<compile_context>
chip_gen: v7x
topology: tpu7x:2x2x1
jax: 0.10.0
libtpu: 0.0.40
codegen_flags: <defaults>
</compile_context>

<pallas_src>
import functools
import math

import jax
import jax.numpy as jnp
from jax.experimental import pallas as pl
from jax.experimental.pallas import tpu as pltpu


# MXU operand dtype (f32 accumulate everywhere); inter-kernel activations are
# also carried in bf16 to halve HBM traffic on the mem-bound path.
MXU_DTYPE = jnp.bfloat16
ACT_DTYPE = jnp.bfloat16
LN_EPS = 1e-5
# 48 MiB: leaves headroom under v7x's 64 MiB physical VMEM while still being
# far above every per-step footprint used here (also fine on v5e/v6e).
VMEM_LIMIT = 48 * 1024 * 1024


def _pick_tile(dim, target):
    """Full dim if small / non-divisible, else the target tile."""
    if dim <= target or dim % target != 0:
        return dim
    return target


def _pick_bt(batch, sp, target_rows=256):
    """Batch elements per attention grid step: amortize per-step overhead but
    keep >=2 grid steps when possible so both v7x TensorCores stay busy."""
    bt = 1
    for cand in range(1, batch + 1):
        if batch % cand:
            continue
        if cand * sp > target_rows:
            continue
        if batch // cand < 2 and batch > 1:
            continue
        bt = cand
    return bt


def _gelu_tanh(x):
    # tanh-approx GELU: the tanh goes to the EUP slot instead of a long VPU
    # polynomial chain.  Max deviation from torch.nn.GELU (exact erf) ~1e-3.
    return 0.5 * x * (1.0 + jnp.tanh(0.7978845608028654 * (x + 0.044715 * x * x * x)))


def _layernorm_f32(x, gamma_ref, beta_ref, eps):
    mean = jnp.mean(x, axis=-1, keepdims=True)
    var = jnp.mean(jnp.square(x - mean), axis=-1, keepdims=True)
    h = (x - mean) * jax.lax.rsqrt(var + eps)
    return h * gamma_ref[...].astype(jnp.float32) + beta_ref[...].astype(jnp.float32)


# ------------------ fused attention block (Bt batches / step) ----------------

def _attn_block_kernel(x_ref, g1_ref, b1_ref, win_ref, bin_ref, wout_ref, bout_ref,
                       o_ref, ctx_ref, *, n_head, scale, s_valid, eps):
    f32 = jnp.float32
    Bt, Sp, D = x_ref.shape
    Dh = D // n_head

    x = x_ref[...].reshape(Bt * Sp, D).astype(f32)              # (M, D), M = Bt*Sp

    # ln_1 fused
    h = _layernorm_f32(x, g1_ref, b1_ref, eps)

    # QKV projection for all heads / batches in one MXU pass (bf16 in, f32 acc)
    qkv = jnp.dot(h.astype(MXU_DTYPE), win_ref[...],
                  preferred_element_type=f32) + bin_ref[...].astype(f32)   # (M, 3D)

    # Causal + key-padding mask generated in-kernel (open_clip causal mask:
    # 0 on/below the diagonal, -inf above).  No (S,S) HBM load.
    row = jax.lax.broadcasted_iota(jnp.int32, (Sp, Sp), 0)
    col = jax.lax.broadcasted_iota(jnp.int32, (Sp, Sp), 1)
    neg = jnp.where((col > row) | (col >= s_valid), -1e30, 0.0).astype(f32)

    # Per-(batch, head) attention; head outputs land in a VMEM scratch so the
    # out-projection is a single full-contraction (M, D) @ (D, D) matmul.
    for b in range(Bt):
        rows = slice(b * Sp, (b + 1) * Sp)
        for hd in range(n_head):
            q = qkv[rows, hd * Dh:(hd + 1) * Dh]
            k = qkv[rows, D + hd * Dh:D + (hd + 1) * Dh]
            v = qkv[rows, 2 * D + hd * Dh:2 * D + (hd + 1) * Dh]
            s = jax.lax.dot_general(q.astype(MXU_DTYPE), k.astype(MXU_DTYPE),
                                    (((1,), (1,)), ((), ())),
                                    preferred_element_type=f32)
            s = s * scale + neg
            s = s - jnp.max(s, axis=-1, keepdims=True)
            p = jnp.exp(s)
            p = p * pl.reciprocal(jnp.sum(p, axis=-1, keepdims=True), approx=True)
            ctx = jnp.dot(p.astype(MXU_DTYPE), v.astype(MXU_DTYPE),
                          preferred_element_type=f32)           # (Sp, Dh)
            ctx_ref[b * Sp:(b + 1) * Sp, hd * Dh:(hd + 1) * Dh] = ctx

    # Single out-projection over all heads/batches (full K=D contraction).
    y = jnp.dot(ctx_ref[...].astype(MXU_DTYPE), wout_ref[...],
                preferred_element_type=f32)
    y = y + bout_ref[...].astype(f32)
    o_ref[...] = (x + y).reshape(Bt, Sp, D).astype(o_ref.dtype)   # residual fused


def attention_block(x, p, n_head, s_valid):
    B, Sp, D = x.shape
    Dh = D // n_head
    Bt = _pick_bt(B, Sp)
    m = B * Sp
    kernel = functools.partial(_attn_block_kernel, n_head=n_head,
                               scale=1.0 / math.sqrt(Dh), s_valid=s_valid, eps=LN_EPS)
    # TODO(synk): single-buffer the constant-index weight BlockSpecs
    # (pipeline_mode=pl.Buffered(1)) once that path is validated on v7x.
    return pl.pallas_call(
        kernel,
        out_shape=jax.ShapeDtypeStruct((B, Sp, D), ACT_DTYPE),
        grid=(B // Bt,),
        in_specs=[pl.BlockSpec((Bt, Sp, D), lambda b: (b, 0, 0)),
                  pl.BlockSpec((1, D), lambda b: (0, 0)),
                  pl.BlockSpec((1, D), lambda b: (0, 0)),
                  pl.BlockSpec((D, 3 * D), lambda b: (0, 0)),
                  pl.BlockSpec((1, 3 * D), lambda b: (0, 0)),
                  pl.BlockSpec((D, D), lambda b: (0, 0)),
                  pl.BlockSpec((1, D), lambda b: (0, 0))],
        out_specs=pl.BlockSpec((Bt, Sp, D), lambda b: (b, 0, 0)),
        scratch_shapes=[pltpu.VMEM((Bt * Sp, D), jnp.float32)],
        compiler_params=pltpu.CompilerParams(
            dimension_semantics=("parallel",),
            vmem_limit_bytes=VMEM_LIMIT),
        cost_estimate=pl.CostEstimate(
            flops=(2 * m * D * 3 * D                    # QKV
                   + 4 * B * n_head * Sp * Sp * Dh      # QK^T and P.V
                   + 2 * m * D * D),                    # out-proj
            transcendentals=B * n_head * Sp * Sp,
            bytes_accessed=2 * m * D * 2 + (3 * D * D + D * D) * 2),
    )(x, p["ln1_g"], p["ln1_b"], p["w_in"], p["b_in"], p["w_out"], p["b_out"])


# -------- fully fused MLP block: ln_2 -> c_fc -> GELU -> c_proj -> +res ------

def _mlp_block_kernel(x_ref, g_ref, b_ref, wfc_ref, bfc_ref, wproj_ref, bproj_ref,
                      o_ref, ln_ref, acc_ref, *, eps):
    f32 = jnp.float32
    kk = pl.program_id(1)

    @pl.when(kk == 0)
    def _():
        # LayerNorm once per row block (not once per mlp-dim tile), cached in
        # VMEM in bf16 for the MXU.
        h = _layernorm_f32(x_ref[...].astype(f32), g_ref, b_ref, eps)
        ln_ref[...] = h.astype(ln_ref.dtype)
        acc_ref[...] = jnp.zeros_like(acc_ref)

    hk = jnp.dot(ln_ref[...], wfc_ref[...], preferred_element_type=f32)
    hk = _gelu_tanh(hk + bfc_ref[...].astype(f32))
    acc_ref[...] += jnp.dot(hk.astype(MXU_DTYPE), wproj_ref[...],
                            preferred_element_type=f32)

    @pl.when(kk == pl.num_programs(1) - 1)
    def _():
        o_ref[...] = (acc_ref[...] + bproj_ref[...].astype(f32)
                      + x_ref[...].astype(f32)).astype(o_ref.dtype)   # residual fused


def mlp_block(x2d, p):
    m, d = x2d.shape
    mlp_dim = p["w_fc"].shape[1]
    tm = _pick_tile(m, 512)
    tk = _pick_tile(mlp_dim, 512)
    kernel = functools.partial(_mlp_block_kernel, eps=LN_EPS)
    return pl.pallas_call(
        kernel,
        out_shape=jax.ShapeDtypeStruct((m, d), ACT_DTYPE),
        grid=(m // tm, mlp_dim // tk),
        in_specs=[pl.BlockSpec((tm, d), lambda i, k: (i, 0)),
                  pl.BlockSpec((1, d), lambda i, k: (0, 0)),
                  pl.BlockSpec((1, d), lambda i, k: (0, 0)),
                  pl.BlockSpec((d, tk), lambda i, k: (0, k)),
                  pl.BlockSpec((1, tk), lambda i, k: (0, k)),
                  pl.BlockSpec((tk, d), lambda i, k: (k, 0)),
                  pl.BlockSpec((1, d), lambda i, k: (0, 0))],
        out_specs=pl.BlockSpec((tm, d), lambda i, k: (i, 0)),
        scratch_shapes=[pltpu.VMEM((tm, d), MXU_DTYPE),      # cached LN(x)
                        pltpu.VMEM((tm, d), jnp.float32)],   # f32 accumulator
        compiler_params=pltpu.CompilerParams(
            dimension_semantics=("parallel", "arbitrary"),
            vmem_limit_bytes=VMEM_LIMIT),
        cost_estimate=pl.CostEstimate(
            flops=4 * m * d * mlp_dim,
            transcendentals=m * mlp_dim,
            bytes_accessed=2 * m * d * 2 + 4 * d * mlp_dim * 2),
    )(x2d, p["ln2_g"], p["ln2_b"], p["w_fc"], p["b_fc"], p["w_proj"], p["b_proj"])


# ---------------- fused ln_final + text_projection (EOT rows) ----------------

def _ln_proj_kernel(x_ref, g_ref, b_ref, w_ref, o_ref, *, eps):
    f32 = jnp.float32
    h = _layernorm_f32(x_ref[...].astype(f32), g_ref, b_ref, eps)
    o_ref[...] = jnp.dot(h.astype(MXU_DTYPE), w_ref[...],
                         preferred_element_type=f32).astype(o_ref.dtype)


def ln_text_projection(feats, gamma, beta, w_proj):
    m, k = feats.shape
    n = w_proj.shape[1]
    tm = _pick_tile(m, 256)
    kernel = functools.partial(_ln_proj_kernel, eps=LN_EPS)
    return pl.pallas_call(
        kernel,
        out_shape=jax.ShapeDtypeStruct((m, n), jnp.float32),
        grid=(m // tm,),
        in_specs=[pl.BlockSpec((tm, k), lambda i: (i, 0)),
                  pl.BlockSpec((1, k), lambda i: (0, 0)),
                  pl.BlockSpec((1, k), lambda i: (0, 0)),
                  pl.BlockSpec((k, n), lambda i: (0, 0))],
        out_specs=pl.BlockSpec((tm, n), lambda i: (i, 0)),
        compiler_params=pltpu.CompilerParams(
            dimension_semantics=("parallel",),
            vmem_limit_bytes=VMEM_LIMIT),
    )(feats, gamma, beta, w_proj)


# ----------------------------- Model assembly --------------------------------

def residual_attention_block(x, p, n_head, s_valid):
    B, Sp, D = x.shape
    # Attention branch (ln_1 + QKV + attention + out_proj + residual), fused.
    x = attention_block(x, p, n_head, s_valid)
    # MLP branch: x = x + c_proj(gelu(c_fc(ln_2(x)))), fully fused — the
    # (m, mlp_dim) GELU intermediate never touches HBM.
    x2 = mlp_block(x.reshape(B * Sp, D), p)
    return x2.reshape(B, Sp, D)


def language_transformer_forward(text, params, n_head):
    B, S = text.shape
    D = params["token_embedding"].shape[1]
    # token embedding lookup + positional embedding (JAX glue; gather has no
    # clean BlockSpec mapping at these sizes).
    x = params["token_embedding"][text] + params["positional_embedding"][None, :S, :]
    x = x.astype(ACT_DTYPE)
    # pad seq to a lane-width multiple (128) so score/softmax tiles are
    # lane-dense and the P.V contraction is full depth; padded key columns are
    # masked in-kernel and padded rows sliced off before the EOT gather.
    Sp = ((S + 127) // 128) * 128
    if Sp != S:
        x = jnp.pad(x, ((0, 0), (0, Sp - S), (0, 0)))
    for blk in params["blocks"]:
        x = residual_attention_block(x, blk, n_head, s_valid=S)
    # EOT token (highest id, CLIP convention) gather, then fused
    # ln_final + text_projection on just the B selected rows (LN is row-wise,
    # so gather/LN commute with the original ln_final-then-gather).
    eot = jnp.argmax(text, axis=-1)
    feats = x[:, :S][jnp.arange(B), eot]                        # (B, D) bf16
    return ln_text_projection(feats, params["lnf_g"], params["lnf_b"],
                              params["text_projection"])


# ----------------------------- Parameter handling ----------------------------

def init_params(key, vocab, seq, width, n_layers, mlp_dim, proj_dim):
    keys = iter(jax.random.split(key, 8 + 8 * n_layers))

    def nrm(shape, scale=0.02):
        return (scale * jax.random.normal(next(keys), shape)).astype(jnp.float32)

    params = {
        "token_embedding": nrm((vocab, width)),
        "positional_embedding": nrm((seq, width), 0.01),
        "lnf_g": jnp.ones((width,), jnp.float32),
        "lnf_b": jnp.zeros((width,), jnp.float32),
        "text_projection": nrm((width, proj_dim), width ** -0.5),
        "blocks": [],
    }
    for _ in range(n_layers):
        params["blocks"].append({
            "ln1_g": jnp.ones((width,), jnp.float32),
            "ln1_b": jnp.zeros((width,), jnp.float32),
            "w_in": nrm((width, 3 * width)),
            "b_in": jnp.zeros((3 * width,), jnp.float32),
            "w_out": nrm((width, width)),
            "b_out": jnp.zeros((width,), jnp.float32),
            "ln2_g": jnp.ones((width,), jnp.float32),
            "ln2_b": jnp.zeros((width,), jnp.float32),
            "w_fc": nrm((width, mlp_dim)),
            "b_fc": jnp.zeros((mlp_dim,), jnp.float32),
            "w_proj": nrm((mlp_dim, width)),
            "b_proj": jnp.zeros((width,), jnp.float32),
        })
    return params


def prepare_params(params):
    """One-time (outside jit) preparation: pre-cast every matmul weight to
    bf16 so no per-forward f32->bf16 convert (full HBM read+write per weight)
    is emitted, and reshape 1-D params to (1, n) row vectors."""
    row = lambda v: v.reshape(1, -1).astype(jnp.float32)
    out = {
        "token_embedding": params["token_embedding"],
        "positional_embedding": params["positional_embedding"],
        "lnf_g": row(params["lnf_g"]),
        "lnf_b": row(params["lnf_b"]),
        "text_projection": params["text_projection"].astype(MXU_DTYPE),
        "blocks": [],
    }
    for blk in params["blocks"]:
        out["blocks"].append({
            "ln1_g": row(blk["ln1_g"]), "ln1_b": row(blk["ln1_b"]),
            "w_in": blk["w_in"].astype(MXU_DTYPE), "b_in": row(blk["b_in"]),
            "w_out": blk["w_out"].astype(MXU_DTYPE), "b_out": row(blk["b_out"]),
            "ln2_g": row(blk["ln2_g"]), "ln2_b": row(blk["ln2_b"]),
            "w_fc": blk["w_fc"].astype(MXU_DTYPE), "b_fc": row(blk["b_fc"]),
            "w_proj": blk["w_proj"].astype(MXU_DTYPE), "b_proj": row(blk["b_proj"]),
        })
    return out


# --------------------------------- Main ---------------------------------------

if __name__ == "__main__":
    B, S, D, H, L = 2, 8, 32, 2, 2
    MLP_DIM, VOCAB, PROJ = 4 * D, 64, 16

    key = jax.random.PRNGKey(0)
    pkey, tkey = jax.random.split(key)
    params = prepare_params(init_params(pkey, VOCAB, S, D, L, MLP_DIM, PROJ))

    # text tokens (int32); argmax over seq picks the "EOT" position.
    text = jax.random.randint(tkey, (B, S), 1, VOCAB, dtype=jnp.int32)

    # NOTE: the module's registered attn_mask buffer is the standard open_clip
    # causal mask (0 on/below the diagonal, -inf above); it is generated
    # in-kernel via iota instead of being loaded from HBM.

    @jax.jit
    def fwd(text, params):
        return language_transformer_forward(text, params, n_head=H)

    out = jax.block_until_ready(fwd(text, params))

    assert out.shape == (B, PROJ), out.shape
    assert bool(jnp.all(jnp.isfinite(out)))
    print("KERNEL_OK")
</pallas_src>

<mosaic_0001>
module attributes {stable_mosaic.version = 11 : i64} {
  func.func @_attn_block_kernel(%arg0: i32, %arg1: memref<1x128x32xbf16, #tpu.memory_space<vmem>>, %arg2: memref<1x32xf32, #tpu.memory_space<vmem>>, %arg3: memref<1x32xf32, #tpu.memory_space<vmem>>, %arg4: memref<32x96xbf16, #tpu.memory_space<vmem>>, %arg5: memref<1x96xf32, #tpu.memory_space<vmem>>, %arg6: memref<32x32xbf16, #tpu.memory_space<vmem>>, %arg7: memref<1x32xf32, #tpu.memory_space<vmem>>, %arg8: memref<1x128x32xbf16, #tpu.memory_space<vmem>>, %arg9: memref<128x32xf32, #tpu.memory_space<vmem>>) attributes {dimension_semantics = [#tpu.dimension_semantics<parallel>], iteration_bounds = array<i64: 2>, scalar_prefetch = 0 : i64, scratch_operands = 1 : i64, tpu.core_type = #tpu.core_type<tc>, window_params = [{transform_indices = @transform_0, window_bounds = array<i64: 1, 128, 32>}, {pipeline_mode = #tpu.pipeline_mode<synchronous>, transform_indices = @transform_1, window_bounds = array<i64: 1, 32>}, {pipeline_mode = #tpu.pipeline_mode<synchronous>, transform_indices = @transform_2, window_bounds = array<i64: 1, 32>}, {pipeline_mode = #tpu.pipeline_mode<synchronous>, transform_indices = @transform_3, window_bounds = array<i64: 32, 96>}, {pipeline_mode = #tpu.pipeline_mode<synchronous>, transform_indices = @transform_4, window_bounds = array<i64: 1, 96>}, {pipeline_mode = #tpu.pipeline_mode<synchronous>, transform_indices = @transform_5, window_bounds = array<i64: 32, 32>}, {pipeline_mode = #tpu.pipeline_mode<synchronous>, transform_indices = @transform_6, window_bounds = array<i64: 1, 32>}, {transform_indices = @transform_7, window_bounds = array<i64: 1, 128, 32>}]} {
    %c0 = arith.constant 0 : index
    %c0_0 = arith.constant 0 : index
    %c0_1 = arith.constant 0 : index
    %0 = vector.load %arg1[%c0, %c0_0, %c0_1] : memref<1x128x32xbf16, #tpu.memory_space<vmem>>, vector<1x128x32xbf16>
    %1 = vector.shape_cast %0 : vector<1x128x32xbf16> to vector<128x32xbf16>
    %2 = arith.extf %1 : vector<128x32xbf16> to vector<128x32xf32>
    %cst = arith.constant dense<0.000000e+00> : vector<128xf32>
    %3 = vector.multi_reduction <add>, %2, %cst [1] : vector<128x32xf32> to vector<128xf32>
    %4 = vector.shape_cast %3 : vector<128xf32> to vector<128x1xf32>
    %cst_2 = arith.constant 3.200000e+01 : f32
    %5 = vector.broadcast %cst_2 : f32 to vector<128x1xf32>
    %6 = arith.divf %4, %5 : vector<128x1xf32>
    %7 = vector.broadcast %6 : vector<128x1xf32> to vector<128x32xf32>
    %8 = arith.subf %2, %7 : vector<128x32xf32>
    %9 = arith.mulf %8, %8 : vector<128x32xf32>
    %cst_3 = arith.constant dense<0.000000e+00> : vector<128xf32>
    %10 = vector.multi_reduction <add>, %9, %cst_3 [1] : vector<128x32xf32> to vector<128xf32>
    %11 = vector.shape_cast %10 : vector<128xf32> to vector<128x1xf32>
    %cst_4 = arith.constant 3.200000e+01 : f32
    %12 = vector.broadcast %cst_4 : f32 to vector<128x1xf32>
    %13 = arith.divf %11, %12 : vector<128x1xf32>
    %14 = vector.broadcast %6 : vector<128x1xf32> to vector<128x32xf32>
    %15 = arith.subf %2, %14 : vector<128x32xf32>
    %cst_5 = arith.constant 9.99999974E-6 : f32
    %16 = vector.broadcast %cst_5 : f32 to vector<128x1xf32>
    %17 = arith.addf %13, %16 : vector<128x1xf32>
    %18 = math.rsqrt %17 : vector<128x1xf32>
    %19 = vector.broadcast %18 : vector<128x1xf32> to vector<128x32xf32>
    %20 = arith.mulf %15, %19 : vector<128x32xf32>
    %c0_6 = arith.constant 0 : index
    %c0_7 = arith.constant 0 : index
    %21 = vector.load %arg2[%c0_6, %c0_7] : memref<1x32xf32, #tpu.memory_space<vmem>>, vector<1x32xf32>
    %22 = vector.broadcast %21 : vector<1x32xf32> to vector<128x32xf32>
    %23 = arith.mulf %20, %22 : vector<128x32xf32>
    %c0_8 = arith.constant 0 : index
    %c0_9 = arith.constant 0 : index
    %24 = vector.load %arg3[%c0_8, %c0_9] : memref<1x32xf32, #tpu.memory_space<vmem>>, vector<1x32xf32>
    %25 = vector.broadcast %24 : vector<1x32xf32> to vector<128x32xf32>
    %26 = arith.addf %23, %25 : vector<128x32xf32>
    %27 = arith.truncf %26 : vector<128x32xf32> to vector<128x32xbf16>
    %c0_10 = arith.constant 0 : index
    %c0_11 = arith.constant 0 : index
    %28 = vector.load %arg4[%c0_10, %c0_11] : memref<32x96xbf16, #tpu.memory_space<vmem>>, vector<32x96xbf16>
    %cst_12 = arith.constant dense<0.000000e+00> : vector<128x96xf32>
    %29 = tpu.matmul %27, %28, %cst_12 {dimension_numbers = #tpu.dot_dimension_numbers<[1], [0], [0], [1], [0, 0, 1, 1], [], []>} : vector<128x32xbf16>, vector<32x96xbf16>, vector<128x96xf32> -> vector<128x96xf32>
    %c0_13 = arith.constant 0 : index
    %c0_14 = arith.constant 0 : index
    %30 = vector.load %arg5[%c0_13, %c0_14] : memref<1x96xf32, #tpu.memory_space<vmem>>, vector<1x96xf32>
    %31 = vector.broadcast %30 : vector<1x96xf32> to vector<128x96xf32>
    %32 = arith.addf %29, %31 : vector<128x96xf32>
    %33 = tpu.iota {dimensions = array<i32: 0>} : vector<128x128xi32>
    %34 = tpu.iota {dimensions = array<i32: 1>} : vector<128x128xi32>
    %35 = arith.cmpi sgt, %34, %33 : vector<128x128xi32>
    %c8_i32 = arith.constant 8 : i32
    %36 = vector.broadcast %c8_i32 : i32 to vector<128x128xi32>
    %37 = arith.cmpi sge, %34, %36 : vector<128x128xi32>
    %38 = arith.ori %35, %37 : vector<128x128xi1>
    %cst_15 = arith.constant -1.000000e+30 : f32
    %cst_16 = arith.constant 0.000000e+00 : f32
    %39 = vector.broadcast %cst_15 : f32 to vector<128x128xf32>
    %40 = vector.broadcast %cst_16 : f32 to vector<128x128xf32>
    %41 = arith.select %38, %39, %40 : vector<128x128xi1>, vector<128x128xf32>
    %42 = vector.extract_strided_slice %32 {offsets = [0, 0], sizes = [128, 16], strides = [1, 1]} : vector<128x96xf32> to vector<128x16xf32>
    %43 = vector.extract_strided_slice %32 {offsets = [0, 32], sizes = [128, 16], strides = [1, 1]} : vector<128x96xf32> to vector<128x16xf32>
    %44 = vector.extract_strided_slice %32 {offsets = [0, 64], sizes = [128, 16], strides = [1, 1]} : vector<128x96xf32> to vector<128x16xf32>
    %45 = arith.truncf %42 : vector<128x16xf32> to vector<128x16xbf16>
    %46 = arith.truncf %43 : vector<128x16xf32> to vector<128x16xbf16>
    %cst_17 = arith.constant dense<0.000000e+00> : vector<128x128xf32>
    %47 = tpu.matmul %45, %46, %cst_17 {dimension_numbers = #tpu.dot_dimension_numbers<[1], [1], [0], [0], [0, 0, 1, 0], [], []>} : vector<128x16xbf16>, vector<128x16xbf16>, vector<128x128xf32> -> vector<128x128xf32>
    %cst_18 = arith.constant 2.500000e-01 : f32
    %48 = vector.broadcast %cst_18 : f32 to vector<128x128xf32>
    %49 = arith.mulf %47, %48 : vector<128x128xf32>
    %50 = arith.addf %49, %41 : vector<128x128xf32>
    %cst_19 = arith.constant dense<0xFF800000> : vector<128xf32>
    %51 = vector.multi_reduction <maximumf>, %50, %cst_19 [1] : vector<128x128xf32> to vector<128xf32>
    %52 = vector.shape_cast %51 : vector<128xf32> to vector<128x1xf32>
    %53 = vector.broadcast %52 : vector<128x1xf32> to vector<128x128xf32>
    %54 = arith.subf %50, %53 : vector<128x128xf32>
    %55 = math.exp %54 : vector<128x128xf32>
    %cst_20 = arith.constant dense<0.000000e+00> : vector<128xf32>
    %56 = vector.multi_reduction <add>, %55, %cst_20 [1] : vector<128x128xf32> to vector<128xf32>
    %57 = vector.shape_cast %56 : vector<128xf32> to vector<128x1xf32>
    %58 = tpu.reciprocal %57 {approx = true} : vector<128x1xf32> -> vector<128x1xf32>
    %59 = vector.broadcast %58 : vector<128x1xf32> to vector<128x128xf32>
    %60 = arith.mulf %55, %59 : vector<128x128xf32>
    %61 = arith.truncf %60 : vector<128x128xf32> to vector<128x128xbf16>
    %62 = arith.truncf %44 : vector<128x16xf32> to vector<128x16xbf16>
    %cst_21 = arith.constant dense<0.000000e+00> : vector<128x16xf32>
    %63 = tpu.matmul %61, %62, %cst_21 {dimension_numbers = #tpu.dot_dimension_numbers<[1], [0], [0], [1], [0, 0, 1, 1], [], []>} : vector<128x128xbf16>, vector<128x16xbf16>, vector<128x16xf32> -> vector<128x16xf32>
    %c0_22 = arith.constant 0 : index
    %c0_23 = arith.constant 0 : index
    %64 = vector.load %arg9[%c0_22, %c0_23] : memref<128x32xf32, #tpu.memory_space<vmem>>, vector<128x16xf32>
    tpu.vector_store %arg9[%c0_22, %c0_23], %63 {strides = array<i32>} : memref<128x32xf32, #tpu.memory_space<vmem>>, vector<128x16xf32>,
    %65 = vector.extract_strided_slice %32 {offsets = [0, 16], sizes = [128, 16], strides = [1, 1]} : vector<128x96xf32> to vector<128x16xf32>
    %66 = vector.extract_strided_slice %32 {offsets = [0, 48], sizes = [128, 16], strides = [1, 1]} : vector<128x96xf32> to vector<128x16xf32>
    %67 = vector.extract_strided_slice %32 {offsets = [0, 80], sizes = [128, 16], strides = [1, 1]} : vector<128x96xf32> to vector<128x16xf32>
    %68 = arith.truncf %65 : vector<128x16xf32> to vector<128x16xbf16>
    %69 = arith.truncf %66 : vector<128x16xf32> to vector<128x16xbf16>
    %cst_24 = arith.constant dense<0.000000e+00> : vector<128x128xf32>
    %70 = tpu.matmul %68, %69, %cst_24 {dimension_numbers = #tpu.dot_dimension_numbers<[1], [1], [0], [0], [0, 0, 1, 0], [], []>} : vector<128x16xbf16>, vector<128x16xbf16>, vector<128x128xf32> -> vector<128x128xf32>
    %cst_25 = arith.constant 2.500000e-01 : f32
    %71 = vector.broadcast %cst_25 : f32 to vector<128x128xf32>
    %72 = arith.mulf %70, %71 : vector<128x128xf32>
    %73 = arith.addf %72, %41 : vector<128x128xf32>
    %cst_26 = arith.constant dense<0xFF800000> : vector<128xf32>
    %74 = vector.multi_reduction <maximumf>, %73, %cst_26 [1] : vector<128x128xf32> to vector<128xf32>
    %75 = vector.shape_cast %74 : vector<128xf32> to vector<128x1xf32>
    %76 = vector.broadcast %75 : vector<128x1xf32> to vector<128x128xf32>
    %77 = arith.subf %73, %76 : vector<128x128xf32>
    %78 = math.exp %77 : vector<128x128xf32>
    %cst_27 = arith.constant dense<0.000000e+00> : vector<128xf32>
    %79 = vector.multi_reduction <add>, %78, %cst_27 [1] : vector<128x128xf32> to vector<128xf32>
    %80 = vector.shape_cast %79 : vector<128xf32> to vector<128x1xf32>
    %81 = tpu.reciprocal %80 {approx = true} : vector<128x1xf32> -> vector<128x1xf32>
    %82 = vector.broadcast %81 : vector<128x1xf32> to vector<128x128xf32>
    %83 = arith.mulf %78, %82 : vector<128x128xf32>
    %84 = arith.truncf %83 : vector<128x128xf32> to vector<128x128xbf16>
    %85 = arith.truncf %67 : vector<128x16xf32> to vector<128x16xbf16>
    %cst_28 = arith.constant dense<0.000000e+00> : vector<128x16xf32>
    %86 = tpu.matmul %84, %85, %cst_28 {dimension_numbers = #tpu.dot_dimension_numbers<[1], [0], [0], [1], [0, 0, 1, 1], [], []>} : vector<128x128xbf16>, vector<128x16xbf16>, vector<128x16xf32> -> vector<128x16xf32>
    %c0_29 = arith.constant 0 : index
    %c16 = arith.constant 16 : index
    %87 = vector.load %arg9[%c0_29, %c16] : memref<128x32xf32, #tpu.memory_space<vmem>>, vector<128x16xf32>
    tpu.vector_store %arg9[%c0_29, %c16], %86 {strides = array<i32>} : memref<128x32xf32, #tpu.memory_space<vmem>>, vector<128x16xf32>,
    %c0_30 = arith.constant 0 : index
    %c0_31 = arith.constant 0 : index
    %88 = vector.load %arg9[%c0_30, %c0_31] : memref<128x32xf32, #tpu.memory_space<vmem>>, vector<128x32xf32>
    %89 = arith.truncf %88 : vector<128x32xf32> to vector<128x32xbf16>
    %c0_32 = arith.constant 0 : index
    %c0_33 = arith.constant 0 : index
    %90 = vector.load %arg6[%c0_32, %c0_33] : memref<32x32xbf16, #tpu.memory_space<vmem>>, vector<32x32xbf16>
    %cst_34 = arith.constant dense<0.000000e+00> : vector<128x32xf32>
    %91 = tpu.matmul %89, %90, %cst_34 {dimension_numbers = #tpu.dot_dimension_numbers<[1], [0], [0], [1], [0, 0, 1, 1], [], []>} : vector<128x32xbf16>, vector<32x32xbf16>, vector<128x32xf32> -> vector<128x32xf32>
    %c0_35 = arith.constant 0 : index
    %c0_36 = arith.constant 0 : index
    %92 = vector.load %arg7[%c0_35, %c0_36] : memref<1x32xf32, #tpu.memory_space<vmem>>, vector<1x32xf32>
    %93 = vector.broadcast %92 : vector<1x32xf32> to vector<128x32xf32>
    %94 = arith.addf %91, %93 : vector<128x32xf32>
    %95 = arith.addf %2, %94 : vector<128x32xf32>
    %96 = vector.shape_cast %95 : vector<128x32xf32> to vector<1x128x32xf32>
    %97 = arith.truncf %96 : vector<1x128x32xf32> to vector<1x128x32xbf16>
    %c0_37 = arith.constant 0 : index
    %c0_38 = arith.constant 0 : index
    %c0_39 = arith.constant 0 : index
    %98 = vector.load %arg8[%c0_37, %c0_38, %c0_39] : memref<1x128x32xbf16, #tpu.memory_space<vmem>>, vector<1x128x32xbf16>
    tpu.vector_store %arg8[%c0_37, %c0_38, %c0_39], %97 {strides = array<i32>} : memref<1x128x32xbf16, #tpu.memory_space<vmem>>, vector<1x128x32xbf16>,
    return
  }
  func.func @transform_0(%arg0: i32) -> (i32, i32, i32) {
    %c0_i32 = arith.constant 0 : i32
    %c0_i32_0 = arith.constant 0 : i32
    %c0_i32_1 = arith.constant 0 : i32
    return %arg0, %c0_i32, %c0_i32_0 : i32, i32, i32
  }
  func.func @transform_1(%arg0: i32) -> (i32, i32) {
    %c0_i32 = arith.constant 0 : i32
    %c0_i32_0 = arith.constant 0 : i32
    %c0_i32_1 = arith.constant 0 : i32
    return %c0_i32, %c0_i32_0 : i32, i32
  }
  func.func @transform_2(%arg0: i32) -> (i32, i32) {
    %c0_i32 = arith.constant 0 : i32
    %c0_i32_0 = arith.constant 0 : i32
    %c0_i32_1 = arith.constant 0 : i32
    return %c0_i32, %c0_i32_0 : i32, i32
  }
  func.func @transform_3(%arg0: i32) -> (i32, i32) {
    %c0_i32 = arith.constant 0 : i32
    %c0_i32_0 = arith.constant 0 : i32
    %c0_i32_1 = arith.constant 0 : i32
    return %c0_i32, %c0_i32_0 : i32, i32
  }
  func.func @transform_4(%arg0: i32) -> (i32, i32) {
    %c0_i32 = arith.constant 0 : i32
    %c0_i32_0 = arith.constant 0 : i32
    %c0_i32_1 = arith.constant 0 : i32
    return %c0_i32, %c0_i32_0 : i32, i32
  }
  func.func @transform_5(%arg0: i32) -> (i32, i32) {
    %c0_i32 = arith.constant 0 : i32
    %c0_i32_0 = arith.constant 0 : i32
    %c0_i32_1 = arith.constant 0 : i32
    return %c0_i32, %c0_i32_0 : i32, i32
  }
  func.func @transform_6(%arg0: i32) -> (i32, i32) {
    %c0_i32 = arith.constant 0 : i32
    %c0_i32_0 = arith.constant 0 : i32
    %c0_i32_1 = arith.constant 0 : i32
    return %c0_i32, %c0_i32_0 : i32, i32
  }
  func.func @transform_7(%arg0: i32) -> (i32, i32, i32) {
    %c0_i32 = arith.constant 0 : i32
    %c0_i32_0 = arith.constant 0 : i32
    %c0_i32_1 = arith.constant 0 : i32
    return %arg0, %c0_i32, %c0_i32_0 : i32, i32, i32
  }
}

module attributes {stable_mosaic.version = 11 : i64} {
  func.func @_ln_proj_kernel(%arg0: i32, %arg1: memref<2x32xbf16, #tpu.memory_space<vmem>>, %arg2: memref<1x32xf32, #tpu.memory_space<vmem>>, %arg3: memref<1x32xf32, #tpu.memory_space<vmem>>, %arg4: memref<32x16xbf16, #tpu.memory_space<vmem>>, %arg5: memref<2x16xf32, #tpu.memory_space<vmem>>) attributes {dimension_semantics = [#tpu.dimension_semantics<parallel>], iteration_bounds = array<i64: 1>, scalar_prefetch = 0 : i64, scratch_operands = 0 : i64, tpu.core_type = #tpu.core_type<tc>, window_params = [{transform_indices = @transform_0, window_bounds = array<i64: 2, 32>}, {pipeline_mode = #tpu.pipeline_mode<synchronous>, transform_indices = @transform_1, window_bounds = array<i64: 1, 32>}, {pipeline_mode = #tpu.pipeline_mode<synchronous>, transform_indices = @transform_2, window_bounds = array<i64: 1, 32>}, {pipeline_mode = #tpu.pipeline_mode<synchronous>, transform_indices = @transform_3, window_bounds = array<i64: 32, 16>}, {transform_indices = @transform_4, window_bounds = array<i64: 2, 16>}]} {
    %c0 = arith.constant 0 : index
    %c0_0 = arith.constant 0 : index
    %0 = vector.load %arg1[%c0, %c0_0] : memref<2x32xbf16, #tpu.memory_space<vmem>>, vector<2x32xbf16>
    %1 = arith.extf %0 : vector<2x32xbf16> to vector<2x32xf32>
    %cst = arith.constant dense<0.000000e+00> : vector<2xf32>
    %2 = vector.multi_reduction <add>, %1, %cst [1] : vector<2x32xf32> to vector<2xf32>
    %3 = vector.shape_cast %2 : vector<2xf32> to vector<2x1xf32>
    %cst_1 = arith.constant 3.200000e+01 : f32
    %4 = vector.broadcast %cst_1 : f32 to vector<2x1xf32>
    %5 = arith.divf %3, %4 : vector<2x1xf32>
    %6 = vector.broadcast %5 : vector<2x1xf32> to vector<2x32xf32>
    %7 = arith.subf %1, %6 : vector<2x32xf32>
    %8 = arith.mulf %7, %7 : vector<2x32xf32>
    %cst_2 = arith.constant dense<0.000000e+00> : vector<2xf32>
    %9 = vector.multi_reduction <add>, %8, %cst_2 [1] : vector<2x32xf32> to vector<2xf32>
    %10 = vector.shape_cast %9 : vector<2xf32> to vector<2x1xf32>
    %cst_3 = arith.constant 3.200000e+01 : f32
    %11 = vector.broadcast %cst_3 : f32 to vector<2x1xf32>
    %12 = arith.divf %10, %11 : vector<2x1xf32>
    %13 = vector.broadcast %5 : vector<2x1xf32> to vector<2x32xf32>
    %14 = arith.subf %1, %13 : vector<2x32xf32>
    %cst_4 = arith.constant 9.99999974E-6 : f32
    %15 = vector.broadcast %cst_4 : f32 to vector<2x1xf32>
    %16 = arith.addf %12, %15 : vector<2x1xf32>
    %17 = math.rsqrt %16 : vector<2x1xf32>
    %18 = vector.broadcast %17 : vector<2x1xf32> to vector<2x32xf32>
    %19 = arith.mulf %14, %18 : vector<2x32xf32>
    %c0_5 = arith.constant 0 : index
    %c0_6 = arith.constant 0 : index
    %20 = vector.load %arg2[%c0_5, %c0_6] : memref<1x32xf32, #tpu.memory_space<vmem>>, vector<1x32xf32>
    %21 = vector.broadcast %20 : vector<1x32xf32> to vector<2x32xf32>
    %22 = arith.mulf %19, %21 : vector<2x32xf32>
    %c0_7 = arith.constant 0 : index
    %c0_8 = arith.constant 0 : index
    %23 = vector.load %arg3[%c0_7, %c0_8] : memref<1x32xf32, #tpu.memory_space<vmem>>, vector<1x32xf32>
    %24 = vector.broadcast %23 : vector<1x32xf32> to vector<2x32xf32>
    %25 = arith.addf %22, %24 : vector<2x32xf32>
    %26 = arith.truncf %25 : vector<2x32xf32> to vector<2x32xbf16>
    %c0_9 = arith.constant 0 : index
    %c0_10 = arith.constant 0 : index
    %27 = vector.load %arg4[%c0_9, %c0_10] : memref<32x16xbf16, #tpu.memory_space<vmem>>, vector<32x16xbf16>
    %cst_11 = arith.constant dense<0.000000e+00> : vector<2x16xf32>
    %28 = tpu.matmul %26, %27, %cst_11 {dimension_numbers = #tpu.dot_dimension_numbers<[1], [0], [0], [1], [0, 0, 1, 1], [], []>} : vector<2x32xbf16>, vector<32x16xbf16>, vector<2x16xf32> -> vector<2x16xf32>
    %c0_12 = arith.constant 0 : index
    %c0_13 = arith.constant 0 : index
    %29 = vector.load %arg5[%c0_12, %c0_13] : memref<2x16xf32, #tpu.memory_space<vmem>>, vector<2x16xf32>
    tpu.vector_store %arg5[%c0_12, %c0_13], %28 {strides = array<i32>} : memref<2x16xf32, #tpu.memory_space<vmem>>, vector<2x16xf32>,
    return
  }
  func.func @transform_0(%arg0: i32) -> (i32, i32) {
    %c0_i32 = arith.constant 0 : i32
    %c0_i32_0 = arith.constant 0 : i32
    return %arg0, %c0_i32 : i32, i32
  }
  func.func @transform_1(%arg0: i32) -> (i32, i32) {
    %c0_i32 = arith.constant 0 : i32
    %c0_i32_0 = arith.constant 0 : i32
    %c0_i32_1 = arith.constant 0 : i32
    return %c0_i32, %c0_i32_0 : i32, i32
  }
  func.func @transform_2(%arg0: i32) -> (i32, i32) {
    %c0_i32 = arith.constant 0 : i32
    %c0_i32_0 = arith.constant 0 : i32
    %c0_i32_1 = arith.constant 0 : i32
    return %c0_i32, %c0_i32_0 : i32, i32
  }
  func.func @transform_3(%arg0: i32) -> (i32, i32) {
    %c0_i32 = arith.constant 0 : i32
    %c0_i32_0 = arith.constant 0 : i32
    %c0_i32_1 = arith.constant 0 : i32
    return %c0_i32, %c0_i32_0 : i32, i32
  }
  func.func @transform_4(%arg0: i32) -> (i32, i32) {
    %c0_i32 = arith.constant 0 : i32
    %c0_i32_0 = arith.constant 0 : i32
    return %arg0, %c0_i32 : i32, i32
  }
}

module attributes {stable_mosaic.version = 11 : i64} {
  func.func @_mlp_block_kernel(%arg0: i32, %arg1: i32, %arg2: memref<256x32xbf16, #tpu.memory_space<vmem>>, %arg3: memref<1x32xf32, #tpu.memory_space<vmem>>, %arg4: memref<1x32xf32, #tpu.memory_space<vmem>>, %arg5: memref<32x128xbf16, #tpu.memory_space<vmem>>, %arg6: memref<1x128xf32, #tpu.memory_space<vmem>>, %arg7: memref<128x32xbf16, #tpu.memory_space<vmem>>, %arg8: memref<1x32xf32, #tpu.memory_space<vmem>>, %arg9: memref<256x32xbf16, #tpu.memory_space<vmem>>, %arg10: memref<256x32xbf16, #tpu.memory_space<vmem>>, %arg11: memref<256x32xf32, #tpu.memory_space<vmem>>) attributes {dimension_semantics = [#tpu.dimension_semantics<parallel>, #tpu.dimension_semantics<arbitrary>], iteration_bounds = array<i64: 1, 1>, scalar_prefetch = 0 : i64, scratch_operands = 2 : i64, tpu.core_type = #tpu.core_type<tc>, window_params = [{transform_indices = @transform_0, window_bounds = array<i64: 256, 32>}, {pipeline_mode = #tpu.pipeline_mode<synchronous>, transform_indices = @transform_1, window_bounds = array<i64: 1, 32>}, {pipeline_mode = #tpu.pipeline_mode<synchronous>, transform_indices = @transform_2, window_bounds = array<i64: 1, 32>}, {transform_indices = @transform_3, window_bounds = array<i64: 32, 128>}, {transform_indices = @transform_4, window_bounds = array<i64: 1, 128>}, {transform_indices = @transform_5, window_bounds = array<i64: 128, 32>}, {pipeline_mode = #tpu.pipeline_mode<synchronous>, transform_indices = @transform_6, window_bounds = array<i64: 1, 32>}, {transform_indices = @transform_7, window_bounds = array<i64: 256, 32>}]} {
    %c0_i32 = arith.constant 0 : i32
    %0 = arith.cmpi eq, %arg1, %c0_i32 : i32
    %1 = arith.extui %0 : i1 to i32
    %c0_i32_0 = arith.constant 0 : i32
    %2 = arith.cmpi ne, %1, %c0_i32_0 : i32
    scf.if %2 {
      %c0_19 = arith.constant 0 : index
      %c0_20 = arith.constant 0 : index
      %31 = vector.load %arg2[%c0_19, %c0_20] : memref<256x32xbf16, #tpu.memory_space<vmem>>, vector<256x32xbf16>
      %32 = arith.extf %31 : vector<256x32xbf16> to vector<256x32xf32>
      %cst_21 = arith.constant dense<0.000000e+00> : vector<256xf32>
      %33 = vector.multi_reduction <add>, %32, %cst_21 [1] : vector<256x32xf32> to vector<256xf32>
      %34 = vector.shape_cast %33 : vector<256xf32> to vector<256x1xf32>
      %cst_22 = arith.constant 3.200000e+01 : f32
      %35 = vector.broadcast %cst_22 : f32 to vector<256x1xf32>
      %36 = arith.divf %34, %35 : vector<256x1xf32>
      %37 = vector.broadcast %36 : vector<256x1xf32> to vector<256x32xf32>
      %38 = arith.subf %32, %37 : vector<256x32xf32>
      %39 = arith.mulf %38, %38 : vector<256x32xf32>
      %cst_23 = arith.constant dense<0.000000e+00> : vector<256xf32>
      %40 = vector.multi_reduction <add>, %39, %cst_23 [1] : vector<256x32xf32> to vector<256xf32>
      %41 = vector.shape_cast %40 : vector<256xf32> to vector<256x1xf32>
      %cst_24 = arith.constant 3.200000e+01 : f32
      %42 = vector.broadcast %cst_24 : f32 to vector<256x1xf32>
      %43 = arith.divf %41, %42 : vector<256x1xf32>
      %44 = vector.broadcast %36 : vector<256x1xf32> to vector<256x32xf32>
      %45 = arith.subf %32, %44 : vector<256x32xf32>
      %cst_25 = arith.constant 9.99999974E-6 : f32
      %46 = vector.broadcast %cst_25 : f32 to vector<256x1xf32>
      %47 = arith.addf %43, %46 : vector<256x1xf32>
      %48 = math.rsqrt %47 : vector<256x1xf32>
      %49 = vector.broadcast %48 : vector<256x1xf32> to vector<256x32xf32>
      %50 = arith.mulf %45, %49 : vector<256x32xf32>
      %c0_26 = arith.constant 0 : index
      %c0_27 = arith.constant 0 : index
      %51 = vector.load %arg3[%c0_26, %c0_27] : memref<1x32xf32, #tpu.memory_space<vmem>>, vector<1x32xf32>
      %52 = vector.broadcast %51 : vector<1x32xf32> to vector<256x32xf32>
      %53 = arith.mulf %50, %52 : vector<256x32xf32>
      %c0_28 = arith.constant 0 : index
      %c0_29 = arith.constant 0 : index
      %54 = vector.load %arg4[%c0_28, %c0_29] : memref<1x32xf32, #tpu.memory_space<vmem>>, vector<1x32xf32>
      %55 = vector.broadcast %54 : vector<1x32xf32> to vector<256x32xf32>
      %56 = arith.addf %53, %55 : vector<256x32xf32>
      %57 = arith.truncf %56 : vector<256x32xf32> to vector<256x32xbf16>
      %c0_30 = arith.constant 0 : index
      %c0_31 = arith.constant 0 : index
      %58 = vector.load %arg10[%c0_30, %c0_31] : memref<256x32xbf16, #tpu.memory_space<vmem>>, vector<256x32xbf16>
      tpu.vector_store %arg10[%c0_30, %c0_31], %57 {strides = array<i32>} : memref<256x32xbf16, #tpu.memory_space<vmem>>, vector<256x32xbf16>,
      %cst_32 = arith.constant 0.000000e+00 : f32
      %59 = vector.broadcast %cst_32 : f32 to vector<256x32xf32>
      %c0_33 = arith.constant 0 : index
      %c0_34 = arith.constant 0 : index
      %60 = vector.load %arg11[%c0_33, %c0_34] : memref<256x32xf32, #tpu.memory_space<vmem>>, vector<256x32xf32>
      tpu.vector_store %arg11[%c0_33, %c0_34], %59 {strides = array<i32>} : memref<256x32xf32, #tpu.memory_space<vmem>>, vector<256x32xf32>,
    } else {
    }
    %c0 = arith.constant 0 : index
    %c0_1 = arith.constant 0 : index
    %3 = vector.load %arg10[%c0, %c0_1] : memref<256x32xbf16, #tpu.memory_space<vmem>>, vector<256x32xbf16>
    %c0_2 = arith.constant 0 : index
    %c0_3 = arith.constant 0 : index
    %4 = vector.load %arg5[%c0_2, %c0_3] : memref<32x128xbf16, #tpu.memory_space<vmem>>, vector<32x128xbf16>
    %cst = arith.constant dense<0.000000e+00> : vector<256x128xf32>
    %5 = tpu.matmul %3, %4, %cst {dimension_numbers = #tpu.dot_dimension_numbers<[1], [0], [0], [1], [0, 0, 1, 1], [], []>} : vector<256x32xbf16>, vector<32x128xbf16>, vector<256x128xf32> -> vector<256x128xf32>
    %c0_4 = arith.constant 0 : index
    %c0_5 = arith.constant 0 : index
    %6 = vector.load %arg6[%c0_4, %c0_5] : memref<1x128xf32, #tpu.memory_space<vmem>>, vector<1x128xf32>
    %7 = vector.broadcast %6 : vector<1x128xf32> to vector<256x128xf32>
    %8 = arith.addf %5, %7 : vector<256x128xf32>
    %cst_6 = arith.constant 5.000000e-01 : f32
    %9 = vector.broadcast %cst_6 : f32 to vector<256x128xf32>
    %10 = arith.mulf %9, %8 : vector<256x128xf32>
    %cst_7 = arith.constant 4.471500e-02 : f32
    %11 = vector.broadcast %cst_7 : f32 to vector<256x128xf32>
    %12 = arith.mulf %11, %8 : vector<256x128xf32>
    %13 = arith.mulf %12, %8 : vector<256x128xf32>
    %14 = arith.mulf %13, %8 : vector<256x128xf32>
    %15 = arith.addf %8, %14 : vector<256x128xf32>
    %cst_8 = arith.constant 0.797884583 : f32
    %16 = vector.broadcast %cst_8 : f32 to vector<256x128xf32>
    %17 = arith.mulf %16, %15 : vector<256x128xf32>
    %18 = math.tanh %17 : vector<256x128xf32>
    %cst_9 = arith.constant 1.000000e+00 : f32
    %19 = vector.broadcast %cst_9 : f32 to vector<256x128xf32>
    %20 = arith.addf %19, %18 : vector<256x128xf32>
    %21 = arith.mulf %10, %20 : vector<256x128xf32>
    %c0_10 = arith.constant 0 : index
    %c0_11 = arith.constant 0 : index
    %22 = vector.load %arg11[%c0_10, %c0_11] : memref<256x32xf32, #tpu.memory_space<vmem>>, vector<256x32xf32>
    %23 = arith.truncf %21 : vector<256x128xf32> to vector<256x128xbf16>
    %c0_12 = arith.constant 0 : index
    %c0_13 = arith.constant 0 : index
    %24 = vector.load %arg7[%c0_12, %c0_13] : memref<128x32xbf16, #tpu.memory_space<vmem>>, vector<128x32xbf16>
    %cst_14 = arith.constant dense<0.000000e+00> : vector<256x32xf32>
    %25 = tpu.matmul %23, %24, %cst_14 {dimension_numbers = #tpu.dot_dimension_numbers<[1], [0], [0], [1], [0, 0, 1, 1], [], []>} : vector<256x128xbf16>, vector<128x32xbf16>, vector<256x32xf32> -> vector<256x32xf32>
    %26 = arith.addf %22, %25 : vector<256x32xf32>
    %c0_15 = arith.constant 0 : index
    %c0_16 = arith.constant 0 : index
    %27 = vector.load %arg11[%c0_15, %c0_16] : memref<256x32xf32, #tpu.memory_space<vmem>>, vector<256x32xf32>
    tpu.vector_store %arg11[%c0_15, %c0_16], %26 {strides = array<i32>} : memref<256x32xf32, #tpu.memory_space<vmem>>, vector<256x32xf32>,
    %c0_i32_17 = arith.constant 0 : i32
    %28 = arith.cmpi eq, %arg1, %c0_i32_17 : i32
    %29 = arith.extui %28 : i1 to i32
    %c0_i32_18 = arith.constant 0 : i32
    %30 = arith.cmpi ne, %29, %c0_i32_18 : i32
    scf.if %30 {
      %c0_19 = arith.constant 0 : index
      %c0_20 = arith.constant 0 : index
      %31 = vector.load %arg11[%c0_19, %c0_20] : memref<256x32xf32, #tpu.memory_space<vmem>>, vector<256x32xf32>
      %c0_21 = arith.constant 0 : index
      %c0_22 = arith.constant 0 : index
      %32 = vector.load %arg8[%c0_21, %c0_22] : memref<1x32xf32, #tpu.memory_space<vmem>>, vector<1x32xf32>
      %33 = vector.broadcast %32 : vector<1x32xf32> to vector<256x32xf32>
      %34 = arith.addf %31, %33 : vector<256x32xf32>
      %c0_23 = arith.constant 0 : index
      %c0_24 = arith.constant 0 : index
      %35 = vector.load %arg2[%c0_23, %c0_24] : memref<256x32xbf16, #tpu.memory_space<vmem>>, vector<256x32xbf16>
      %36 = arith.extf %35 : vector<256x32xbf16> to vector<256x32xf32>
      %37 = arith.addf %34, %36 : vector<256x32xf32>
      %38 = arith.truncf %37 : vector<256x32xf32> to vector<256x32xbf16>
      %c0_25 = arith.constant 0 : index
      %c0_26 = arith.constant 0 : index
      %39 = vector.load %arg9[%c0_25, %c0_26] : memref<256x32xbf16, #tpu.memory_space<vmem>>, vector<256x32xbf16>
      tpu.vector_store %arg9[%c0_25, %c0_26], %38 {strides = array<i32>} : memref<256x32xbf16, #tpu.memory_space<vmem>>, vector<256x32xbf16>,
    } else {
    }
    return
  }
  func.func @transform_0(%arg0: i32, %arg1: i32) -> (i32, i32) {
    %c0_i32 = arith.constant 0 : i32
    %c0_i32_0 = arith.constant 0 : i32
    return %arg0, %c0_i32 : i32, i32
  }
  func.func @transform_1(%arg0: i32, %arg1: i32) -> (i32, i32) {
    %c0_i32 = arith.constant 0 : i32
    %c0_i32_0 = arith.constant 0 : i32
    %c0_i32_1 = arith.constant 0 : i32
    return %c0_i32, %c0_i32_0 : i32, i32
  }
  func.func @transform_2(%arg0: i32, %arg1: i32) -> (i32, i32) {
    %c0_i32 = arith.constant 0 : i32
    %c0_i32_0 = arith.constant 0 : i32
    %c0_i32_1 = arith.constant 0 : i32
    return %c0_i32, %c0_i32_0 : i32, i32
  }
  func.func @transform_3(%arg0: i32, %arg1: i32) -> (i32, i32) {
    %c0_i32 = arith.constant 0 : i32
    %c0_i32_0 = arith.constant 0 : i32
    return %c0_i32, %arg1 : i32, i32
  }
  func.func @transform_4(%arg0: i32, %arg1: i32) -> (i32, i32) {
    %c0_i32 = arith.constant 0 : i32
    %c0_i32_0 = arith.constant 0 : i32
    return %c0_i32, %arg1 : i32, i32
  }
  func.func @transform_5(%arg0: i32, %arg1: i32) -> (i32, i32) {
    %c0_i32 = arith.constant 0 : i32
    %c0_i32_0 = arith.constant 0 : i32
    return %arg1, %c0_i32 : i32, i32
  }
  func.func @transform_6(%arg0: i32, %arg1: i32) -> (i32, i32) {
    %c0_i32 = arith.constant 0 : i32
    %c0_i32_0 = arith.constant 0 : i32
    %c0_i32_1 = arith.constant 0 : i32
    return %c0_i32, %c0_i32_0 : i32, i32
  }
  func.func @transform_7(%arg0: i32, %arg1: i32) -> (i32, i32) {
    %c0_i32 = arith.constant 0 : i32
    %c0_i32_0 = arith.constant 0 : i32
    return %arg0, %c0_i32 : i32, i32
  }
}

</mosaic_0001>

<bundles_post_ra>
// kernel: fwd.9
= control target key start
LH: loop header
LB: loop body
LE: loop exit
PB: predicated region body
PF: predicated region fallthrough
CT: control target
= control target key end

     0   :  { %vm21_vm0 = vcmask 254976   ;;  %s231_s0 = inlined_call_operand.vmem [shape: bf16[2,32], index: 0, kind: input, shape index: {}]   ;;  %s232_s1 = inlined_call_operand.vmem [shape: f32[1,32], index: 1, kind: input, shape index: {}]   ;;  %s233_s2 = inlined_call_operand.vmem [shape: f32[1,32], index: 2, kind: input, shape index: {}]   ;;  %s234_s3 = inlined_call_operand.vmem [shape: bf16[32,16], index: 3, kind: input, shape index: {}]   ;;  %s235_s4 = inlined_call_operand.hbm [shape: f32[2,16], index: 4, kind: output, shape index: {}]  }
   0x1   :  { %v19_v0 = vld [vmem:[%s231_s0] sm:$0x1] }
   0x2   :  { %v20_v1 = vunpack.c.l.bf16 %v19_v0 }
   0x3   :  { %9 = vsyncpa [#allocation3], 0  ;;  %v148_v8 = vld [vmem:[%s234_s3] sm:$0xff]   ;;  %v176_v9 = vmov 0.0   ;;  %v149_v10 = vld [vmem:[%s234_s3 + $0x8] sm:$0xff]   ;;  %vm177_vm1 = vmmov 0  }
   0x4   :  { %v22_v2 = vsel %vm21_vm0, %v20_v1, 0.0  ;;  %137 = vmatprep.subr.bf16.mxu0 %v176_v9  ;;  %141 = vmatprep.mubr.msk.bf16.mxu0 %vm177_vm1, %v176_v9  ;;  %v129_v15 = vld [vmem:[%s232_s1] ss:$0 sm:$0xff]  ;;  %vm69_vm2 = vcmask 261120   ;;  %s178_s3 = smov [#allocation2]   ;;  %vm113_vm3 = vcmask 123904  }
   0x5   :  { %23 = vadd.xlane.f32.xlu0 %v22_v2  ;;  %138 = vmatpush3.bf16.msra.mxu0 %v148_v8  ;;  %v130_v17 = vld [vmem:[%s233_s2] ss:$0 sm:$0xff]  ;;  %s121_s24 = sshll.u32 %s178_s3, 4  ;;  %s122_s24 = int_to_ptr.vmem [resolvable:$true] %s121_s24 }
   0x6   :  { %139 = vmatprep.subr.bf16.mxu0 %v176_v9  ;;  %s152_s25 = scalar_lea.vmem %s122_s24, 32  ;;  %p157_p1 = scmp.lt.s32.totalorder %s122_s24, %s122_s24 }
   0x7   :  { %p153_p0 = scmp.ne.s32.totalorder %s122_s24, %s152_s25  ;;  %p158_p2 = scmp.lt.s32.totalorder %s152_s25, %s152_s25 }
   0x9   :  { %140 = vmatpush3.bf16.msra.mxu0 %v149_v10  ;;  %p159_p3 = por %p158_p2, %p157_p1 }
   0xb   :  { %p160_p4 = pnand %p159_p3, %p153_p0 }
  0x92   :  { %v24_v3 = vpop.xlane.xlu0 %23 }
  0x93   :  { %v26_v4 = vmul.f32 0.03125, %v24_v3 }
  0x95   :  { %v27_v5 = vsub.f32 %v20_v1, %v26_v4 }
  0x97   :  { %v28_v6 = vmul.f32 %v27_v5, %v27_v5 }
  0x99   :  { %v29_v7 = vsel %vm21_vm0, %v28_v6, 0.0 }
  0x9a   :  { %30 = vadd.xlane.f32.xlu0 %v29_v7 }
 0x127   :  { %v31_v11 = vpop.xlane.xlu0 %30 }
 0x128   :  { %v32_v12 = vmul.f32 0.03125, %v31_v11 }
 0x12a   :  { %v33_v13 = vadd.f32 1e-05, %v32_v12 }
 0x12c   :  { %150 = vrsqrt.f32 %v33_v13 }
 0x136   :  { %v151_v14 = vpop.eup %150 }
 0x137   :  { %v35_v16 = vmul.f32 %v151_v14, %v27_v5 }
 0x139   :  { %v43_v18 = vmul.f32 %v129_v15, %v35_v16 }
 0x13b   :  { %v51_v19 = vadd.f32 %v130_v17, %v43_v18 }
 0x13d   :  { %v52_v20 = vpack.c.bf16 %v51_v19, %v51_v19 }
 0x13f   :  { %142 = vmatmul.mubr.msk.bf16.vlgmr.msra.gmra.mrb[0].mxu0 %vm69_vm2, %v52_v20 }
 0x212   :  { %v107_v21 = vpop.f32.mrb[0].mxu0 }
 0x213   :  { %114 = vst.msk [vmem:[#allocation2] sm:$0x3] %vm113_vm3, %v107_v21  ;;  %v143_v22 = vpop.f32.mrb[1].mxu0 }
 0x214   :  { %v110_v23 = vpop.f32.mrb[2].mxu0 }
 0x215   :  { %163 = shalt.err (!%p160_p4)
}
 0x216   :  { %s164_s26 = scalar_lea.hbm %s235_s4, 32 }
 0x217   :  { %p165_p5 = scmp.ne.s32.totalorder %s235_s4, %s164_s26  ;;  %p168_p6 = scmp.lt.u32.totalorder %s164_s26, %s235_s4 }
 0x219   :  { %p170_p7 = pnand %p168_p6, %p165_p5 }
 0x21b   :  { %173 = shalt.err (!%p170_p7)
}
 0x21c   :  { %124 = dma.vmem_to_hbm [thread:$0]  %s122_s24, 32, %s235_s4, [#allocation3]   ;;  %v144_v24 = vpop.f32.mrb[3].mxu0 }
 0x21d   :  { %174 = dma.done.wait [#allocation3], 32  }
 0x21e   :  { %175 = vsyncadd [#allocation3], 4294967264 }
 0x21f   :  { %128 = vsyncpa [#allocation3], 1 }

// kernel: fwd.5
= control target key start
LH: loop header
LB: loop body
LE: loop exit
PB: predicated region body
PF: predicated region fallthrough
CT: control target
= control target key end

     0   :  { %s2812_s24 = smov 0   ;;  %s3767_s0 = inlined_call_operand.vmem [shape: bf16[2,128,32], index: 0, kind: input, shape index: {}]   ;;  %s3768_s1 = inlined_call_operand.vmem [shape: f32[1,32], index: 1, kind: input, shape index: {}]   ;;  %s3769_s2 = inlined_call_operand.vmem [shape: f32[1,32], index: 2, kind: input, shape index: {}]   ;;  %s3770_s3 = inlined_call_operand.vmem [shape: bf16[32,96], index: 3, kind: input, shape index: {}]   ;;  %s3771_s4 = inlined_call_operand.vmem [shape: f32[1,96], index: 4, kind: input, shape index: {}]   ;;  %s3772_s5 = inlined_call_operand.vmem [shape: bf16[32,32], index: 5, kind: input, shape index: {}]   ;;  %s3773_s6 = inlined_call_operand.vmem [shape: f32[1,32], index: 6, kind: input, shape index: {}]   ;;  %s3774_s7 = inlined_call_operand.vmem [shape: bf16[2,128,32], index: 7, kind: output, shape index: {}]  }
   0x1 LB: > { %s2170_s25 = sadd.s32 4294967295, %s2763_s24   ;;  %p2174_p0 = scmp.ge.s32.totalorder %s2763_s24, 1  ;;  %s2763_s24 = sphi %s2812_s24, %s17_s24  }
   0x2   : > { %p237_p1 = scmp.lt.s32.totalorder %s2763_s24, 3 }
   0x4   : > { %p238_p2 = pnand %p2174_p0, %p237_p1 }
   0x6   : > { %241 = sbr.rel (%p238_p2) target bundleno = 2551 (0x9f7), region = 48 }
   0xd   : > { %p269_p3 = scmp.lt.s32.totalorder %s2170_s25, 1  ;;  %vm312_vm0 = vcmask 261120   ;;  %vm820_vm1 = vcmask 130048   ;;  %s2765_s17 = smov 96  }
   0xe   : > { %s2766_s18 = smov 64   ;;  %s2767_s19 = smov 80  }
   0xf   : > { %s3812_s25 = smov (!%p269_p3, %s2170_s25), 1  ;;  %s2769_s20 = smov 112  }
  0x10   : > { %s2237_s26 = sshll.u32 %s3812_s25, 6  ;;  %s2770_s21 = smov 48  }
  0x11   : > { %s2828_s29 = scalar_lea.vmem %s3767_s0, %s2237_s26  ;;  %s2771_s27 = smov 16  }
  0x12   : > { %v2256_v0 = vld [vmem:[%s2828_s29] sm:$0xff]   ;;  %v2287_v1 = vld [vmem:[%s2828_s29 + $0x8] sm:$0xff]   ;;  %v2288_v6 = vld [vmem:[%s2828_s29 + $0x10] sm:$0xff]   ;;  %s3702_s11 = scalar_lea.vmem %s3774_s7, %s2237_s26 }
  0x13   : > { %v2832_v2 = vunpack.c.l.bf16 %v2256_v0  ;;  %v2834_v3 = vunpack.c.l.bf16 %v2287_v1  ;;  %v2836_v4 = vunpack.c.h.bf16 %v2256_v0  ;;  %v2838_v5 = vunpack.c.h.bf16 %v2287_v1  ;;  %v2289_v13 = vld [vmem:[%s2828_s29 + $0x18] sm:$0xff]   ;;  %v2290_v18 = vld [vmem:[%s2828_s29 + $0x20] sm:$0xff]   ;;  %v2291_v23 = vld [vmem:[%s2828_s29 + $0x28] sm:$0xff]  }
  0x14   : > { %v2849_v11 = vunpack.c.l.bf16 %v2288_v6  ;;  %v2851_v12 = vunpack.c.h.bf16 %v2288_v6  ;;  %v2858_v16 = vunpack.c.l.bf16 %v2289_v13  ;;  %v2860_v17 = vunpack.c.h.bf16 %v2289_v13  ;;  %v2292_v28 = vld [vmem:[%s2828_s29 + $0x30] sm:$0xff]   ;;  %v2293_v33 = vld [vmem:[%s2828_s29 + $0x38] sm:$0xff]  }
  0x15   : > { %v313_v7 = vsel %vm312_vm0, %v2832_v2, 0.0  ;;  %v319_v8 = vsel %vm312_vm0, %v2834_v3, 0.0  ;;  %v316_v9 = vsel %vm312_vm0, %v2836_v4, 0.0  ;;  %v322_v10 = vsel %vm312_vm0, %v2838_v5, 0.0 }
  0x16   : > { %314 = vadd.xlane.f32.xlu0 %v313_v7  ;;  %320 = vadd.xlane.f32.xlu1 %v319_v8  ;;  %3787 = vst [vmem:[#allocation3_spill] sm:$0xff] %v2849_v11  ;;  %3788 = vst [vmem:[#allocation4_spill] sm:$0xff] %v2851_v12  ;;  %v325_v14 = vsel %vm312_vm0, %v2849_v11, 0.0  ;;  %v328_v15 = vsel %vm312_vm0, %v2851_v12, 0.0  ;;  %v331_v19 = vsel %vm312_vm0, %v2858_v16, 0.0  ;;  %v334_v20 = vsel %vm312_vm0, %v2860_v17, 0.0 }
  0x17   : > { %3789 = vst [vmem:[#allocation5_spill] sm:$0xff] %v2858_v16  ;;  %3790 = vst [vmem:[#allocation6_spill] sm:$0xff] %v2860_v17  ;;  %v2867_v21 = vunpack.c.l.bf16 %v2290_v18  ;;  %v2869_v22 = vunpack.c.h.bf16 %v2290_v18  ;;  %v2876_v26 = vunpack.c.l.bf16 %v2291_v23  ;;  %v2878_v27 = vunpack.c.h.bf16 %v2291_v23 }
  0x18   : > { %v2885_v31 = vunpack.c.l.bf16 %v2292_v28  ;;  %v2887_v32 = vunpack.c.h.bf16 %v2292_v28  ;;  %v2894_v36 = vunpack.c.l.bf16 %v2293_v33  ;;  %v2896_v37 = vunpack.c.h.bf16 %v2293_v33 }
  0x19   : > { %3791 = vst [vmem:[#allocation7_spill] sm:$0xff] %v2867_v21  ;;  %3792 = vst [vmem:[#allocation8_spill] sm:$0xff] %v2869_v22  ;;  %v337_v24 = vsel %vm312_vm0, %v2867_v21, 0.0  ;;  %v340_v25 = vsel %vm312_vm0, %v2869_v22, 0.0  ;;  %v343_v29 = vsel %vm312_vm0, %v2876_v26, 0.0  ;;  %v346_v30 = vsel %vm312_vm0, %v2878_v27, 0.0 }
  0x1a   : > { %317 = vadd.xlane.f32.xlu0 %v316_v9  ;;  %323 = vadd.xlane.f32.xlu1 %v322_v10  ;;  %3793 = vst [vmem:[#allocation9_spill] sm:$0xff] %v2876_v26  ;;  %3794 = vst [vmem:[#allocation10_spill] sm:$0xff] %v2878_v27  ;;  %v349_v34 = vsel %vm312_vm0, %v2885_v31, 0.0  ;;  %v352_v35 = vsel %vm312_vm0, %v2887_v32, 0.0  ;;  %v355_v38 = vsel %vm312_vm0, %v2894_v36, 0.0  ;;  %v358_v39 = vsel %vm312_vm0, %v2896_v37, 0.0 }
  0x1b   : > { %3795 = vst [vmem:[#allocation11_spill] sm:$0xff] %v2885_v31  ;;  %3796 = vst [vmem:[#allocation12_spill] sm:$0xff] %v2887_v32 }
  0x1c   : > { %3797 = vst [vmem:[#allocation13_spill] sm:$0xff] %v2894_v36  ;;  %3798 = vst [vmem:[#allocation14_spill] sm:$0xff] %v2896_v37 }
  0x1e   : > { %326 = vadd.xlane.f32.xlu0 %v325_v14  ;;  %329 = vadd.xlane.f32.xlu1 %v328_v15 }
  0x22   : > { %332 = vadd.xlane.f32.xlu0 %v331_v19  ;;  %335 = vadd.xlane.f32.xlu1 %v334_v20 }
  0x26   : > { %338 = vadd.xlane.f32.xlu0 %v337_v24  ;;  %341 = vadd.xlane.f32.xlu1 %v340_v25 }
  0x2a   : > { %344 = vadd.xlane.f32.xlu0 %v343_v29  ;;  %347 = vadd.xlane.f32.xlu1 %v346_v30 }
  0x2e   : > { %350 = vadd.xlane.f32.xlu0 %v349_v34  ;;  %353 = vadd.xlane.f32.xlu1 %v352_v35 }
  0x32   : > { %356 = vadd.xlane.f32.xlu0 %v355_v38  ;;  %359 = vadd.xlane.f32.xlu1 %v358_v39 }
  0xa3   : > { %v315_v40 = vpop.xlane.xlu0 %314  ;;  %v321_v41 = vpop.xlane.xlu1 %320 }
  0xa4   : > { %v362_v42 = vmul.f32 0.03125, %v315_v40  ;;  %v364_v43 = vmul.f32 0.03125, %v321_v41 }
  0xa6   : > { %v2903_v44 = vsub.f32 %v2832_v2, %v362_v42  ;;  %v2906_v45 = vsub.f32 %v2834_v3, %v364_v43 }
  0xa7   : > { %v318_v46 = vpop.xlane.xlu0 %317  ;;  %v324_v47 = vpop.xlane.xlu1 %323 }
  0xa8   : > { %v363_v48 = vmul.f32 0.03125, %v318_v46  ;;  %v365_v49 = vmul.f32 0.03125, %v324_v47  ;;  %v394_v50 = vmul.f32 %v2903_v44, %v2903_v44  ;;  %v396_v51 = vmul.f32 %v2906_v45, %v2906_v45 }
  0xaa   : > { %v2913_v52 = vsub.f32 %v2836_v4, %v363_v48  ;;  %v2916_v53 = vsub.f32 %v2838_v5, %v365_v49  ;;  %v410_v54 = vsel %vm312_vm0, %v394_v50, 0.0  ;;  %v416_v57 = vsel %vm312_vm0, %v396_v51, 0.0 }
  0xab   : > { %411 = vadd.xlane.f32.xlu0 %v410_v54  ;;  %v327_v55 = vpop.xlane.xlu0 %326  ;;  %v330_v56 = vpop.xlane.xlu1 %329 }
  0xac   : > { %v366_v58 = vmul.f32 0.03125, %v327_v55  ;;  %v367_v59 = vmul.f32 0.03125, %v330_v56  ;;  %v395_v60 = vmul.f32 %v2913_v52, %v2913_v52  ;;  %v397_v61 = vmul.f32 %v2916_v53, %v2916_v53 }
  0xae   : > { %v2925_v62 = vsub.f32 %v2849_v11, %v366_v58  ;;  %v2928_v63 = vsub.f32 %v2851_v12, %v367_v59  ;;  %v413_v0 = vsel %vm312_vm0, %v395_v60, 0.0  ;;  %v419_v7 = vsel %vm312_vm0, %v397_v61, 0.0 }
  0xaf   : > { %417 = vadd.xlane.f32.xlu0 %v416_v57  ;;  %414 = vadd.xlane.f32.xlu1 %v413_v0  ;;  %v333_v1 = vpop.xlane.xlu0 %332  ;;  %v336_v6 = vpop.xlane.xlu1 %335 }
  0xb0   : > { %v368_v8 = vmul.f32 0.03125, %v333_v1  ;;  %v369_v9 = vmul.f32 0.03125, %v336_v6  ;;  %v398_v10 = vmul.f32 %v2925_v62, %v2925_v62  ;;  %v399_v13 = vmul.f32 %v2928_v63, %v2928_v63 }
  0xb2   : > { %v2937_v14 = vsub.f32 %v2858_v16, %v368_v8  ;;  %v2940_v15 = vsub.f32 %v2860_v17, %v369_v9  ;;  %v422_v18 = vsel %vm312_vm0, %v398_v10, 0.0  ;;  %v425_v23 = vsel %vm312_vm0, %v399_v13, 0.0 }
  0xb3   : > { %420 = vadd.xlane.f32.xlu1 %v419_v7  ;;  %423 = vadd.xlane.f32.xlu0 %v422_v18  ;;  %v339_v19 = vpop.xlane.xlu0 %338  ;;  %v342_v20 = vpop.xlane.xlu1 %341 }
  0xb4   : > { %v370_v24 = vmul.f32 0.03125, %v339_v19  ;;  %v371_v25 = vmul.f32 0.03125, %v342_v20  ;;  %v400_v28 = vmul.f32 %v2937_v14, %v2937_v14  ;;  %v401_v29 = vmul.f32 %v2940_v15, %v2940_v15 }
  0xb6   : > { %v2949_v30 = vsub.f32 %v2867_v21, %v370_v24  ;;  %v2952_v33 = vsub.f32 %v2869_v22, %v371_v25  ;;  %v428_v34 = vsel %vm312_vm0, %v400_v28, 0.0  ;;  %v431_v39 = vsel %vm312_vm0, %v401_v29, 0.0  ;;  %v2593_v28 = vld [vmem:[%s3770_s3] sm:$0xff]   ;;  %v2594_v29 = vld [vmem:[%s3770_s3 + $0x8] sm:$0xff]  }
  0xb7   : > { %426 = vadd.xlane.f32.xlu1 %v425_v23  ;;  %429 = vadd.xlane.f32.xlu0 %v428_v34  ;;  %v345_v35 = vpop.xlane.xlu0 %344  ;;  %v348_v38 = vpop.xlane.xlu1 %347 }
  0xb8   : > { %v372_v40 = vmul.f32 0.03125, %v345_v35  ;;  %v373_v41 = vmul.f32 0.03125, %v348_v38  ;;  %v402_v42 = vmul.f32 %v2949_v30, %v2949_v30  ;;  %v403_v43 = vmul.f32 %v2952_v33, %v2952_v33  ;;  %2378 = vmatprep.subr.bf16.mxu0 %v2593_v28 }
  0xb9   : > { %2379 = vmatpush3.bf16.msra.mxu0 %v2593_v28 }
  0xba   : > { %v2961_v46 = vsub.f32 %v2876_v26, %v372_v40  ;;  %v2964_v47 = vsub.f32 %v2878_v27, %v373_v41  ;;  %v434_v48 = vsel %vm312_vm0, %v402_v42, 0.0  ;;  %v437_v51 = vsel %vm312_vm0, %v403_v43, 0.0  ;;  %2380 = vmatprep.subr.bf16.mxu0 %v2594_v29 }
  0xbb   : > { %432 = vadd.xlane.f32.xlu1 %v431_v39  ;;  %435 = vadd.xlane.f32.xlu0 %v434_v48  ;;  %v351_v49 = vpop.xlane.xlu0 %350  ;;  %v354_v50 = vpop.xlane.xlu1 %353 }
  0xbc   : > { %v374_v54 = vmul.f32 0.03125, %v351_v49  ;;  %v375_v55 = vmul.f32 0.03125, %v354_v50  ;;  %v404_v56 = vmul.f32 %v2961_v46, %v2961_v46  ;;  %v405_v57 = vmul.f32 %v2964_v47, %v2964_v47 }
  0xbd   : > { %2381 = vmatpush3.bf16.msra.mxu0 %v2594_v29 }
  0xbe   : > { %v2973_v58 = vsub.f32 %v2885_v31, %v374_v54  ;;  %v2976_v59 = vsub.f32 %v2887_v32, %v375_v55  ;;  %v440_v60 = vsel %vm312_vm0, %v404_v56, 0.0  ;;  %v443_v1 = vsel %vm312_vm0, %v405_v57, 0.0 }
  0xbf   : > { %438 = vadd.xlane.f32.xlu1 %v437_v51  ;;  %441 = vadd.xlane.f32.xlu0 %v440_v60  ;;  %v357_v61 = vpop.xlane.xlu0 %356  ;;  %v360_v0 = vpop.xlane.xlu1 %359 }
  0xc0   : > { %v376_v6 = vmul.f32 0.03125, %v357_v61  ;;  %v377_v7 = vmul.f32 0.03125, %v360_v0  ;;  %v406_v8 = vmul.f32 %v2973_v58, %v2973_v58  ;;  %v407_v9 = vmul.f32 %v2976_v59, %v2976_v59 }
  0xc2   : > { %v2985_v10 = vsub.f32 %v2894_v36, %v376_v6  ;;  %v2988_v13 = vsub.f32 %v2896_v37, %v377_v7  ;;  %v446_v18 = vsel %vm312_vm0, %v406_v8, 0.0  ;;  %v449_v19 = vsel %vm312_vm0, %v407_v9, 0.0 }
  0xc3   : > { %444 = vadd.xlane.f32.xlu1 %v443_v1  ;;  %447 = vadd.xlane.f32.xlu0 %v446_v18 }
  0xc4   : > { %v408_v20 = vmul.f32 %v2985_v10, %v2985_v10  ;;  %v409_v23 = vmul.f32 %v2988_v13, %v2988_v13 }
  0xc6   : > { %v452_v24 = vsel %vm312_vm0, %v408_v20, 0.0  ;;  %v455_v25 = vsel %vm312_vm0, %v409_v23, 0.0  ;;  %v3008_v23 = vld [vmem:[%s3768_s1] ss:$0 sm:$0xff] }
  0xc7   : > { %450 = vadd.xlane.f32.xlu1 %v449_v19  ;;  %453 = vadd.xlane.f32.xlu0 %v452_v24 }
  0xcb   : > { %456 = vadd.xlane.f32.xlu1 %v455_v25 }
 0x138   : > { %v412_v34 = vpop.xlane.xlu0 %411 }
 0x139   : > { %v458_v35 = vmul.f32 0.03125, %v412_v34 }
 0x13b   : > { %v474_v38 = vadd.f32 1e-05, %v458_v35 }
 0x13c   : > { %v415_v39 = vpop.xlane.xlu1 %414  ;;  %v418_v40 = vpop.xlane.xlu0 %417 }
 0x13d   : > { %2597 = vrsqrt.f32 %v474_v38  ;;  %v459_v41 = vmul.f32 0.03125, %v415_v39  ;;  %v460_v42 = vmul.f32 0.03125, %v418_v40 }
 0x13f   : > { %v475_v43 = vadd.f32 1e-05, %v459_v41  ;;  %v476_v48 = vadd.f32 1e-05, %v460_v42  ;;  %v3015_v41 = vld [vmem:[%s3769_s2] ss:$0 sm:$0xff] }
 0x140   : > { %v421_v49 = vpop.xlane.xlu1 %420  ;;  %v424_v50 = vpop.xlane.xlu0 %423 }
 0x141   : > { %2599 = vrsqrt.f32 %v475_v43  ;;  %v461_v51 = vmul.f32 0.03125, %v421_v49  ;;  %v462_v54 = vmul.f32 0.03125, %v424_v50 }
 0x142   : > { %2601 = vrsqrt.f32 %v476_v48 }
 0x143   : > { %v477_v55 = vadd.f32 1e-05, %v461_v51  ;;  %v478_v56 = vadd.f32 1e-05, %v462_v54 }
 0x144   : > { %v427_v57 = vpop.xlane.xlu1 %426  ;;  %v430_v60 = vpop.xlane.xlu0 %429 }
 0x145   : > { %2603 = vrsqrt.f32 %v477_v55  ;;  %v463_v61 = vmul.f32 0.03125, %v427_v57  ;;  %v464_v0 = vmul.f32 0.03125, %v430_v60 }
 0x146   : > { %2605 = vrsqrt.f32 %v478_v56 }
 0x147   : > { %v2598_v1 = vpop.eup %2597  ;;  %v479_v6 = vadd.f32 1e-05, %v463_v61  ;;  %v480_v7 = vadd.f32 1e-05, %v464_v0 }
 0x148   : > { %v433_v8 = vpop.xlane.xlu1 %432  ;;  %v436_v9 = vpop.xlane.xlu0 %435  ;;  %v506_v18 = vmul.f32 %v2598_v1, %v2903_v44 }
 0x149   : > { %2607 = vrsqrt.f32 %v479_v6  ;;  %v465_v19 = vmul.f32 0.03125, %v433_v8  ;;  %v466_v20 = vmul.f32 0.03125, %v436_v9 }
 0x14a   : > { %2609 = vrsqrt.f32 %v480_v7  ;;  %v529_v39 = vmul.f32 %v3008_v23, %v506_v18 }
 0x14b   : > { %v2600_v24 = vpop.eup %2599  ;;  %v481_v25 = vadd.f32 1e-05, %v465_v19  ;;  %v482_v28 = vadd.f32 1e-05, %v466_v20 }
 0x14c   : > { %v2602_v29 = vpop.eup %2601  ;;  %v439_v34 = vpop.xlane.xlu1 %438  ;;  %v507_v38 = vmul.f32 %v2600_v24, %v2913_v52  ;;  %v552_v55 = vadd.f32 %v3015_v41, %v529_v39 }
 0x14d   : > { %v442_v35 = vpop.xlane.xlu0 %441  ;;  %2611 = vrsqrt.f32 %v481_v25  ;;  %v467_v44 = vmul.f32 0.03125, %v439_v34  ;;  %v508_v42 = vmul.f32 %v2602_v29, %v2906_v45 }
 0x14e   : > { %v468_v40 = vmul.f32 0.03125, %v442_v35  ;;  %2613 = vrsqrt.f32 %v482_v28  ;;  %v530_v43 = vmul.f32 %v3008_v23, %v507_v38 }
 0x14f   : > { %v2604_v48 = vpop.eup %2603  ;;  %v483_v49 = vadd.f32 1e-05, %v467_v44  ;;  %v531_v60 = vmul.f32 %v3008_v23, %v508_v42 }
 0x150   : > { %v484_v50 = vadd.f32 1e-05, %v468_v40  ;;  %v2606_v51 = vpop.eup %2605  ;;  %v445_v52 = vpop.xlane.xlu1 %444  ;;  %v553_v56 = vadd.f32 %v3015_v41, %v530_v43  ;;  %v509_v57 = vmul.f32 %v2604_v48, %v2916_v53 }
 0x151   : > { %v448_v54 = vpop.xlane.xlu0 %447  ;;  %2615 = vrsqrt.f32 %v483_v49  ;;  %v469_v61 = vmul.f32 0.03125, %v445_v52  ;;  %v510_v6 = vmul.f32 %v2606_v51, %v2925_v62  ;;  %v554_v53 = vadd.f32 %v3015_v41, %v531_v60 }
 0x152   : > { %v470_v45 = vmul.f32 0.03125, %v448_v54  ;;  %2617 = vrsqrt.f32 %v484_v50  ;;  %v568_v0 = vpack.c.bf16 %v553_v56, %v552_v55  ;;  %v532_v1 = vmul.f32 %v3008_v23, %v509_v57 }
 0x153   : > { %v2608_v7 = vpop.eup %2607  ;;  %v485_v8 = vadd.f32 1e-05, %v469_v61  ;;  %v533_v28 = vmul.f32 %v3008_v23, %v510_v6 }
 0x154   : > { %v486_v9 = vadd.f32 1e-05, %v470_v45  ;;  %v2610_v18 = vpop.eup %2609  ;;  %v451_v19 = vpop.xlane.xlu1 %450  ;;  %2382 = vmatprep.mubr.msk.bf16.mxu0 %vm312_vm0, %v568_v0  ;;  %v555_v24 = vadd.f32 %v3015_v41, %v532_v1  ;;  %v511_v25 = vmul.f32 %v2608_v7, %v2928_v63 }
 0x155   : > { %v454_v20 = vpop.xlane.xlu0 %453  ;;  %2619 = vrsqrt.f32 %v485_v8  ;;  %v471_v29 = vmul.f32 0.03125, %v451_v19  ;;  %v512_v62 = vmul.f32 %v2610_v18, %v2937_v14  ;;  %v556_v63 = vadd.f32 %v3015_v41, %v533_v28 }
 0x156   : > { %v472_v34 = vmul.f32 0.03125, %v454_v20  ;;  %2621 = vrsqrt.f32 %v486_v9  ;;  %v569_v35 = vpack.c.bf16 %v555_v24, %v554_v53  ;;  %v534_v38 = vmul.f32 %v3008_v23, %v511_v25 }
 0x157   : > { %v2612_v39 = vpop.eup %2611  ;;  %v487_v44 = vadd.f32 1e-05, %v471_v29  ;;  %v535_v50 = vmul.f32 %v3008_v23, %v512_v62 }
 0x158   : > { %v488_v40 = vadd.f32 1e-05, %v472_v34  ;;  %v2614_v42 = vpop.eup %2613  ;;  %v457_v43 = vpop.xlane.xlu1 %456  ;;  %2383 = vmatmul.mubr.msk.bf16.vlgmr.msra.gmra.mrb[0].mxu0 %vm312_vm0, %v569_v35  ;;  %v557_v48 = vadd.f32 %v3015_v41, %v534_v38  ;;  %v513_v49 = vmul.f32 %v2612_v39, %v2940_v15 }
 0x159   : > { %2623 = vrsqrt.f32 %v487_v44  ;;  %v473_v14 = vmul.f32 0.03125, %v457_v43  ;;  %v514_v51 = vmul.f32 %v2614_v42, %v2949_v30  ;;  %v558_v60 = vadd.f32 %v3015_v41, %v535_v50 }
 0x15a   : > { %2625 = vrsqrt.f32 %v488_v40  ;;  %v570_v52 = vpack.c.bf16 %v557_v48, %v556_v63  ;;  %v536_v54 = vmul.f32 %v3008_v23, %v513_v49  ;;  %v2181_v49 = vld [vmem:[%s3771_s4] ss:$0 sm:$0xff] }
 0x15b   : > { %v2616_v55 = vpop.eup %2615  ;;  %v489_v56 = vadd.f32 1e-05, %v473_v14  ;;  %v537_v45 = vmul.f32 %v3008_v23, %v514_v51 }
 0x15c   : > { %v2618_v57 = vpop.eup %2617  ;;  %2386 = vmatprep.mubr.msk.bf16.mxu0 %vm312_vm0, %v570_v52  ;;  %v559_v61 = vadd.f32 %v3015_v41, %v536_v54  ;;  %v515_v15 = vmul.f32 %v2616_v55, %v2952_v33 }
 0x15d   : > { %2627 = vrsqrt.f32 %v489_v56  ;;  %v516_v30 = vmul.f32 %v2618_v57, %v2961_v46  ;;  %v560_v8 = vadd.f32 %v3015_v41, %v537_v45 }
 0x15e   : > { %v571_v0 = vpack.c.bf16 %v559_v61, %v558_v60  ;;  %v538_v1 = vmul.f32 %v3008_v23, %v515_v15 }
 0x15f   : > { %v2620_v6 = vpop.eup %2619  ;;  %v539_v33 = vmul.f32 %v3008_v23, %v516_v30 }
 0x160   : > { %v2622_v7 = vpop.eup %2621  ;;  %2387 = vmatmul.mubr.msk.bf16.gmra.mrb[4].mxu0 %vm312_vm0, %v571_v0  ;;  %v561_v9 = vadd.f32 %v3015_v41, %v538_v1  ;;  %v517_v18 = vmul.f32 %v2620_v6, %v2964_v47 }
 0x161   : > { %v518_v19 = vmul.f32 %v2622_v7, %v2973_v58  ;;  %v562_v25 = vadd.f32 %v3015_v41, %v539_v33 }
 0x162   : > { %v572_v20 = vpack.c.bf16 %v561_v9, %v560_v8  ;;  %v540_v46 = vmul.f32 %v3008_v23, %v517_v18 }
 0x163   : > { %v2624_v53 = vpop.eup %2623  ;;  %v541_v34 = vmul.f32 %v3008_v23, %v518_v19 }
 0x164   : > { %v2626_v24 = vpop.eup %2625  ;;  %2390 = vmatprep.mubr.msk.bf16.mxu0 %vm312_vm0, %v572_v20  ;;  %v563_v28 = vadd.f32 %v3015_v41, %v540_v46  ;;  %v519_v29 = vmul.f32 %v2624_v53, %v2976_v59 }
 0x165   : > { %v520_v47 = vmul.f32 %v2626_v24, %v2985_v10  ;;  %v564_v38 = vadd.f32 %v3015_v41, %v541_v34 }
 0x166   : > { %v573_v62 = vpack.c.bf16 %v563_v28, %v562_v25  ;;  %v542_v58 = vmul.f32 %v3008_v23, %v519_v29 }
 0x167   : > { %v2628_v35 = vpop.eup %2627  ;;  %v543_v40 = vmul.f32 %v3008_v23, %v520_v47 }
 0x168   : > { %2391 = vmatmul.mubr.msk.bf16.gmra.mrb[8].mxu0 %vm312_vm0, %v573_v62  ;;  %v565_v39 = vadd.f32 %v3015_v41, %v542_v58  ;;  %v521_v44 = vmul.f32 %v2628_v35, %v2988_v13 }
 0x169   : > { %v566_v10 = vadd.f32 %v3015_v41, %v543_v40 }
 0x16a   : > { %v574_v42 = vpack.c.bf16 %v565_v39, %v564_v38  ;;  %v544_v59 = vmul.f32 %v3008_v23, %v521_v44 }
 0x16c   : > { %2394 = vmatprep.mubr.msk.bf16.mxu0 %vm312_vm0, %v574_v42  ;;  %v567_v43 = vadd.f32 %v3015_v41, %v544_v59 }
 0x16e   : > { %v575_v63 = vpack.c.bf16 %v567_v43, %v566_v10 }
 0x170   : > { %2395 = vmatmul.mubr.msk.bf16.gmra.mrb[12].mxu0 %vm312_vm0, %v575_v63 }
 0x22b   : > { %v2384_v48 = vpop.f32.mrb[0].mxu0 }
 0x22c   : > { %v657_v13 = vpop.f32.mrb[1].mxu0  ;;  %v666_v14 = vadd.f32 %v2384_v48, %v2181_v49 }
 0x22d   : > { %v2385_v50 = vpop.f32.mrb[2].mxu0  ;;  %v658_v23 = vadd.f32 %v2181_v49, %v657_v13 }
 0x22e   : > { %v669_v51 = vadd.f32 %v2385_v50, %v2181_v49  ;;  %v660_v52 = vpop.f32.mrb[3].mxu0 }
 0x22f   : > { %v661_v54 = vadd.f32 %v2181_v49, %v660_v52 }
 0x230   : > { %v3073_v55 = vpack.c.bf16 %v669_v51, %v666_v14 }
 0x231   : > { %v3075_v56 = vpack.c.bf16 %v661_v54, %v658_v23 }
 0x232   : > { %806 = vrot.lane.b32.xlu1 %v3073_v55, %s2765_s17 }
 0x233   : > { %804 = vrot.lane.b32.xlu0 %v3075_v56, %s2765_s17  ;;  %v2388_v41 = vpop.f32.mrb[4].mxu0  ;;  %2414 = vmatprep.mubr.msk.bf16.mxu1 %vm820_vm1, %v3075_v56 }
 0x234   : > { %v673_v57 = vpop.f32.mrb[5].mxu0  ;;  %v682_v61 = vadd.f32 %v2388_v41, %v2181_v49 }
 0x235   : > { %v2389_v60 = vpop.f32.mrb[6].mxu0  ;;  %v674_v30 = vadd.f32 %v2181_v49, %v673_v57 }
 0x236   : > { %v685_v15 = vadd.f32 %v2389_v60, %v2181_v49  ;;  %v676_v45 = vpop.f32.mrb[7].mxu0 }
 0x237   : > { %v677_v0 = vadd.f32 %v2181_v49, %v676_v45 }
 0x238   : > { %v3083_v1 = vpack.c.bf16 %v685_v15, %v682_v61 }
 0x239   : > { %v3085_v6 = vpack.c.bf16 %v677_v0, %v674_v30 }
 0x23b   : > { %808 = vrot.lane.b32.xlu1 %v3085_v6, %s2765_s17  ;;  %v2392_v7 = vpop.f32.mrb[8].mxu0 }
 0x23c   : > { %v689_v8 = vpop.f32.mrb[9].mxu0  ;;  %v698_v18 = vadd.f32 %v2392_v7, %v2181_v49 }
 0x23d   : > { %v2393_v9 = vpop.f32.mrb[10].mxu0  ;;  %v690_v20 = vadd.f32 %v2181_v49, %v689_v8  ;;  %v720_v8 = vlaneseq }
 0x23e   : > { %v701_v33 = vadd.f32 %v2393_v9, %v2181_v49  ;;  %v692_v19 = vpop.f32.mrb[11].mxu0 }
 0x23f   : > { %v693_v46 = vadd.f32 %v2181_v49, %v692_v19  ;;  %810 = vrot.lane.b32.xlu1 %v3083_v1, %s2765_s17  ;;  %v3153_v9 = vshrl.u32 %v720_v8, 7 }
 0x240   : > { %v3091_v53 = vpack.c.bf16 %v701_v33, %v698_v18  ;;  %v3155_v18 = vand.u32 127, %v720_v8 }
 0x241   : > { %v3093_v24 = vpack.c.bf16 %v693_v46, %v690_v20  ;;  %v736_v33 = vadd.s32 120, %v3153_v9  ;;  %v734_v19 = vadd.s32 104, %v3153_v9  ;;  %v2768_v20 = vmov 0.0  }
 0x242   : > { %vm755_vm2 = vcmp.ge.s32.totalorder %v3155_v18, 8  ;;  %vm739_vm10 = vcmp.gt.s32.totalorder %v3155_v18, %v3153_v9 }
 0x243   : > { %814 = vrot.lane.b32.xlu1 %v3091_v53, %s2765_s17  ;;  %812 = vrot.lane.b32.xlu0 %v3093_v24, %s2765_s17  ;;  %v2396_v25 = vpop.f32.mrb[12].mxu0  ;;  %vm754_vm3 = vcmp.gt.s32.totalorder %v3155_v18, %v736_v33  ;;  %vm752_vm5 = vcmp.gt.s32.totalorder %v3155_v18, %v734_v19  ;;  %vm756_vm12 = vmor %vm739_vm10, %vm755_vm2  ;;  %v730_v19 = vadd.s32 72, %v3153_v9 }
 0x244   : > { %v705_v28 = vpop.f32.mrb[13].mxu0  ;;  %v714_v34 = vadd.f32 %v2396_v25, %v2181_v49  ;;  %vm771_vm4 = vmor %vm754_vm3, %vm755_vm2 }
 0x245   : > { %v2397_v29 = vpop.f32.mrb[14].mxu0  ;;  %v706_v58 = vadd.f32 %v2181_v49, %v705_v28  ;;  %v3165_v46 = vsel %vm771_vm4, -1e+30, %v2768_v20  ;;  %vm769_vm6 = vmor %vm752_vm5, %vm755_vm2  ;;  %v723_v28 = vadd.s32 16, %v3153_v9 }
 0x246   : > { %v717_v47 = vadd.f32 %v2397_v29, %v2181_v49  ;;  %v708_v62 = vpop.f32.mrb[15].mxu0  ;;  %v3170_v25 = vsel %vm769_vm6, -1e+30, %v2768_v20  ;;  %v722_v29 = vadd.s32 8, %v3153_v9 }
 0x247   : > { %v709_v35 = vadd.f32 %v2181_v49, %v708_v62  ;;  %vm741_vm7 = vcmp.gt.s32.totalorder %v3155_v18, %v723_v28 }
 0x248   : > { %v3099_v38 = vpack.c.bf16 %v717_v47, %v714_v34  ;;  %vm758_vm8 = vmor %vm741_vm7, %vm755_vm2  ;;  %vm740_vm9 = vcmp.gt.s32.totalorder %v3155_v18, %v722_v29  ;;  %v724_v34 = vadd.s32 24, %v3153_v9 }
 0x249   : > { %v3101_v39 = vpack.c.bf16 %v709_v35, %v706_v58  ;;  %v3182_v62 = vsel %vm758_vm8, -1e+30, %v2768_v20  ;;  %vm757_vm11 = vmor %vm740_vm9, %vm755_vm2  ;;  %v728_v58 = vadd.s32 56, %v3153_v9 }
 0x24a   : > { %818 = vrot.lane.b32.xlu1 %v3099_v38, %s2765_s17  ;;  %vm742_vm13 = vcmp.gt.s32.totalorder %v3155_v18, %v724_v34 }
 0x24b   : > { %816 = vrot.lane.b32.xlu0 %v3101_v39, %s2765_s17  ;;  %vm746_vm14 = vcmp.gt.s32.totalorder %v3155_v18, %v728_v58  ;;  %vm759_vm15 = vmor %vm742_vm13, %vm755_vm2  ;;  %vm748_vm13 = vcmp.gt.s32.totalorder %v3155_v18, %v730_v19 }
 0x24c   : > { %vm763_vm4 = vmor %vm746_vm14, %vm755_vm2 }
 0x24e   : > { %1152 = vrot.lane.b32.xlu1 %v3073_v55, %s2766_s18 }
 0x24f   : > { %1150 = vrot.lane.b32.xlu0 %v3075_v56, %s2766_s18 }
 0x252   : > { %1156 = vrot.lane.b32.xlu1 %v3083_v1, %s2766_s18 }
 0x253   : > { %1154 = vrot.lane.b32.xlu0 %v3085_v6, %s2766_s18 }
 0x256   : > { %1160 = vrot.lane.b32.xlu1 %v3091_v53, %s2766_s18 }
 0x257   : > { %1158 = vrot.lane.b32.xlu0 %v3093_v24, %s2766_s18 }
 0x25a   : > { %1164 = vrot.lane.b32.xlu1 %v3099_v38, %s2766_s18 }
 0x25b   : > { %1303 = vrot.lane.b32.xlu0 %v3075_v56, %s2767_s19 }
 0x25e   : > { %1305 = vrot.lane.b32.xlu1 %v3073_v55, %s2767_s19 }
 0x25f   : > { %1162 = vrot.lane.b32.xlu0 %v3101_v39, %s2766_s18 }
 0x2a4   : > { %v807_v42 = vpop.permute.xlu1 %806 }
 0x2a5   : > { %v805_v44 = vpop.permute.xlu0 %804  ;;  %v849_v10 = vsel %vm820_vm1, %v807_v42, 0 }
 0x2a6   : > { %2562 = vmatprep.subr.msk.bf16.mxu1 %vm820_vm1, %v805_v44  ;;  %v846_v40 = vsel %vm820_vm1, %v805_v44, 0 }
 0x2a7   : > { %2399 = vmatpush3.bf16.xpose.msra.mxu1 %v846_v40 }
 0x2a8   : > { %2563 = vmatprep.subr.msk.bf16.mxu1 %vm820_vm1, %v807_v42  ;;  %v727_v42 = vadd.s32 48, %v3153_v9 }
 0x2aa   : > { %vm745_vm3 = vcmp.gt.s32.totalorder %v3155_v18, %v727_v42 }
 0x2ab   : > { %vm762_vm6 = vmor %vm745_vm3, %vm755_vm2 }
 0x2ac   : > { %v3235_v33 = vsel %vm762_vm6, -1e+30, %v2768_v20  ;;  %vm765_vm3 = vmor %vm748_vm13, %vm755_vm2 }
 0x2ad   : > { %v809_v59 = vpop.permute.xlu1 %808 }
 0x2ae   : > { %v852_v63 = vsel %vm820_vm1, %v809_v59, 0 }
 0x2af   : > { %2401 = vmatpush3.bf16.xpose.msra.mxu1 %v849_v10 }
 0x2b0   : > { %2564 = vmatprep.subr.msk.bf16.mxu1 %vm820_vm1, %v809_v59 }
 0x2b1   : > { %v811_v43 = vpop.permute.xlu1 %810 }
 0x2b2   : > { %v855_v14 = vsel %vm820_vm1, %v811_v43, 0 }
 0x2b5   : > { %v815_v48 = vpop.permute.xlu1 %814  ;;  %v813_v49 = vpop.permute.xlu0 %812 }
 0x2b6   : > { %v858_v54 = vsel %vm820_vm1, %v813_v49, 0  ;;  %v861_v60 = vsel %vm820_vm1, %v815_v48, 0 }
 0x2b7   : > { %2403 = vmatpush3.bf16.xpose.msra.mxu1 %v852_v63  ;;  %v3195_v63 = vsel %vm757_vm11, -1e+30, %v2768_v20 }
 0x2b8   : > { %2565 = vmatprep.subr.msk.bf16.mxu1 %vm820_vm1, %v811_v43 }
 0x2bc   : > { %v819_v13 = vpop.permute.xlu1 %818 }
 0x2bd   : > { %v817_v50 = vpop.permute.xlu0 %816  ;;  %v867_v7 = vsel %vm820_vm1, %v819_v13, 0 }
 0x2be   : > { %v864_v45 = vsel %vm820_vm1, %v817_v50, 0 }
 0x2bf   : > { %2405 = vmatpush3.bf16.xpose.msra.mxu1 %v855_v14  ;;  %v725_v14 = vadd.s32 32, %v3153_v9 }
 0x2c0   : > { %2566 = vmatprep.subr.msk.bf16.mxu1 %vm820_vm1, %v813_v49  ;;  %v1153_v52 = vpop.permute.xlu1 %1152  ;;  %v3198_v49 = vsel %vm756_vm12, -1e+30, %v2768_v20 }
 0x2c1   : > { %v1151_v51 = vpop.permute.xlu0 %1150  ;;  %vm743_vm7 = vcmp.gt.s32.totalorder %v3155_v18, %v725_v14 }
 0x2c2   : > { %2430 = vmatprep.subr.bf16.mxu0 %v1151_v51  ;;  %vm760_vm10 = vmor %vm743_vm7, %vm755_vm2 }
 0x2c3   : > { %2431 = vmatpush3.bf16.msra.mxu0 %v1151_v51 }
 0x2c4   : > { %2432 = vmatprep.subr.bf16.mxu0 %v1153_v52  ;;  %v1157_v41 = vpop.permute.xlu1 %1156 }
 0x2c5   : > { %v1155_v23 = vpop.permute.xlu0 %1154 }
 0x2c7   : > { %2407 = vmatpush3.bf16.xpose.msra.mxu1 %v858_v54  ;;  %2433 = vmatpush3.bf16.msra.mxu0 %v1153_v52  ;;  %v3217_v54 = vsel %vm759_vm15, -1e+30, %v2768_v20 }
 0x2c8   : > { %2567 = vmatprep.subr.msk.bf16.mxu1 %vm820_vm1, %v815_v48  ;;  %2434 = vmatprep.subr.bf16.mxu0 %v1155_v23  ;;  %v1161_v15 = vpop.permute.xlu1 %1160 }
 0x2c9   : > { %v1159_v57 = vpop.permute.xlu0 %1158 }
 0x2cb   : > { %2435 = vmatpush3.bf16.msra.mxu0 %v1155_v23 }
 0x2cc   : > { %2436 = vmatprep.subr.bf16.mxu0 %v1157_v41  ;;  %v1165_v0 = vpop.permute.xlu1 %1164 }
 0x2cd   : > { %v3132_v61 = vpop.permute.xlu0 %1303 }
 0x2cf   : > { %2409 = vmatpush3.bf16.xpose.msra.mxu1 %v861_v60  ;;  %2437 = vmatpush3.bf16.msra.mxu0 %v1157_v41  ;;  %v732_v41 = vadd.s32 88, %v3153_v9 }
 0x2d0   : > { %2568 = vmatprep.subr.msk.bf16.mxu1 %vm820_vm1, %v817_v50  ;;  %2438 = vmatprep.subr.bf16.mxu0 %v1159_v57 }
 0x2d1   : > { %v1163_v30 = vpop.permute.xlu0 %1162  ;;  %vm750_vm9 = vcmp.gt.s32.totalorder %v3155_v18, %v732_v41 }
 0x2d2   : > { %vm767_vm12 = vmor %vm750_vm9, %vm755_vm2 }
 0x2d3   : > { %2439 = vmatpush3.bf16.msra.mxu0 %v1159_v57 }
 0x2d4   : > { %2440 = vmatprep.subr.bf16.mxu0 %v1161_v15 }
 0x2d7   : > { %2411 = vmatpush3.bf16.xpose.msra.mxu1 %v864_v45  ;;  %2441 = vmatpush3.bf16.msra.mxu0 %v1161_v15  ;;  %v3225_v15 = vsel %vm763_vm4, -1e+30, %v2768_v20  ;;  %v731_v45 = vadd.s32 80, %v3153_v9 }
 0x2d8   : > { %2569 = vmatprep.subr.msk.bf16.mxu1 %vm820_vm1, %v819_v13  ;;  %2442 = vmatprep.subr.bf16.mxu0 %v1163_v30  ;;  %v726_v13 = vadd.s32 40, %v3153_v9 }
 0x2d9   : > { %vm749_vm11 = vcmp.gt.s32.totalorder %v3155_v18, %v731_v45 }
 0x2da   : > { %vm744_vm5 = vcmp.gt.s32.totalorder %v3155_v18, %v726_v13  ;;  %vm766_vm14 = vmor %vm749_vm11, %vm755_vm2  ;;  %v735_v13 = vadd.s32 112, %v3153_v9 }
 0x2db   : > { %2443 = vmatpush3.bf16.msra.mxu0 %v1163_v30  ;;  %vm761_vm8 = vmor %vm744_vm5, %vm755_vm2 }
 0x2dc   : > { %2444 = vmatprep.subr.bf16.mxu0 %v1165_v0  ;;  %v3246_v34 = vsel %vm761_vm8, -1e+30, %v2768_v20  ;;  %vm753_vm5 = vcmp.gt.s32.totalorder %v3155_v18, %v735_v13 }
 0x2dd   : > { %vm770_vm6 = vmor %vm753_vm5, %vm755_vm2 }
 0x2df   : > { %2413 = vmatpush3.bf16.xpose.msra.mxu1 %v867_v7  ;;  %2445 = vmatpush3.bf16.msra.mxu0 %v1165_v0 }
 0x2e0   : > { %2570 = vmatprep.subr.msk.bf16.mxu0 %vm820_vm1, %v3132_v61 }
 0x2e6   : > { %2415 = vmatmul.mubr.msk.bf16.vlgmr.msra.gmra.mrb[0].mxu1 %vm820_vm1, %v3073_v55 }
 0x2e7   : > { %2418 = vmatprep.mubr.msk.bf16.mxu1 %vm820_vm1, %v3085_v6 }
 0x2ee   : > { %2419 = vmatmul.mubr.msk.bf16.gmra.mrb[4].mxu1 %vm820_vm1, %v3083_v1 }
 0x2ef   : > { %2422 = vmatprep.mubr.msk.bf16.mxu1 %vm820_vm1, %v3093_v24 }
 0x2f6   : > { %2423 = vmatmul.mubr.msk.bf16.gmra.mrb[8].mxu1 %vm820_vm1, %v3091_v53 }
 0x2f7   : > { %2426 = vmatprep.mubr.msk.bf16.mxu1 %vm820_vm1, %v3101_v39 }
 0x2fe   : > { %2427 = vmatmul.mubr.msk.bf16.gmra.mrb[12].mxu1 %vm820_vm1, %v3099_v38 }
 0x3b9   : > { %v2416_v47 = vpop.f32.mrb[0].mxu1 }
 0x3ba   : > { %v968_v35 = vmul.f32 0.25, %v2416_v47  ;;  %v903_v44 = vpop.f32.mrb[1].mxu1  ;;  %v729_v47 = vadd.s32 64, %v3153_v9 }
 0x3bb   : > { %v2417_v40 = vpop.f32.mrb[2].mxu1  ;;  %v966_v59 = vmul.f32 0.25, %v903_v44 }
 0x3bc   : > { %v906_v10 = vpop.f32.mrb[3].mxu1  ;;  %v3192_v43 = vadd.f32 %v968_v35, %v3182_v62  ;;  %v969_v51 = vmul.f32 0.25, %v2417_v40  ;;  %v3257_v40 = vsel %vm760_vm10, -1e+30, %v2768_v20  ;;  %vm747_vm15 = vcmp.gt.s32.totalorder %v3155_v18, %v729_v47 }
 0x3bd   : > { %v967_v48 = vmul.f32 0.25, %v906_v10  ;;  %v3211_v52 = vadd.f32 %v966_v59, %v3198_v49  ;;  %vm764_vm4 = vmor %vm747_vm15, %vm755_vm2 }
 0x3be   : > { %1002 = vmax.xlane.f32.xlu0 %v3192_v43  ;;  %v3230_v8 = vadd.f32 %v969_v51, %v3217_v54  ;;  %v3296_v47 = vsel %vm764_vm4, -1e+30, %v2768_v20 }
 0x3bf   : > { %v3206_v50 = vadd.f32 %v967_v48, %v3195_v63  ;;  %v3267_v48 = vsel %vm767_vm12, -1e+30, %v2768_v20 }
 0x3c1   : > { %1000 = vmax.xlane.f32.xlu1 %v3206_v50  ;;  %v2420_v23 = vpop.f32.mrb[4].mxu1 }
 0x3c2   : > { %998 = vmax.xlane.f32.xlu0 %v3211_v52  ;;  %v919_v57 = vpop.f32.mrb[5].mxu1  ;;  %v972_v30 = vmul.f32 0.25, %v2420_v23 }
 0x3c3   : > { %v2421_v60 = vpop.f32.mrb[6].mxu1  ;;  %v970_v58 = vmul.f32 0.25, %v919_v57  ;;  %v3278_v57 = vsel %vm766_vm14, -1e+30, %v2768_v20 }
 0x3c4   : > { %v973_v0 = vmul.f32 0.25, %v2421_v60  ;;  %v922_v7 = vpop.f32.mrb[7].mxu1  ;;  %v3252_v35 = vadd.f32 %v972_v30, %v3235_v33  ;;  %v3287_v30 = vsel %vm765_vm3, -1e+30, %v2768_v20 }
 0x3c5   : > { %v971_v28 = vmul.f32 0.25, %v922_v7  ;;  %v3273_v41 = vadd.f32 %v970_v58, %v3257_v40 }
 0x3c6   : > { %1004 = vmax.xlane.f32.xlu0 %v3230_v8  ;;  %v3241_v29 = vadd.f32 %v973_v0, %v3225_v15  ;;  %v733_v0 = vadd.s32 96, %v3153_v9 }
 0x3c7   : > { %v3262_v59 = vadd.f32 %v971_v28, %v3246_v34 }
 0x3c8   : > { %1012 = vmax.xlane.f32.xlu1 %v3241_v29  ;;  %vm751_vm7 = vcmp.gt.s32.totalorder %v3155_v18, %v733_v0 }
 0x3c9   : > { %v2424_v44 = vpop.f32.mrb[8].mxu1  ;;  %vm768_vm8 = vmor %vm751_vm7, %vm755_vm2 }
 0x3ca   : > { %1010 = vmax.xlane.f32.xlu0 %v3252_v35  ;;  %v935_v42 = vpop.f32.mrb[9].mxu1  ;;  %v976_v14 = vmul.f32 0.25, %v2424_v44 }
 0x3cb   : > { %v2425_v10 = vpop.f32.mrb[10].mxu1  ;;  %v974_v7 = vmul.f32 0.25, %v935_v42 }
 0x3cc   : > { %v977_v51 = vmul.f32 0.25, %v2425_v10  ;;  %1008 = vmax.xlane.f32.xlu1 %v3262_v59  ;;  %v938_v23 = vpop.f32.mrb[11].mxu1  ;;  %v3293_v19 = vadd.f32 %v976_v14, %v3278_v57  ;;  %v3310_v14 = vsel %vm770_vm6, -1e+30, %v2768_v20 }
 0x3cd   : > { %v975_v60 = vmul.f32 0.25, %v938_v23  ;;  %v3307_v13 = vadd.f32 %v974_v7, %v3296_v47 }
 0x3ce   : > { %1006 = vmax.xlane.f32.xlu0 %v3273_v41  ;;  %v3282_v45 = vadd.f32 %v977_v51, %v3267_v48 }
 0x3cf   : > { %v3300_v44 = vadd.f32 %v975_v60, %v3287_v30  ;;  %v3319_v60 = vsel %vm768_vm8, -1e+30, %v2768_v20 }
 0x3d0   : > { %1020 = vmax.xlane.f32.xlu1 %v3282_v45 }
 0x3d1   : > { %v2428_v28 = vpop.f32.mrb[12].mxu1 }
 0x3d2   : > { %1018 = vmax.xlane.f32.xlu0 %v3293_v19  ;;  %v951_v58 = vpop.f32.mrb[13].mxu1  ;;  %v980_v42 = vmul.f32 0.25, %v2428_v28 }
 0x3d3   : > { %v2429_v9 = vpop.f32.mrb[14].mxu1  ;;  %v978_v51 = vmul.f32 0.25, %v951_v58  ;;  %v3338_v58 = vpop.permute.xlu1 %1305 }
 0x3d4   : > { %1016 = vmax.xlane.f32.xlu1 %v3300_v44  ;;  %v954_v10 = vpop.f32.mrb[15].mxu1  ;;  %v3316_v23 = vadd.f32 %v980_v42, %v3310_v14  ;;  %v981_v18 = vmul.f32 0.25, %v2429_v9 }
 0x3d5   : > { %v3323_v0 = vadd.f32 %v978_v51, %v3319_v60  ;;  %v979_v7 = vmul.f32 0.25, %v954_v10 }
 0x3d6   : > { %1014 = vmax.xlane.f32.xlu0 %v3307_v13  ;;  %v3331_v28 = vadd.f32 %v981_v18, %v3165_v46 }
 0x3d7   : > { %v3335_v20 = vadd.f32 %v979_v7, %v3170_v25 }
 0x3da   : > { %1026 = vmax.xlane.f32.xlu0 %v3316_v23 }
 0x3de   : > { %1022 = vmax.xlane.f32.xlu0 %v3323_v0 }
 0x3e5   : > { %1309 = vrot.lane.b32.xlu1 %v3083_v1, %s2767_s19 }
 0x3f4   : > { %1307 = vrot.lane.b32.xlu0 %v3085_v6, %s2767_s19 }
 0x409   : > { %1028 = vmax.xlane.f32.xlu1 %v3331_v28 }
 0x40d   : > { %1024 = vmax.xlane.f32.xlu1 %v3335_v20 }
 0x44b   : > { %v1003_v42 = vpop.xlane.xlu0 %1002 }
 0x44c   : > { %v1032_v51 = vsub.f32 %v3192_v43, %v1003_v42 }
 0x44e   : > { %v1050_v32 = vmul.f32 1.442695, %v1032_v51  ;;  %v1001_v37 = vpop.xlane.xlu1 %1000 }
 0x44f   : > { %v1031_v9 = vsub.f32 %v3206_v50, %v1001_v37  ;;  %v999_v10 = vpop.xlane.xlu0 %998 }
 0x450   : > { %2629 = vpow2.f32 %v1050_v32  ;;  %v1030_v18 = vsub.f32 %v3211_v52, %v999_v10 }
 0x451   : > { %v1048_v31 = vmul.f32 1.442695, %v1031_v9 }
 0x452   : > { %v1046_v36 = vmul.f32 1.442695, %v1030_v18 }
 0x453   : > { %2631 = vpow2.f32 %v1048_v31  ;;  %v1005_v7 = vpop.xlane.xlu0 %1004 }
 0x454   : > { %2633 = vpow2.f32 %v1046_v36  ;;  %v1033_v22 = vsub.f32 %v3230_v8, %v1005_v7 }
 0x456   : > { %v1052_v27 = vmul.f32 1.442695, %v1033_v22 }
 0x457   : > { %v1011_v31 = vpop.xlane.xlu0 %1010 }
 0x458   : > { %2635 = vpow2.f32 %v1052_v27  ;;  %v1013_v27 = vpop.xlane.xlu1 %1012  ;;  %v1036_v50 = vsub.f32 %v3252_v35, %v1011_v31 }
 0x459   : > { %v1037_v7 = vsub.f32 %v3241_v29, %v1013_v27 }
 0x45a   : > { %v3344_v21 = vpop.eup %2629  ;;  %v1058_v42 = vmul.f32 1.442695, %v1036_v50 }
 0x45b   : > { %1082 = vadd.xlane.f32.xlu1 %v3344_v21  ;;  %v1007_v22 = vpop.xlane.xlu0 %1006  ;;  %v1060_v11 = vmul.f32 1.442695, %v1037_v7 }
 0x45c   : > { %v1009_v52 = vpop.xlane.xlu1 %1008  ;;  %v1034_v51 = vsub.f32 %v3273_v41, %v1007_v22  ;;  %2637 = vpow2.f32 %v1058_v42 }
 0x45d   : > { %v3347_v43 = vpop.eup %2631  ;;  %v1035_v9 = vsub.f32 %v3262_v59, %v1009_v52 }
 0x45e   : > { %v3349_v37 = vpop.eup %2633  ;;  %1080 = vadd.xlane.f32.xlu0 %v3347_v43  ;;  %v1054_v26 = vmul.f32 1.442695, %v1034_v51 }
 0x45f   : > { %1078 = vadd.xlane.f32.xlu1 %v3349_v37  ;;  %v1019_v36 = vpop.xlane.xlu0 %1018  ;;  %v1056_v12 = vmul.f32 1.442695, %v1035_v9 }
 0x460   : > { %v1021_v10 = vpop.xlane.xlu1 %1020  ;;  %v1040_v17 = vsub.f32 %v3293_v19, %v1019_v36  ;;  %2639 = vpow2.f32 %v1054_v26 }
 0x461   : > { %2641 = vpow2.f32 %v1056_v12  ;;  %v1041_v29 = vsub.f32 %v3282_v45, %v1021_v10 }
 0x462   : > { %v3353_v32 = vpop.eup %2635  ;;  %v1066_v31 = vmul.f32 1.442695, %v1040_v17  ;;  %2643 = vpow2.f32 %v1060_v11 }
 0x463   : > { %1084 = vadd.xlane.f32.xlu1 %v3353_v32  ;;  %v1015_v8 = vpop.xlane.xlu0 %1014  ;;  %v1068_v17 = vmul.f32 1.442695, %v1041_v29 }
 0x464   : > { %v1017_v16 = vpop.xlane.xlu1 %1016  ;;  %v1038_v41 = vsub.f32 %v3307_v13, %v1015_v8  ;;  %2645 = vpow2.f32 %v1066_v31 }
 0x465   : > { %v1039_v26 = vsub.f32 %v3300_v44, %v1017_v16 }
 0x466   : > { %v1062_v27 = vmul.f32 1.442695, %v1038_v41  ;;  %v3369_v52 = vpop.eup %2637 }
 0x467   : > { %v1027_v18 = vpop.xlane.xlu0 %1026 }
 0x468   : > { %v1044_v35 = vsub.f32 %v3316_v23, %v1027_v18  ;;  %v3371_v19 = vpop.permute.xlu1 %1309 }
 0x46a   : > { %v1074_v59 = vmul.f32 1.442695, %v1044_v35  ;;  %v3375_v11 = vpop.eup %2639 }
 0x46b   : > { %v1023_v22 = vpop.xlane.xlu0 %1022  ;;  %v3377_v23 = vpop.eup %2641 }
 0x46c   : > { %v1042_v50 = vsub.f32 %v3323_v0, %v1023_v22  ;;  %2647 = vpow2.f32 %v1074_v59  ;;  %v1064_v0 = vmul.f32 1.442695, %v1039_v26  ;;  %v3382_v8 = vpop.eup %2643 }
 0x46d   : > { %2649 = vpow2.f32 %v1062_v27 }
 0x46e   : > { %v1070_v12 = vmul.f32 1.442695, %v1042_v50  ;;  %v3384_v16 = vpop.eup %2645 }
 0x46f   : > { %v1308_v31 = vpop.permute.xlu0 %1307 }
 0x470   : > { %2651 = vpow2.f32 %v1070_v12 }
 0x471   : > { %2653 = vpow2.f32 %v1068_v17 }
 0x474   : > { %1311 = vrot.lane.b32.xlu0 %v3093_v24, %s2767_s19  ;;  %1313 = vrot.lane.b32.xlu1 %v3091_v53, %s2767_s19 }
 0x476   : > { %v3389_v51 = vpop.eup %2647 }
 0x477   : > { %v3391_v9 = vpop.eup %2649 }
 0x47a   : > { %v3395_v10 = vpop.eup %2651 }
 0x47b   : > { %v3397_v18 = vpop.eup %2653 }
 0x493   : > { %1090 = vadd.xlane.f32.xlu0 %v3369_v52 }
 0x496   : > { %v1029_v13 = vpop.xlane.xlu1 %1028 }
 0x497   : > { %v1045_v45 = vsub.f32 %v3331_v28, %v1029_v13  ;;  %1086 = vadd.xlane.f32.xlu0 %v3375_v11 }
 0x498   : > { %1088 = vadd.xlane.f32.xlu1 %v3377_v23 }
 0x499   : > { %v1076_v36 = vmul.f32 1.442695, %v1045_v45 }
 0x49a   : > { %v1025_v42 = vpop.xlane.xlu1 %1024 }
 0x49b   : > { %2655 = vpow2.f32 %v1076_v36  ;;  %v1043_v44 = vsub.f32 %v3335_v20, %v1025_v42  ;;  %1092 = vadd.xlane.f32.xlu0 %v3382_v8 }
 0x49c   : > { %1098 = vadd.xlane.f32.xlu1 %v3384_v16  ;;  %2657 = vpow2.f32 %v1064_v0  ;;  %v1344_v0 = vsel %vm820_vm1, %v3132_v61, 0 }
 0x49d   : > { %v1072_v28 = vmul.f32 1.442695, %v1043_v44 }
 0x49f   : > { %1106 = vadd.xlane.f32.xlu0 %v3389_v51  ;;  %2659 = vpow2.f32 %v1072_v28 }
 0x4a0   : > { %1094 = vadd.xlane.f32.xlu1 %v3391_v9 }
 0x4a3   : > { %1102 = vadd.xlane.f32.xlu0 %v3395_v10 }
 0x4a4   : > { %1100 = vadd.xlane.f32.xlu1 %v3397_v18 }
 0x4a5   : > { %v3401_v20 = vpop.eup %2655 }
 0x4a6   : > { %v3403_v7 = vpop.eup %2657 }
 0x4a7   : > { %1108 = vadd.xlane.f32.xlu0 %v3401_v20 }
 0x4a8   : > { %1096 = vadd.xlane.f32.xlu1 %v3403_v7 }
 0x4a9   : > { %v3407_v35 = vpop.eup %2659 }
 0x4ac   : > { %1104 = vadd.xlane.f32.xlu1 %v3407_v35 }
 0x4bd   : > { %1317 = vrot.lane.b32.xlu1 %v3099_v38, %s2767_s19  ;;  %1315 = vrot.lane.b32.xlu0 %v3101_v39, %s2767_s19 }
 0x4c1   : > { %1289 = vrot.lane.b32.xlu1 %v3073_v55, %s2769_s20  ;;  %1287 = vrot.lane.b32.xlu0 %v3075_v56, %s2769_s20 }
 0x4c5   : > { %1293 = vrot.lane.b32.xlu1 %v3083_v1, %s2769_s20  ;;  %1291 = vrot.lane.b32.xlu0 %v3085_v6, %s2769_s20 }
 0x4c9   : > { %1297 = vrot.lane.b32.xlu1 %v3091_v53, %s2769_s20  ;;  %1295 = vrot.lane.b32.xlu0 %v3093_v24, %s2769_s20 }
 0x4cd   : > { %1301 = vrot.lane.b32.xlu1 %v3099_v38, %s2769_s20  ;;  %1299 = vrot.lane.b32.xlu0 %v3101_v39, %s2769_s20 }
 0x4d1   : > { %1650 = vrot.lane.b32.xlu1 %v3073_v55, %s2770_s21  ;;  %1648 = vrot.lane.b32.xlu0 %v3075_v56, %s2770_s21 }
 0x4d5   : > { %1652 = vrot.lane.b32.xlu0 %v3085_v6, %s2770_s21 }
 0x4e8   : > { %v1083_v41 = vpop.xlane.xlu1 %1082 }
 0x4eb   : > { %v1081_v22 = vpop.xlane.xlu0 %1080 }
 0x4ec   : > { %2661 = vrcp.f32 %v1081_v22  ;;  %v1079_v59 = vpop.xlane.xlu1 %1078 }
 0x4ed   : > { %2663 = vrcp.f32 %v1079_v59 }
 0x4ee   : > { %2665 = vrcp.f32 %v1083_v41 }
 0x4ef   : > { %v1312_v61 = vpop.permute.xlu0 %1311 }
 0x4f0   : > { %v1085_v50 = vpop.xlane.xlu1 %1084 }
 0x4f1   : > { %2667 = vrcp.f32 %v1085_v50 }
 0x4f6   : > { %v2662_v29 = vpop.eup %2661 }
 0x4f7   : > { %v2664_v27 = vpop.eup %2663  ;;  %v1127_v12 = vmul.f32 %v2662_v29, %v3347_v43  ;;  %v1347_v43 = vsel %vm820_vm1, %v3338_v58, 0 }
 0x4f8   : > { %v1126_v55 = vmul.f32 %v2664_v27, %v3349_v37  ;;  %v2666_v17 = vpop.eup %2665  ;;  %v1353_v37 = vsel %vm820_vm1, %v3371_v19, 0 }
 0x4f9   : > { %v1128_v6 = vmul.f32 %v2666_v17, %v3344_v21  ;;  %v1350_v21 = vsel %vm820_vm1, %v1308_v31, 0 }
 0x4fa   : > { %v1142_v56 = vpack.c.bf16 %v1127_v12, %v1126_v55 }
 0x4fb   : > { %v2668_v26 = vpop.eup %2667 }
 0x4fc   : > { %v1129_v13 = vmul.f32 %v2668_v26, %v3353_v32  ;;  %2446 = vmatprep.mubr.bf16.mxu0 %v1142_v56  ;;  %v1356_v32 = vsel %vm820_vm1, %v1312_v61, 0 }
 0x4fe   : > { %v1143_v45 = vpack.c.bf16 %v1129_v13, %v1128_v6 }
 0x500   : > { %2447 = vmatmul.mubr.bf16.vlgmr.msra.gmra.mrb[16].mxu0 %v1143_v45 }
 0x501   : > { %2463 = vmatpush3.bf16.xpose.msra.mxu0 %v1344_v0 }
 0x502   : > { %2571 = vmatprep.subr.msk.bf16.mxu0 %vm820_vm1, %v3338_v58  ;;  %v1314_v58 = vpop.permute.xlu1 %1313 }
 0x503   : > { %v1359_v28 = vsel %vm820_vm1, %v1314_v58, 0 }
 0x509   : > { %2465 = vmatpush3.bf16.xpose.msra.mxu0 %v1347_v43 }
 0x50a   : > { %2572 = vmatprep.subr.msk.bf16.mxu0 %vm820_vm1, %v1308_v31 }
 0x511   : > { %2467 = vmatpush3.bf16.xpose.msra.mxu0 %v1350_v21 }
 0x512   : > { %2573 = vmatprep.subr.msk.bf16.mxu0 %vm820_vm1, %v3371_v19 }
 0x519   : > { %2469 = vmatpush3.bf16.xpose.msra.mxu0 %v1353_v37 }
 0x51a   : > { %2574 = vmatprep.subr.msk.bf16.mxu0 %vm820_vm1, %v1312_v61 }
 0x520   : > { %v1091_v36 = vpop.xlane.xlu0 %1090 }
 0x521   : > { %2471 = vmatpush3.bf16.xpose.msra.mxu0 %v1356_v32 }
 0x522   : > { %2575 = vmatprep.subr.msk.bf16.mxu0 %vm820_vm1, %v1314_v58 }
 0x524   : > { %v1087_v42 = vpop.xlane.xlu0 %1086 }
 0x525   : > { %2669 = vrcp.f32 %v1087_v42  ;;  %v1089_v44 = vpop.xlane.xlu1 %1088 }
 0x526   : > { %2671 = vrcp.f32 %v1089_v44 }
 0x527   : > { %2673 = vrcp.f32 %v1091_v36 }
 0x528   : > { %v1093_v31 = vpop.xlane.xlu0 %1092 }
 0x529   : > { %2473 = vmatpush3.bf16.xpose.msra.mxu0 %v1359_v28  ;;  %2675 = vrcp.f32 %v1093_v31  ;;  %v1099_v19 = vpop.xlane.xlu1 %1098 }
 0x52c   : > { %v1107_v41 = vpop.xlane.xlu0 %1106 }
 0x52d   : > { %v1095_v22 = vpop.xlane.xlu1 %1094 }
 0x52f   : > { %v2670_v59 = vpop.eup %2669 }
 0x530   : > { %v2672_v50 = vpop.eup %2671  ;;  %v1103_v29 = vpop.xlane.xlu0 %1102  ;;  %v1130_v27 = vmul.f32 %v2670_v59, %v3375_v11 }
 0x531   : > { %v2674_v12 = vpop.eup %2673  ;;  %v1101_v55 = vpop.xlane.xlu1 %1100  ;;  %v1131_v17 = vmul.f32 %v2672_v50, %v3377_v23 }
 0x532   : > { %2677 = vrcp.f32 %v1101_v55  ;;  %v1132_v13 = vmul.f32 %v2674_v12, %v3369_v52 }
 0x533   : > { %v2676_v56 = vpop.eup %2675  ;;  %v1144_v26 = vpack.c.bf16 %v1131_v17, %v1130_v27  ;;  %2679 = vrcp.f32 %v1095_v22 }
 0x534   : > { %v1109_v6 = vpop.xlane.xlu0 %1108  ;;  %v1133_v45 = vmul.f32 %v2676_v56, %v3382_v8  ;;  %2681 = vrcp.f32 %v1099_v19 }
 0x535   : > { %v1097_v0 = vpop.xlane.xlu1 %1096  ;;  %2450 = vmatprep.mubr.bf16.mxu0 %v1144_v26 }
 0x536   : > { %2683 = vrcp.f32 %v1097_v0  ;;  %v1145_v43 = vpack.c.bf16 %v1133_v45, %v1132_v13 }
 0x537   : > { %2685 = vrcp.f32 %v1103_v29 }
 0x538   : > { %2451 = vmatmul.mubr.bf16.gmra.mrb[20].mxu0 %v1145_v43  ;;  %v1316_v11 = vpop.permute.xlu0 %1315 }
 0x539   : > { %v1362_v21 = vsel %vm820_vm1, %v1316_v11, 0  ;;  %v1105_v23 = vpop.xlane.xlu1 %1104  ;;  %2576 = vmatprep.subr.msk.bf16.mxu0 %vm820_vm1, %v1316_v11 }
 0x53a   : > { %2687 = vrcp.f32 %v1105_v23  ;;  %2475 = vmatpush3.bf16.xpose.msra.mxu0 %v1362_v21 }
 0x53b   : > { %2689 = vrcp.f32 %v1109_v6 }
 0x53c   : > { %v1288_v37 = vpop.permute.xlu0 %1287  ;;  %v2678_v52 = vpop.eup %2677  ;;  %2691 = vrcp.f32 %v1107_v41 }
 0x53d   : > { %v1318_v8 = vpop.permute.xlu1 %1317  ;;  %v2680_v61 = vpop.eup %2679  ;;  %v1137_v42 = vmul.f32 %v2678_v52, %v3397_v18 }
 0x53e   : > { %2577 = vmatprep.subr.msk.bf16.mxu0 %vm820_vm1, %v1318_v8  ;;  %v2682_v32 = vpop.eup %2681  ;;  %v1365_v44 = vsel %vm820_vm1, %v1318_v8, 0  ;;  %v1134_v31 = vmul.f32 %v2680_v61, %v3391_v9 }
 0x53f   : > { %v1136_v41 = vmul.f32 %v2682_v32, %v3384_v16 }
 0x540   : > { %v2684_v36 = vpop.eup %2683  ;;  %v1292_v58 = vpop.permute.xlu0 %1291 }
 0x541   : > { %v1290_v28 = vpop.permute.xlu1 %1289  ;;  %v1135_v19 = vmul.f32 %v2684_v36, %v3403_v7  ;;  %v2686_v22 = vpop.eup %2685  ;;  %v1147_v27 = vpack.c.bf16 %v1137_v42, %v1136_v41 }
 0x542   : > { %2477 = vmatpush3.bf16.xpose.msra.mxu0 %v1365_v44  ;;  %v1138_v18 = vmul.f32 %v2686_v22, %v3395_v10 }
 0x543   : > { %v1146_v59 = vpack.c.bf16 %v1135_v19, %v1134_v31 }
 0x544   : > { %v2688_v50 = vpop.eup %2687  ;;  %v1296_v29 = vpop.permute.xlu0 %1295 }
 0x545   : > { %v2690_v12 = vpop.eup %2689  ;;  %v1294_v55 = vpop.permute.xlu1 %1293  ;;  %2454 = vmatprep.mubr.bf16.mxu0 %v1146_v59  ;;  %v1139_v17 = vmul.f32 %v2688_v50, %v3407_v35 }
 0x546   : > { %2455 = vmatmul.mubr.bf16.gmra.mrb[24].mxu0 %v1147_v27  ;;  %v2692_v56 = vpop.eup %2691  ;;  %v1141_v7 = vmul.f32 %v2690_v12, %v3401_v20 }
 0x547   : > { %v1148_v9 = vpack.c.bf16 %v1139_v17, %v1138_v18  ;;  %v1140_v16 = vmul.f32 %v2692_v56, %v3389_v51 }
 0x548   : > { %v1300_v26 = vpop.permute.xlu0 %1299 }
 0x549   : > { %v1298_v6 = vpop.permute.xlu1 %1297  ;;  %2458 = vmatprep.mubr.bf16.mxu0 %v1148_v9  ;;  %v1149_v45 = vpack.c.bf16 %v1141_v7, %v1140_v16 }
 0x54c   : > { %v1649_v13 = vpop.permute.xlu0 %1648 }
 0x54d   : > { %v1302_v0 = vpop.permute.xlu1 %1301  ;;  %2494 = vmatprep.subr.bf16.mxu0 %v1649_v13  ;;  %2546 = vmatprep.subr.bf16.mxu1 %v1649_v13 }
 0x54e   : > { %2459 = vmatmul.mubr.bf16.gmra.mrb[28].mxu0 %v1149_v45  ;;  %2554 = vmatpush3.bf16.msra.mxu1 %v1649_v13 }
 0x54f   : > { %2478 = vmatprep.mubr.msk.bf16.mxu0 %vm820_vm1, %v1288_v37 }
 0x550   : > { %v1653_v35 = vpop.permute.xlu0 %1652 }
 0x551   : > { %v1651_v10 = vpop.permute.xlu1 %1650 }
 0x552   : > { %2547 = vmatprep.subr.bf16.mxu1 %v1651_v10 }
 0x553   : > { %2555 = vmatpush3.bf16.msra.mxu1 %v1651_v10 }
 0x554   : > { %2548 = vmatprep.subr.bf16.mxu1 %v1653_v35 }
 0x556   : > { %2479 = vmatmul.mubr.msk.bf16.vlgmr.msra.gmra.mrb[32].mxu0 %vm820_vm1, %v1290_v28 }
 0x557   : > { %2495 = vmatpush3.bf16.msra.mxu0 %v1649_v13  ;;  %2482 = vmatprep.mubr.msk.bf16.mxu0 %vm820_vm1, %v1292_v58 }
 0x558   : > { %2496 = vmatprep.subr.bf16.mxu0 %v1651_v10  ;;  %2556 = vmatpush3.bf16.msra.mxu1 %v1653_v35 }
 0x55b   : > { %2497 = vmatpush3.bf16.msra.mxu0 %v1651_v10 }
 0x55c   : > { %2498 = vmatprep.subr.bf16.mxu0 %v1653_v35 }
 0x55e   : > { %2483 = vmatmul.mubr.msk.bf16.gmra.mrb[36].mxu0 %vm820_vm1, %v1294_v55 }
 0x55f   : > { %2499 = vmatpush3.bf16.msra.mxu0 %v1653_v35  ;;  %2486 = vmatprep.mubr.msk.bf16.mxu0 %vm820_vm1, %v1296_v29 }
 0x566   : > { %2487 = vmatmul.mubr.msk.bf16.gmra.mrb[40].mxu0 %vm820_vm1, %v1298_v6 }
 0x567   : > { %2490 = vmatprep.mubr.msk.bf16.mxu0 %vm820_vm1, %v1300_v26 }
 0x56e   : > { %2491 = vmatmul.mubr.msk.bf16.gmra.mrb[44].mxu0 %vm820_vm1, %v1302_v0 }
 0x5d3   : > { %v2448_v51 = vpop.f32.mrb[16].mxu0 }
 0x5d4   : > { %1273 = vst.msk [vmem:[#allocation2 + $0x10] sm:$0xff] %vm820_vm1, %v2448_v51  ;;  %v1208_v20 = vpop.f32.mrb[17].mxu0 }
 0x5d5   : > { %1271 = vst.msk [vmem:[#allocation2] sm:$0xff] %vm820_vm1, %v1208_v20  ;;  %v2449_v43 = vpop.f32.mrb[18].mxu0 }
 0x5d6   : > { %1274 = vst.msk [vmem:[#allocation2 + $0x18] sm:$0xff] %vm820_vm1, %v2449_v43  ;;  %v1211_v11 = vpop.f32.mrb[19].mxu0 }
 0x5d7   : > { %1272 = vst.msk [vmem:[#allocation2 + $0x8] sm:$0xff] %vm820_vm1, %v1211_v11 }
 0x60b   : > { %v2452_v21 = vpop.f32.mrb[20].mxu0 }
 0x60c   : > { %1277 = vst.msk [vmem:[#allocation2 + $0x30] sm:$0xff] %vm820_vm1, %v2452_v21  ;;  %v1224_v23 = vpop.f32.mrb[21].mxu0 }
 0x60d   : > { %1275 = vst.msk [vmem:[#allocation2 + $0x20] sm:$0xff] %vm820_vm1, %v1224_v23  ;;  %v2453_v37 = vpop.f32.mrb[22].mxu0 }
 0x60e   : > { %1278 = vst.msk [vmem:[#allocation2 + $0x38] sm:$0xff] %vm820_vm1, %v2453_v37  ;;  %v1227_v52 = vpop.f32.mrb[23].mxu0 }
 0x60f   : > { %1276 = vst.msk [vmem:[#allocation2 + $0x28] sm:$0xff] %vm820_vm1, %v1227_v52 }
 0x619   : > { %v2456_v8 = vpop.f32.mrb[24].mxu0 }
 0x61a   : > { %1281 = vst.msk [vmem:[#allocation2 + $0x50] sm:$0xff] %vm820_vm1, %v2456_v8  ;;  %v1240_v61 = vpop.f32.mrb[25].mxu0 }
 0x61b   : > { %1279 = vst.msk [vmem:[#allocation2 + $0x40] sm:$0xff] %vm820_vm1, %v1240_v61  ;;  %v2457_v32 = vpop.f32.mrb[26].mxu0 }
 0x61c   : > { %1282 = vst.msk [vmem:[#allocation2 + $0x58] sm:$0xff] %vm820_vm1, %v2457_v32  ;;  %v1243_v36 = vpop.f32.mrb[27].mxu0 }
 0x61d   : > { %1280 = vst.msk [vmem:[#allocation2 + $0x48] sm:$0xff] %vm820_vm1, %v1243_v36 }
 0x621   : > { %v2460_v58 = vpop.f32.mrb[28].mxu0 }
 0x622   : > { %1285 = vst.msk [vmem:[#allocation2 + $0x70] sm:$0xff] %vm820_vm1, %v2460_v58  ;;  %v1256_v42 = vpop.f32.mrb[29].mxu0 }
 0x623   : > { %1283 = vst.msk [vmem:[#allocation2 + $0x60] sm:$0xff] %vm820_vm1, %v1256_v42  ;;  %v2461_v44 = vpop.f32.mrb[30].mxu0 }
 0x624   : > { %1286 = vst.msk [vmem:[#allocation2 + $0x78] sm:$0xff] %vm820_vm1, %v2461_v44  ;;  %v1259_v28 = vpop.f32.mrb[31].mxu0 }
 0x625   : > { %1284 = vst.msk [vmem:[#allocation2 + $0x68] sm:$0xff] %vm820_vm1, %v1259_v28  ;;  %vm1833_vm1 = vcmask 261248  }
 0x629   : > { %v2480_v31 = vpop.f32.mrb[32].mxu0 }
 0x62a   : > { %v1466_v19 = vmul.f32 0.25, %v2480_v31  ;;  %v1401_v22 = vpop.f32.mrb[33].mxu0 }
 0x62b   : > { %v2481_v41 = vpop.f32.mrb[34].mxu0  ;;  %v1464_v50 = vmul.f32 0.25, %v1401_v22 }
 0x62c   : > { %v3489_v59 = vadd.f32 %v1466_v19, %v3182_v62  ;;  %v1404_v29 = vpop.f32.mrb[35].mxu0  ;;  %v1467_v18 = vmul.f32 0.25, %v2481_v41 }
 0x62d   : > { %v1465_v27 = vmul.f32 0.25, %v1404_v29  ;;  %v3496_v55 = vadd.f32 %v1464_v50, %v3198_v49 }
 0x62e   : > { %1500 = vmax.xlane.f32.xlu0 %v3489_v59  ;;  %v3501_v9 = vadd.f32 %v1467_v18, %v3217_v54 }
 0x62f   : > { %v3493_v12 = vadd.f32 %v1465_v27, %v3195_v63 }
 0x631   : > { %1498 = vmax.xlane.f32.xlu1 %v3493_v12  ;;  %v2484_v17 = vpop.f32.mrb[36].mxu0 }
 0x632   : > { %1496 = vmax.xlane.f32.xlu0 %v3496_v55  ;;  %v1417_v56 = vpop.f32.mrb[37].mxu0  ;;  %v1470_v26 = vmul.f32 0.25, %v2484_v17 }
 0x633   : > { %v2485_v62 = vpop.f32.mrb[38].mxu0  ;;  %v1468_v13 = vmul.f32 0.25, %v1417_v56 }
 0x634   : > { %v1471_v7 = vmul.f32 0.25, %v2485_v62  ;;  %v1420_v6 = vpop.f32.mrb[39].mxu0  ;;  %v3508_v49 = vadd.f32 %v1470_v26, %v3235_v33 }
 0x635   : > { %v1469_v16 = vmul.f32 0.25, %v1420_v6 }
 0x636   : > { %v3504_v63 = vadd.f32 %v1471_v7, %v3225_v15  ;;  %1502 = vmax.xlane.f32.xlu0 %v3501_v9  ;;  %v3516_v15 = vadd.f32 %v1468_v13, %v3257_v40 }
 0x637   : > { %v3512_v0 = vadd.f32 %v1469_v16, %v3246_v34 }
 0x638   : > { %1510 = vmax.xlane.f32.xlu1 %v3504_v63 }
 0x639   : > { %v2488_v45 = vpop.f32.mrb[40].mxu0 }
 0x63a   : > { %1508 = vmax.xlane.f32.xlu0 %v3508_v49  ;;  %v1433_v54 = vpop.f32.mrb[41].mxu0  ;;  %v1474_v35 = vmul.f32 0.25, %v2488_v45 }
 0x63b   : > { %v2489_v10 = vpop.f32.mrb[42].mxu0  ;;  %v1472_v11 = vmul.f32 0.25, %v1433_v54 }
 0x63c   : > { %v1475_v51 = vmul.f32 0.25, %v2489_v10  ;;  %1506 = vmax.xlane.f32.xlu1 %v3512_v0  ;;  %v1436_v33 = vpop.f32.mrb[43].mxu0  ;;  %v3524_v34 = vadd.f32 %v1474_v35, %v3278_v57 }
 0x63d   : > { %v1473_v43 = vmul.f32 0.25, %v1436_v33 }
 0x63e   : > { %v3520_v20 = vadd.f32 %v1475_v51, %v3267_v48  ;;  %1504 = vmax.xlane.f32.xlu0 %v3516_v15  ;;  %v3532_v48 = vadd.f32 %v1472_v11, %v3296_v47 }
 0x63f   : > { %v3528_v40 = vadd.f32 %v1473_v43, %v3287_v30 }
 0x640   : > { %1518 = vmax.xlane.f32.xlu1 %v3520_v20 }
 0x641   : > { %v2492_v21 = vpop.f32.mrb[44].mxu0 }
 0x642   : > { %1516 = vmax.xlane.f32.xlu0 %v3524_v34  ;;  %v1449_v23 = vpop.f32.mrb[45].mxu0  ;;  %v1478_v52 = vmul.f32 0.25, %v2492_v21 }
 0x643   : > { %v2493_v37 = vpop.f32.mrb[46].mxu0  ;;  %v1476_v61 = vmul.f32 0.25, %v1449_v23 }
 0x644   : > { %1514 = vmax.xlane.f32.xlu1 %v3528_v40  ;;  %v1452_v8 = vpop.f32.mrb[47].mxu0  ;;  %v3537_v57 = vadd.f32 %v1478_v52, %v3310_v14  ;;  %v1479_v47 = vmul.f32 0.25, %v2493_v37 }
 0x645   : > { %v3541_v30 = vadd.f32 %v1476_v61, %v3319_v60  ;;  %v1477_v14 = vmul.f32 0.25, %v1452_v8 }
 0x646   : > { %1512 = vmax.xlane.f32.xlu0 %v3532_v48  ;;  %v3549_v32 = vadd.f32 %v1479_v47, %v3165_v46 }
 0x647   : > { %v3553_v36 = vadd.f32 %v1477_v14, %v3170_v25 }
 0x64a   : > { %1524 = vmax.xlane.f32.xlu0 %v3537_v57 }
 0x64e   : > { %1520 = vmax.xlane.f32.xlu0 %v3541_v30 }
 0x655   : > { %1656 = vrot.lane.b32.xlu1 %v3093_v24, %s2770_s21 }
 0x664   : > { %1654 = vrot.lane.b32.xlu0 %v3083_v1, %s2770_s21 }
 0x679   : > { %1526 = vmax.xlane.f32.xlu1 %v3549_v32 }
 0x67d   : > { %1522 = vmax.xlane.f32.xlu1 %v3553_v36 }
 0x68e   : > { %1658 = vrot.lane.b32.xlu1 %v3091_v53, %s2770_s21 }
 0x6bb   : > { %v1501_v60 = vpop.xlane.xlu0 %1500 }
 0x6bc   : > { %v1530_v24 = vsub.f32 %v3489_v59, %v1501_v60 }
 0x6be   : > { %v1548_v58 = vmul.f32 1.442695, %v1530_v24  ;;  %v1499_v42 = vpop.xlane.xlu1 %1498 }
 0x6bf   : > { %v1497_v1 = vpop.xlane.xlu0 %1496  ;;  %v1529_v28 = vsub.f32 %v3493_v12, %v1499_v42 }
 0x6c0   : > { %2693 = vpow2.f32 %v1548_v58  ;;  %v1528_v46 = vsub.f32 %v3496_v55, %v1497_v1 }
 0x6c1   : > { %v1546_v41 = vmul.f32 1.442695, %v1529_v28 }
 0x6c2   : > { %v1544_v44 = vmul.f32 1.442695, %v1528_v46 }
 0x6c3   : > { %v1503_v31 = vpop.xlane.xlu0 %1502 }
 0x6c4   : > { %2695 = vpow2.f32 %v1544_v44  ;;  %v1531_v25 = vsub.f32 %v3501_v9, %v1503_v31 }
 0x6c5   : > { %v1511_v19 = vpop.xlane.xlu1 %1510 }
 0x6c6   : > { %v1550_v22 = vmul.f32 1.442695, %v1531_v25  ;;  %v1535_v18 = vsub.f32 %v3504_v63, %v1511_v19 }
 0x6c7   : > { %v1509_v53 = vpop.xlane.xlu0 %1508 }
 0x6c8   : > { %2697 = vpow2.f32 %v1550_v22  ;;  %v1534_v59 = vsub.f32 %v3508_v49, %v1509_v53  ;;  %v1558_v6 = vmul.f32 1.442695, %v1535_v18 }
 0x6c9   : > { %v1507_v50 = vpop.xlane.xlu1 %1506  ;;  %2699 = vpow2.f32 %v1546_v41 }
 0x6ca   : > { %v3563_v29 = vpop.eup %2693  ;;  %v1556_v27 = vmul.f32 1.442695, %v1534_v59  ;;  %v1533_v55 = vsub.f32 %v3512_v0, %v1507_v50 }
 0x6cb   : > { %1580 = vadd.xlane.f32.xlu1 %v3563_v29  ;;  %v1505_v12 = vpop.xlane.xlu0 %1504 }
 0x6cc   : > { %2701 = vpow2.f32 %v1556_v27  ;;  %v1554_v17 = vmul.f32 1.442695, %v1533_v55  ;;  %v1532_v56 = vsub.f32 %v3516_v15, %v1505_v12 }
 0x6cd   : > { %v1519_v26 = vpop.xlane.xlu1 %1518 }
 0x6ce   : > { %v3569_v62 = vpop.eup %2695  ;;  %v1552_v9 = vmul.f32 1.442695, %v1532_v56  ;;  %2703 = vpow2.f32 %v1554_v17  ;;  %v1539_v63 = vsub.f32 %v3520_v20, %v1519_v26 }
 0x6cf   : > { %1576 = vadd.xlane.f32.xlu1 %v3569_v62  ;;  %v1517_v7 = vpop.xlane.xlu0 %1516 }
 0x6d0   : > { %2705 = vpow2.f32 %v1552_v9  ;;  %v1538_v16 = vsub.f32 %v3524_v34, %v1517_v7  ;;  %v1566_v51 = vmul.f32 1.442695, %v1539_v63 }
 0x6d1   : > { %2707 = vpow2.f32 %v1558_v6  ;;  %v1515_v0 = vpop.xlane.xlu1 %1514 }
 0x6d2   : > { %v3573_v49 = vpop.eup %2697  ;;  %v1564_v13 = vmul.f32 1.442695, %v1538_v16  ;;  %v1537_v33 = vsub.f32 %v3528_v40, %v1515_v0 }
 0x6d3   : > { %1582 = vadd.xlane.f32.xlu1 %v3573_v49  ;;  %v1513_v45 = vpop.xlane.xlu0 %1512  ;;  %v3578_v10 = vpop.eup %2699 }
 0x6d4   : > { %v1536_v54 = vsub.f32 %v3532_v48, %v1513_v45  ;;  %2709 = vpow2.f32 %v1564_v13  ;;  %v1562_v23 = vmul.f32 1.442695, %v1537_v33 }
 0x6d5   : > { %v1657_v61 = vpop.permute.xlu1 %1656 }
 0x6d6   : > { %v3580_v15 = vpop.eup %2701  ;;  %v1560_v35 = vmul.f32 1.442695, %v1536_v54 }
 0x6d7   : > { %1578 = vadd.xlane.f32.xlu1 %v3578_v10  ;;  %1588 = vadd.xlane.f32.xlu0 %v3580_v15  ;;  %v1525_v20 = vpop.xlane.xlu0 %1524 }
 0x6d8   : > { %2711 = vpow2.f32 %v1560_v35  ;;  %v1542_v43 = vsub.f32 %v3537_v57, %v1525_v20  ;;  %v3586_v34 = vpop.eup %2703 }
 0x6d9   : > { %2713 = vpow2.f32 %v1566_v51 }
 0x6da   : > { %v3588_v11 = vpop.eup %2705  ;;  %v1572_v21 = vmul.f32 1.442695, %v1542_v43 }
 0x6db   : > { %1586 = vadd.xlane.f32.xlu1 %v3586_v34  ;;  %1584 = vadd.xlane.f32.xlu0 %v3588_v11  ;;  %v1521_v40 = vpop.xlane.xlu0 %1520  ;;  %v3593_v48 = vpop.eup %2707 }
 0x6dc   : > { %2715 = vpow2.f32 %v1572_v21  ;;  %v1540_v37 = vsub.f32 %v3541_v30, %v1521_v40 }
 0x6dd   : > { %2717 = vpow2.f32 %v1562_v23 }
 0x6de   : > { %v1568_v52 = vmul.f32 1.442695, %v1540_v37  ;;  %v3596_v57 = vpop.eup %2709 }
 0x6df   : > { %1590 = vadd.xlane.f32.xlu0 %v3593_v48  ;;  %v1655_v8 = vpop.permute.xlu0 %1654 }
 0x6e0   : > { %2719 = vpow2.f32 %v1568_v52  ;;  %2500 = vmatprep.subr.bf16.mxu0 %v1655_v8  ;;  %2549 = vmatprep.subr.bf16.mxu1 %v1655_v8 }
 0x6e1   : > { %2501 = vmatpush3.bf16.msra.mxu0 %v1655_v8  ;;  %2557 = vmatpush3.bf16.msra.mxu1 %v1655_v8 }
 0x6e2   : > { %v3598_v47 = vpop.eup %2711  ;;  %2502 = vmatprep.subr.bf16.mxu0 %v1657_v61  ;;  %2550 = vmatprep.subr.bf16.mxu1 %v1657_v61 }
 0x6e3   : > { %1596 = vadd.xlane.f32.xlu0 %v3596_v57  ;;  %1592 = vadd.xlane.f32.xlu1 %v3598_v47  ;;  %v3602_v30 = vpop.eup %2713 }
 0x6e5   : > { %2503 = vmatpush3.bf16.msra.mxu0 %v1657_v61  ;;  %2558 = vmatpush3.bf16.msra.mxu1 %v1657_v61 }
 0x6e6   : > { %v3604_v14 = vpop.eup %2715 }
 0x6e7   : > { %1598 = vadd.xlane.f32.xlu0 %v3602_v30  ;;  %1604 = vadd.xlane.f32.xlu1 %v3604_v14  ;;  %v3608_v60 = vpop.eup %2717 }
 0x6ea   : > { %v3610_v24 = vpop.eup %2719 }
 0x6eb   : > { %1594 = vadd.xlane.f32.xlu0 %v3608_v60  ;;  %1600 = vadd.xlane.f32.xlu1 %v3610_v24 }
 0x6fc   : > { %1662 = vrot.lane.b32.xlu1 %v3099_v38, %s2770_s21 }
 0x701   : > { %1660 = vrot.lane.b32.xlu0 %v3101_v39, %s2770_s21 }
 0x706   : > { %v1527_v58 = vpop.xlane.xlu1 %1526 }
 0x707   : > { %v1543_v44 = vsub.f32 %v3549_v32, %v1527_v58 }
 0x709   : > { %v1574_v31 = vmul.f32 1.442695, %v1543_v44 }
 0x70a   : > { %v1523_v1 = vpop.xlane.xlu1 %1522 }
 0x70b   : > { %v1541_v42 = vsub.f32 %v3553_v36, %v1523_v1 }
 0x70d   : > { %v1570_v28 = vmul.f32 1.442695, %v1541_v42 }
 0x70e   : > { %v1659_v46 = vpop.permute.xlu1 %1658 }
 0x70f   : > { %2504 = vmatprep.subr.bf16.mxu0 %v1659_v46  ;;  %2551 = vmatprep.subr.bf16.mxu1 %v1659_v46  ;;  %2721 = vpow2.f32 %v1570_v28 }
 0x710   : > { %2505 = vmatpush3.bf16.msra.mxu0 %v1659_v46  ;;  %2559 = vmatpush3.bf16.msra.mxu1 %v1659_v46  ;;  %2723 = vpow2.f32 %v1574_v31 }
 0x719   : > { %v3620_v25 = vpop.eup %2721 }
 0x71a   : > { %v3623_v38 = vpop.eup %2723 }
 0x720   : > { %1602 = vadd.xlane.f32.xlu0 %v3620_v25 }
 0x724   : > { %1606 = vadd.xlane.f32.xlu0 %v3623_v38 }
 0x758   : > { %v1581_v39 = vpop.xlane.xlu1 %1580 }
 0x75c   : > { %v1577_v36 = vpop.xlane.xlu1 %1576 }
 0x75d   : > { %2725 = vrcp.f32 %v1577_v36 }
 0x760   : > { %v1583_v19 = vpop.xlane.xlu1 %1582 }
 0x764   : > { %v1579_v22 = vpop.xlane.xlu1 %1578  ;;  %v1589_v41 = vpop.xlane.xlu0 %1588 }
 0x765   : > { %2727 = vrcp.f32 %v1579_v22 }
 0x767   : > { %v2726_v50 = vpop.eup %2725 }
 0x768   : > { %v1587_v32 = vpop.xlane.xlu1 %1586  ;;  %v1585_v53 = vpop.xlane.xlu0 %1584  ;;  %v1624_v18 = vmul.f32 %v2726_v50, %v3569_v62 }
 0x769   : > { %2729 = vrcp.f32 %v1587_v32 }
 0x76a   : > { %2731 = vrcp.f32 %v1585_v53 }
 0x76b   : > { %2733 = vrcp.f32 %v1583_v19  ;;  %v2595_v19 = vld [vmem:[%s3772_s5] sm:$0xff]  }
 0x76c   : > { %v1591_v59 = vpop.xlane.xlu0 %1590 }
 0x76d   : > { %2735 = vrcp.f32 %v1591_v59 }
 0x76e   : > { %2737 = vrcp.f32 %v1581_v39 }
 0x76f   : > { %v2728_v27 = vpop.eup %2727  ;;  %2739 = vrcp.f32 %v1589_v41 }
 0x770   : > { %v1593_v55 = vpop.xlane.xlu1 %1592  ;;  %v1597_v12 = vpop.xlane.xlu0 %1596  ;;  %v1625_v17 = vmul.f32 %v2728_v27, %v3578_v10 }
 0x771   : > { %2741 = vrcp.f32 %v1593_v55 }
 0x772   : > { %v1640_v56 = vpack.c.bf16 %v1625_v17, %v1624_v18 }
 0x773   : > { %v2730_v9 = vpop.eup %2729 }
 0x774   : > { %v2732_v26 = vpop.eup %2731  ;;  %2510 = vmatprep.mubr.bf16.mxu0 %v1640_v56  ;;  %v1605_v7 = vpop.xlane.xlu1 %1604  ;;  %v1629_v16 = vmul.f32 %v2730_v9, %v3586_v34 }
 0x775   : > { %v1599_v6 = vpop.xlane.xlu0 %1598  ;;  %v1628_v63 = vmul.f32 %v2732_v26, %v3588_v11  ;;  %v2734_v0 = vpop.eup %2733 }
 0x776   : > { %2743 = vrcp.f32 %v1599_v6  ;;  %v1627_v20 = vmul.f32 %v2734_v0, %v3573_v49 }
 0x777   : > { %v1642_v13 = vpack.c.bf16 %v1629_v16, %v1628_v63  ;;  %v2736_v54 = vpop.eup %2735 }
 0x778   : > { %v1601_v45 = vpop.xlane.xlu1 %1600  ;;  %v2738_v35 = vpop.eup %2737  ;;  %v1631_v43 = vmul.f32 %v2736_v54, %v3593_v48 }
 0x779   : > { %v1595_v62 = vpop.xlane.xlu0 %1594  ;;  %2514 = vmatprep.mubr.bf16.mxu1 %v1642_v13  ;;  %v2740_v51 = vpop.eup %2739  ;;  %v1626_v34 = vmul.f32 %v2738_v35, %v3563_v29 }
 0x77a   : > { %2745 = vrcp.f32 %v1595_v62  ;;  %v1630_v11 = vmul.f32 %v2740_v51, %v3580_v15 }
 0x77b   : > { %2747 = vrcp.f32 %v1597_v12  ;;  %v2742_v21 = vpop.eup %2741  ;;  %v1641_v40 = vpack.c.bf16 %v1627_v20, %v1626_v34 }
 0x77c   : > { %v1663_v33 = vpop.permute.xlu1 %1662  ;;  %v1643_v37 = vpack.c.bf16 %v1631_v43, %v1630_v11  ;;  %v1632_v8 = vmul.f32 %v2742_v21, %v3598_v47  ;;  %2749 = vrcp.f32 %v1601_v45 }
 0x77d   : > { %v1661_v10 = vpop.permute.xlu0 %1660 }
 0x77e   : > { %2506 = vmatprep.subr.bf16.mxu0 %v1661_v10  ;;  %2552 = vmatprep.subr.bf16.mxu1 %v1661_v10 }
 0x77f   : > { %2507 = vmatpush3.bf16.msra.mxu0 %v1661_v10  ;;  %2560 = vmatpush3.bf16.msra.mxu1 %v1661_v10 }
 0x780   : > { %2508 = vmatprep.subr.bf16.mxu0 %v1663_v33  ;;  %2553 = vmatprep.subr.bf16.mxu1 %v1663_v33  ;;  %v2744_v23 = vpop.eup %2743 }
 0x781   : > { %v1635_v58 = vmul.f32 %v2744_v23, %v3602_v30 }
 0x783   : > { %2509 = vmatpush3.bf16.msra.mxu0 %v1663_v33  ;;  %2561 = vmatpush3.bf16.msra.mxu1 %v1663_v33 }
 0x784   : > { %v2746_v52 = vpop.eup %2745  ;;  %2526 = vmatprep.subr.bf16.mxu1 %v2595_v19 }
 0x785   : > { %v1633_v49 = vmul.f32 %v2746_v52, %v3608_v60  ;;  %v2748_v48 = vpop.eup %2747 }
 0x786   : > { %2511 = vmatmul.mubr.bf16.vlgmr.msra.gmra.mrb[48].mxu0 %v1641_v40  ;;  %2515 = vmatmul.mubr.bf16.vlgmr.msra.gmra.mrb[16].mxu1 %v1643_v37  ;;  %v1634_v29 = vmul.f32 %v2748_v48, %v3596_v57  ;;  %v2750_v46 = vpop.eup %2749 }
 0x787   : > { %v1644_v61 = vpack.c.bf16 %v1633_v49, %v1632_v8  ;;  %v1636_v47 = vmul.f32 %v2750_v46, %v3610_v24  ;;  %2527 = vmatpush3.bf16.msra.mxu1 %v2595_v19 }
 0x788   : > { %v1645_v15 = vpack.c.bf16 %v1635_v58, %v1634_v29 }
 0x789   : > { %2518 = vmatprep.mubr.bf16.mxu1 %v1644_v61 }
 0x78e   : > { %2519 = vmatmul.mubr.bf16.gmra.mrb[20].mxu1 %v1645_v15 }
 0x7ad   : > { %v1603_v1 = vpop.xlane.xlu0 %1602 }
 0x7ae   : > { %2751 = vrcp.f32 %v1603_v1 }
 0x7af   : > { %2753 = vrcp.f32 %v1605_v7 }
 0x7b1   : > { %v1607_v42 = vpop.xlane.xlu0 %1606 }
 0x7b2   : > { %2755 = vrcp.f32 %v1607_v42 }
 0x7b8   : > { %v2752_v44 = vpop.eup %2751 }
 0x7b9   : > { %v1637_v60 = vmul.f32 %v2752_v44, %v3620_v25  ;;  %v2754_v28 = vpop.eup %2753 }
 0x7ba   : > { %v1638_v57 = vmul.f32 %v2754_v28, %v3604_v14  ;;  %v2596_v14 = vld [vmem:[%s3772_s5 + $0x8] sm:$0xff]  }
 0x7bb   : > { %v1646_v31 = vpack.c.bf16 %v1637_v60, %v1636_v47  ;;  %2528 = vmatprep.subr.bf16.mxu1 %v2596_v14 }
 0x7bc   : > { %v2756_v30 = vpop.eup %2755  ;;  %2529 = vmatpush3.bf16.msra.mxu1 %v2596_v14 }
 0x7bd   : > { %2522 = vmatprep.mubr.bf16.mxu1 %v1646_v31  ;;  %v1639_v39 = vmul.f32 %v2756_v30, %v3623_v38 }
 0x7bf   : > { %v1647_v36 = vpack.c.bf16 %v1639_v39, %v1638_v57  ;;  %v3691_v39 = vld [vmem:[%s3773_s6] ss:$0 sm:$0xff] }
 0x7c1   : > { %2523 = vmatmul.mubr.bf16.gmra.mrb[24].mxu1 %v1647_v36 }
 0x859   : > { %v2512_v22 = vpop.f32.mrb[48].mxu0  ;;  %v2516_v41 = vpop.f32.mrb[16].mxu1 }
 0x85a   : > { %v1722_v24 = vpop.f32.mrb[17].mxu1  ;;  %1789 = vrot.lane.b32.xlu1 %v2512_v22, %s2771_s27  ;;  %v1706_v25 = vpop.f32.mrb[49].mxu0 }
 0x85b   : > { %v2517_v38 = vpop.f32.mrb[18].mxu1  ;;  %1785 = vrot.lane.b32.xlu0 %v1706_v25, %s2771_s27  ;;  %v2513_v32 = vpop.f32.mrb[50].mxu0 }
 0x85c   : > { %v1709_v53 = vpop.f32.mrb[51].mxu0  ;;  %v1725_v59 = vpop.f32.mrb[19].mxu1 }
 0x85e   : > { %1787 = vrot.lane.b32.xlu1 %v1709_v53, %s2771_s27 }
 0x85f   : > { %1793 = vrot.lane.b32.xlu0 %v1722_v24, %s2771_s27 }
 0x861   : > { %v2520_v50 = vpop.f32.mrb[20].mxu1 }
 0x862   : > { %v1738_v27 = vpop.f32.mrb[21].mxu1  ;;  %1791 = vrot.lane.b32.xlu1 %v2513_v32, %s2771_s27 }
 0x863   : > { %v2521_v55 = vpop.f32.mrb[22].mxu1  ;;  %1797 = vrot.lane.b32.xlu0 %v2516_v41, %s2771_s27 }
 0x864   : > { %v1741_v12 = vpop.f32.mrb[23].mxu1 }
 0x866   : > { %1795 = vrot.lane.b32.xlu1 %v1725_v59, %s2771_s27 }
 0x867   : > { %1801 = vrot.lane.b32.xlu0 %v1738_v27, %s2771_s27 }
 0x86a   : > { %1799 = vrot.lane.b32.xlu1 %v2517_v38, %s2771_s27 }
 0x86b   : > { %1805 = vrot.lane.b32.xlu0 %v2520_v50, %s2771_s27 }
 0x86e   : > { %1803 = vrot.lane.b32.xlu1 %v1741_v12, %s2771_s27 }
 0x872   : > { %1807 = vrot.lane.b32.xlu1 %v2521_v55, %s2771_s27 }
 0x894   : > { %v2524_v18 = vpop.f32.mrb[24].mxu1 }
 0x895   : > { %v1754_v17 = vpop.f32.mrb[25].mxu1 }
 0x896   : > { %1809 = vrot.lane.b32.xlu0 %v1754_v17, %s2771_s27  ;;  %v2525_v56 = vpop.f32.mrb[26].mxu1 }
 0x897   : > { %v1757_v9 = vpop.f32.mrb[27].mxu1 }
 0x898   : > { %1811 = vrot.lane.b32.xlu1 %v1757_v9, %s2771_s27 }
 0x89a   : > { %1813 = vrot.lane.b32.xlu0 %v2524_v18, %s2771_s27 }
 0x89c   : > { %1815 = vrot.lane.b32.xlu1 %v2525_v56, %s2771_s27  ;;  %v3799_v56 = vld [vmem:[#allocation5_spill] sm:$0xff] }
 0x8cc   : > { %v1790_v26 = vpop.permute.xlu1 %1789 }
 0x8cd   : > { %1836 = vst.msk [vmem:[#allocation2 + $0x10] sm:$0xff] %vm1833_vm1, %v1790_v26  ;;  %v1786_v7 = vpop.permute.xlu0 %1785 }
 0x8ce   : > { %1834 = vst.msk [vmem:[#allocation2] sm:$0xff] %vm1833_vm1, %v1786_v7 }
 0x8d0   : > { %v1788_v6 = vpop.permute.xlu1 %1787 }
 0x8d1   : > { %1835 = vst.msk [vmem:[#allocation2 + $0x8] sm:$0xff] %vm1833_vm1, %v1788_v6  ;;  %v1794_v16 = vpop.permute.xlu0 %1793  ;;  %v3800_v6 = vld [vmem:[#allocation3_spill] sm:$0xff] }
 0x8d2   : > { %1838 = vst.msk [vmem:[#allocation2 + $0x20] sm:$0xff] %vm1833_vm1, %v1794_v16 }
 0x8d4   : > { %v1792_v63 = vpop.permute.xlu1 %1791  ;;  %v1852_v51 = vld [vmem:[#allocation2 + $0x10] sm:$0xff] }
 0x8d5   : > { %1837 = vst.msk [vmem:[#allocation2 + $0x18] sm:$0xff] %vm1833_vm1, %v1792_v63  ;;  %v1798_v13 = vpop.permute.xlu0 %1797  ;;  %v1850_v62 = vld [vmem:[#allocation2] sm:$0xff] }
 0x8d6   : > { %1840 = vst.msk [vmem:[#allocation2 + $0x30] sm:$0xff] %vm1833_vm1, %v1798_v13 }
 0x8d8   : > { %v1796_v45 = vpop.permute.xlu1 %1795  ;;  %v1851_v0 = vld [vmem:[#allocation2 + $0x8] sm:$0xff] }
 0x8d9   : > { %1839 = vst.msk [vmem:[#allocation2 + $0x28] sm:$0xff] %vm1833_vm1, %v1796_v45  ;;  %v1802_v54 = vpop.permute.xlu0 %1801  ;;  %v1866_v10 = vpack.c.bf16 %v1851_v0, %v1850_v62  ;;  %v1854_v11 = vld [vmem:[#allocation2 + $0x20] sm:$0xff]  ;;  %v3801_v45 = vld [vmem:[#allocation6_spill] sm:$0xff] }
 0x8da   : > { %1842 = vst.msk [vmem:[#allocation2 + $0x40] sm:$0xff] %vm1833_vm1, %v1802_v54  ;;  %v3802_v54 = vld [vmem:[#allocation4_spill] sm:$0xff] }
 0x8db   : > { %2530 = vmatprep.mubr.msk.bf16.mxu1 %vm312_vm0, %v1866_v10 }
 0x8dc   : > { %v1800_v35 = vpop.permute.xlu1 %1799  ;;  %v1853_v33 = vld [vmem:[#allocation2 + $0x18] sm:$0xff] }
 0x8dd   : > { %1841 = vst.msk [vmem:[#allocation2 + $0x38] sm:$0xff] %vm1833_vm1, %v1800_v35  ;;  %v1806_v20 = vpop.permute.xlu0 %1805  ;;  %v1867_v43 = vpack.c.bf16 %v1853_v33, %v1852_v51  ;;  %v1856_v37 = vld [vmem:[#allocation2 + $0x30] sm:$0xff] }
 0x8de   : > { %1844 = vst.msk [vmem:[#allocation2 + $0x50] sm:$0xff] %vm1833_vm1, %v1806_v20 }
 0x8df   : > { %2531 = vmatmul.mubr.msk.bf16.vlgmr.msra.gmra.mrb[28].mxu1 %vm312_vm0, %v1867_v43 }
 0x8e0   : > { %v1804_v34 = vpop.permute.xlu1 %1803  ;;  %v1855_v21 = vld [vmem:[#allocation2 + $0x28] sm:$0xff] }
 0x8e1   : > { %1843 = vst.msk [vmem:[#allocation2 + $0x48] sm:$0xff] %vm1833_vm1, %v1804_v34  ;;  %v1868_v23 = vpack.c.bf16 %v1855_v21, %v1854_v11  ;;  %v1858_v49 = vld [vmem:[#allocation2 + $0x40] sm:$0xff]  ;;  %v3803_v21 = vld [vmem:[#allocation9_spill] sm:$0xff] }
 0x8e3   : > { %2534 = vmatprep.mubr.msk.bf16.mxu1 %vm312_vm0, %v1868_v23 }
 0x8e4   : > { %v1808_v40 = vpop.permute.xlu1 %1807  ;;  %v1857_v52 = vld [vmem:[#allocation2 + $0x38] sm:$0xff] }
 0x8e5   : > { %1845 = vst.msk [vmem:[#allocation2 + $0x58] sm:$0xff] %vm1833_vm1, %v1808_v40  ;;  %v1869_v8 = vpack.c.bf16 %v1857_v52, %v1856_v37  ;;  %v1860_v58 = vld [vmem:[#allocation2 + $0x50] sm:$0xff]  ;;  %v3804_v52 = vld [vmem:[#allocation7_spill] sm:$0xff] }
 0x8e7   : > { %2535 = vmatmul.mubr.msk.bf16.gmra.mrb[32].mxu1 %vm312_vm0, %v1869_v8 }
 0x8e8   : > { %v1859_v48 = vld [vmem:[#allocation2 + $0x48] sm:$0xff] }
 0x8e9   : > { %v1870_v61 = vpack.c.bf16 %v1859_v48, %v1858_v49 }
 0x8eb   : > { %2538 = vmatprep.mubr.msk.bf16.mxu1 %vm312_vm0, %v1870_v61  ;;  %v3805_v61 = vld [vmem:[#allocation10_spill] sm:$0xff] }
 0x8ec   : > { %v1861_v29 = vld [vmem:[#allocation2 + $0x58] sm:$0xff] }
 0x8ed   : > { %v1871_v15 = vpack.c.bf16 %v1861_v29, %v1860_v58 }
 0x8ef   : > { %2539 = vmatmul.mubr.msk.bf16.gmra.mrb[36].mxu1 %vm312_vm0, %v1871_v15  ;;  %v3806_v15 = vld [vmem:[#allocation8_spill] sm:$0xff] }
 0x908   : > { %v1810_v1 = vpop.permute.xlu0 %1809 }
 0x909   : > { %1846 = vst.msk [vmem:[#allocation2 + $0x60] sm:$0xff] %vm1833_vm1, %v1810_v1 }
 0x90a   : > { %v1812_v42 = vpop.permute.xlu1 %1811 }
 0x90b   : > { %1847 = vst.msk [vmem:[#allocation2 + $0x68] sm:$0xff] %vm1833_vm1, %v1812_v42 }
 0x90c   : > { %v1814_v46 = vpop.permute.xlu0 %1813 }
 0x90d   : > { %1848 = vst.msk [vmem:[#allocation2 + $0x70] sm:$0xff] %vm1833_vm1, %v1814_v46 }
 0x90e   : > { %v1816_v44 = vpop.permute.xlu1 %1815 }
 0x90f   : > { %1849 = vst.msk [vmem:[#allocation2 + $0x78] sm:$0xff] %vm1833_vm1, %v1816_v44 }
 0x910   : > { %v1862_v47 = vld [vmem:[#allocation2 + $0x60] sm:$0xff] }
 0x912   : > { %v1863_v60 = vld [vmem:[#allocation2 + $0x68] sm:$0xff] }
 0x913   : > { %v1872_v28 = vpack.c.bf16 %v1863_v60, %v1862_v47 }
 0x914   : > { %v1864_v31 = vld [vmem:[#allocation2 + $0x70] sm:$0xff] }
 0x915   : > { %2542 = vmatprep.mubr.msk.bf16.mxu1 %vm312_vm0, %v1872_v28 }
 0x916   : > { %v1865_v30 = vld [vmem:[#allocation2 + $0x78] sm:$0xff] }
 0x917   : > { %v1873_v57 = vpack.c.bf16 %v1865_v30, %v1864_v31  ;;  %v3807_v30 = vld [vmem:[#allocation13_spill] sm:$0xff] }
 0x919   : > { %2543 = vmatmul.mubr.msk.bf16.gmra.mrb[40].mxu1 %vm312_vm0, %v1873_v57  ;;  %vm2098_vm0 = vcmask 257024  }
 0x9b2   : > { %v2532_v36 = vpop.f32.mrb[28].mxu1 }
 0x9b3   : > { %v1964_v19 = vadd.f32 %v2532_v36, %v3691_v39  ;;  %v1955_v22 = vpop.f32.mrb[29].mxu1 }
 0x9b4   : > { %v1956_v41 = vadd.f32 %v3691_v39, %v1955_v22  ;;  %v2533_v24 = vpop.f32.mrb[30].mxu1  ;;  %v3808_v22 = vld [vmem:[#allocation11_spill] sm:$0xff] }
 0x9b5   : > { %v2020_v25 = vadd.f32 %v2834_v3, %v1964_v19  ;;  %v1967_v14 = vadd.f32 %v2533_v24, %v3691_v39  ;;  %v1958_v38 = vpop.f32.mrb[31].mxu1 }
 0x9b6   : > { %v2018_v32 = vadd.f32 %v2832_v2, %v1956_v41  ;;  %v1959_v53 = vadd.f32 %v3691_v39, %v1958_v38 }
 0x9b7   : > { %v2241_v59 = vpack.c.bf16 %v2020_v25, %v2020_v25  ;;  %v2021_v3 = vadd.f32 %v2838_v5, %v1967_v14  ;;  %v3809_v14 = vld [vmem:[#allocation14_spill] sm:$0xff] }
 0x9b8   : > { %v2239_v50 = vpack.c.bf16 %v2018_v32, %v2018_v32  ;;  %v2019_v27 = vadd.f32 %v2836_v4, %v1959_v53  ;;  %v3810_v53 = vld [vmem:[#allocation12_spill] sm:$0xff] }
 0x9b9   : > { %2101 = vst.msk [vmem:[%s3702_s11 + $0x8] sm:$0xf] %vm2098_vm0, %v2241_v59  ;;  %v2242_v55 = vpack.c.bf16 %v2021_v3, %v2021_v3 }
 0x9ba   : > { %2099 = vst.msk [vmem:[%s3702_s11] sm:$0xf] %vm2098_vm0, %v2239_v50  ;;  %v2240_v12 = vpack.c.bf16 %v2019_v27, %v2019_v27  ;;  %v2536_v18 = vpop.f32.mrb[32].mxu1 }
 0x9bb   : > { %2102 = vst.msk [vmem:[%s3702_s11 + $0xc] sm:$0xf] %vm2098_vm0, %v2242_v55  ;;  %v1980_v2 = vadd.f32 %v2536_v18, %v3691_v39  ;;  %v1971_v17 = vpop.f32.mrb[33].mxu1 }
 0x9bc   : > { %2100 = vst.msk [vmem:[%s3702_s11 + $0x4] sm:$0xf] %vm2098_vm0, %v2240_v12  ;;  %v1972_v5 = vadd.f32 %v3691_v39, %v1971_v17  ;;  %v2537_v4 = vpop.f32.mrb[34].mxu1 }
 0x9bd   : > { %v2024_v9 = vadd.f32 %v3799_v56, %v1980_v2  ;;  %v1983_v26 = vadd.f32 %v2537_v4, %v3691_v39  ;;  %v1974_v7 = vpop.f32.mrb[35].mxu1 }
 0x9be   : > { %v2022_v16 = vadd.f32 %v3800_v6, %v1972_v5  ;;  %v1975_v63 = vadd.f32 %v3691_v39, %v1974_v7 }
 0x9bf   : > { %v2245_v13 = vpack.c.bf16 %v2024_v9, %v2024_v9  ;;  %v2025_v62 = vadd.f32 %v3801_v45, %v1983_v26 }
 0x9c0   : > { %v2243_v0 = vpack.c.bf16 %v2022_v16, %v2022_v16  ;;  %v2023_v10 = vadd.f32 %v3802_v54, %v1975_v63 }
 0x9c1   : > { %2105 = vst.msk [vmem:[%s3702_s11 + $0x18] sm:$0xf] %vm2098_vm0, %v2245_v13  ;;  %v2246_v35 = vpack.c.bf16 %v2025_v62, %v2025_v62 }
 0x9c2   : > { %2103 = vst.msk [vmem:[%s3702_s11 + $0x10] sm:$0xf] %vm2098_vm0, %v2243_v0  ;;  %v2244_v51 = vpack.c.bf16 %v2023_v10, %v2023_v10  ;;  %v2540_v33 = vpop.f32.mrb[36].mxu1 }
 0x9c3   : > { %2106 = vst.msk [vmem:[%s3702_s11 + $0x1c] sm:$0xf] %vm2098_vm0, %v2246_v35  ;;  %v1996_v20 = vadd.f32 %v2540_v33, %v3691_v39  ;;  %v1987_v43 = vpop.f32.mrb[37].mxu1 }
 0x9c4   : > { %2104 = vst.msk [vmem:[%s3702_s11 + $0x14] sm:$0xf] %vm2098_vm0, %v2244_v51  ;;  %v1988_v34 = vadd.f32 %v3691_v39, %v1987_v43  ;;  %v2541_v11 = vpop.f32.mrb[38].mxu1 }
 0x9c5   : > { %v2028_v23 = vadd.f32 %v3803_v21, %v1996_v20  ;;  %v1999_v40 = vadd.f32 %v2541_v11, %v3691_v39  ;;  %v1990_v37 = vpop.f32.mrb[39].mxu1 }
 0x9c6   : > { %v2026_v8 = vadd.f32 %v3804_v52, %v1988_v34  ;;  %v1991_v49 = vadd.f32 %v3691_v39, %v1990_v37 }
 0x9c7   : > { %v2249_v48 = vpack.c.bf16 %v2028_v23, %v2028_v23  ;;  %v2029_v58 = vadd.f32 %v3805_v61, %v1999_v40 }
 0x9c8   : > { %v2247_v29 = vpack.c.bf16 %v2026_v8, %v2026_v8  ;;  %v2027_v1 = vadd.f32 %v3806_v15, %v1991_v49 }
 0x9c9   : > { %2109 = vst.msk [vmem:[%s3702_s11 + $0x28] sm:$0xf] %vm2098_vm0, %v2249_v48  ;;  %v2250_v42 = vpack.c.bf16 %v2029_v58, %v2029_v58 }
 0x9ca   : > { %2107 = vst.msk [vmem:[%s3702_s11 + $0x20] sm:$0xf] %vm2098_vm0, %v2247_v29  ;;  %v2248_v46 = vpack.c.bf16 %v2027_v1, %v2027_v1 }
 0x9cb   : > { %2110 = vst.msk [vmem:[%s3702_s11 + $0x2c] sm:$0xf] %vm2098_vm0, %v2250_v42 }
 0x9cc   : > { %2108 = vst.msk [vmem:[%s3702_s11 + $0x24] sm:$0xf] %vm2098_vm0, %v2248_v46 }
 0x9ec   : > { %v2544_v44 = vpop.f32.mrb[40].mxu1 }
 0x9ed   : > { %v2012_v47 = vadd.f32 %v2544_v44, %v3691_v39  ;;  %v2003_v60 = vpop.f32.mrb[41].mxu1 }
 0x9ee   : > { %v2004_v28 = vadd.f32 %v3691_v39, %v2003_v60  ;;  %v2545_v31 = vpop.f32.mrb[42].mxu1 }
 0x9ef   : > { %v2032_v57 = vadd.f32 %v3807_v30, %v2012_v47  ;;  %v2015_v36 = vadd.f32 %v2545_v31, %v3691_v39  ;;  %v2006_v19 = vpop.f32.mrb[43].mxu1 }
 0x9f0   : > { %v2030_v41 = vadd.f32 %v3808_v22, %v2004_v28  ;;  %v2007_v24 = vadd.f32 %v3691_v39, %v2006_v19 }
 0x9f1   : > { %v2253_v25 = vpack.c.bf16 %v2032_v57, %v2032_v57  ;;  %v2033_v38 = vadd.f32 %v3809_v14, %v2015_v36 }
 0x9f2   : > { %v2251_v32 = vpack.c.bf16 %v2030_v41, %v2030_v41  ;;  %v2031_v59 = vadd.f32 %v3810_v53, %v2007_v24 }
 0x9f3   : > { %2113 = vst.msk [vmem:[%s3702_s11 + $0x38] sm:$0xf] %vm2098_vm0, %v2253_v25  ;;  %v2254_v3 = vpack.c.bf16 %v2033_v38, %v2033_v38 }
 0x9f4   : > { %2111 = vst.msk [vmem:[%s3702_s11 + $0x30] sm:$0xf] %vm2098_vm0, %v2251_v32  ;;  %v2252_v50 = vpack.c.bf16 %v2031_v59, %v2031_v59 }
 0x9f5   : > { %2114 = vst.msk [vmem:[%s3702_s11 + $0x3c] sm:$0xf] %vm2098_vm0, %v2254_v3 }
 0x9f6   : > { %2112 = vst.msk [vmem:[%s3702_s11 + $0x34] sm:$0xf] %vm2098_vm0, %v2252_v50 }
 0x9f7 PF: > { %s17_s24 = sadd.s32 1, %s2763_s24  }
 0x9f8   : > { %p14_p4 = scmp.ge.s32.totalorder %s17_s24, 4  }
 0x9fa   :  { %16 = sbr.rel (!%p14_p4) target bundleno = 1 (0x1), region = 78 }

// kernel: fwd.6
= control target key start
LH: loop header
LB: loop body
LE: loop exit
PB: predicated region body
PF: predicated region fallthrough
CT: control target
= control target key end

     0   :  { %vm95_vm0 = vcmask 261120   ;;  %vm1827_vm1 = vcmask 257024   ;;  %s3591_s0 = inlined_call_operand.vmem [shape: bf16[256,32], index: 0, kind: input, shape index: {}]   ;;  %s3592_s3 = inlined_call_operand.vmem [shape: bf16[32,128], index: 3, kind: input, shape index: {}]   ;;  %s3593_s1 = inlined_call_operand.vmem [shape: f32[1,32], index: 1, kind: input, shape index: {}]   ;;  %s3594_s2 = inlined_call_operand.vmem [shape: f32[1,32], index: 2, kind: input, shape index: {}]   ;;  %s3595_s5 = inlined_call_operand.vmem [shape: bf16[128,32], index: 5, kind: input, shape index: {}]   ;;  %s3596_s4 = inlined_call_operand.vmem [shape: f32[1,128], index: 4, kind: input, shape index: {}]   ;;  %s3597_s6 = inlined_call_operand.vmem [shape: f32[1,32], index: 6, kind: input, shape index: {}]   ;;  %s3598_s7 = inlined_call_operand.vmem [shape: bf16[256,32], index: 7, kind: output, shape index: {}]  }
   0x1   :  { %v2441_v0 = vld [vmem:[%s3591_s0] sm:$0xff]   ;;  %v2446_v1 = vld [vmem:[%s3591_s0 + $0x8] sm:$0xff]   ;;  %v2455_v6 = vld [vmem:[%s3591_s0 + $0x10] sm:$0xff]  }
   0x2   :  { %v1960_v2 = vunpack.c.l.bf16 %v2441_v0  ;;  %v1964_v3 = vunpack.c.l.bf16 %v2446_v1  ;;  %v1961_v4 = vunpack.c.h.bf16 %v2441_v0  ;;  %v1965_v5 = vunpack.c.h.bf16 %v2446_v1  ;;  %v2474_v13 = vld [vmem:[%s3591_s0 + $0x18] sm:$0xff]   ;;  %v2487_v18 = vld [vmem:[%s3591_s0 + $0x20] sm:$0xff]   ;;  %v2500_v23 = vld [vmem:[%s3591_s0 + $0x28] sm:$0xff]  }
   0x3   :  { %v1968_v11 = vunpack.c.l.bf16 %v2455_v6  ;;  %v1969_v12 = vunpack.c.h.bf16 %v2455_v6  ;;  %v1972_v16 = vunpack.c.l.bf16 %v2474_v13  ;;  %v1973_v17 = vunpack.c.h.bf16 %v2474_v13  ;;  %v2513_v28 = vld [vmem:[%s3591_s0 + $0x30] sm:$0xff]   ;;  %v2526_v33 = vld [vmem:[%s3591_s0 + $0x38] sm:$0xff]   ;;  %v2539_v38 = vld [vmem:[%s3591_s0 + $0x40] sm:$0xff]  }
   0x4   :  { %v96_v7 = vsel %vm95_vm0, %v1960_v2, 0.0  ;;  %v102_v8 = vsel %vm95_vm0, %v1964_v3, 0.0  ;;  %v99_v9 = vsel %vm95_vm0, %v1961_v4, 0.0  ;;  %v105_v10 = vsel %vm95_vm0, %v1965_v5, 0.0  ;;  %v2552_v43 = vld [vmem:[%s3591_s0 + $0x48] sm:$0xff]   ;;  %v2565_v48 = vld [vmem:[%s3591_s0 + $0x50] sm:$0xff]  }
   0x5   :  { %97 = vadd.xlane.f32.xlu0 %v96_v7  ;;  %103 = vadd.xlane.f32.xlu1 %v102_v8  ;;  %v108_v14 = vsel %vm95_vm0, %v1968_v11, 0.0  ;;  %v111_v15 = vsel %vm95_vm0, %v1969_v12, 0.0  ;;  %v114_v19 = vsel %vm95_vm0, %v1972_v16, 0.0  ;;  %v117_v20 = vsel %vm95_vm0, %v1973_v17, 0.0  ;;  %v2578_v53 = vld [vmem:[%s3591_s0 + $0x58] sm:$0xff]   ;;  %v2591_v58 = vld [vmem:[%s3591_s0 + $0x60] sm:$0xff]  }
   0x6   :  { %v1976_v21 = vunpack.c.l.bf16 %v2487_v18  ;;  %v1977_v22 = vunpack.c.h.bf16 %v2487_v18  ;;  %v1980_v26 = vunpack.c.l.bf16 %v2500_v23  ;;  %v1981_v27 = vunpack.c.h.bf16 %v2500_v23  ;;  %v2604_v63 = vld [vmem:[%s3591_s0 + $0x68] sm:$0xff]  }
   0x7   :  { %v1984_v31 = vunpack.c.l.bf16 %v2513_v28  ;;  %v1985_v32 = vunpack.c.h.bf16 %v2513_v28  ;;  %v1988_v36 = vunpack.c.l.bf16 %v2526_v33  ;;  %v1989_v37 = vunpack.c.h.bf16 %v2526_v33 }
   0x8   :  { %v120_v24 = vsel %vm95_vm0, %v1976_v21, 0.0  ;;  %v123_v25 = vsel %vm95_vm0, %v1977_v22, 0.0  ;;  %v126_v29 = vsel %vm95_vm0, %v1980_v26, 0.0  ;;  %v129_v30 = vsel %vm95_vm0, %v1981_v27, 0.0 }
   0x9   :  { %100 = vadd.xlane.f32.xlu0 %v99_v9  ;;  %106 = vadd.xlane.f32.xlu1 %v105_v10  ;;  %v132_v34 = vsel %vm95_vm0, %v1984_v31, 0.0  ;;  %v135_v35 = vsel %vm95_vm0, %v1985_v32, 0.0  ;;  %v138_v39 = vsel %vm95_vm0, %v1988_v36, 0.0  ;;  %v141_v40 = vsel %vm95_vm0, %v1989_v37, 0.0 }
   0xa   :  { %v1992_v41 = vunpack.c.l.bf16 %v2539_v38  ;;  %v1993_v42 = vunpack.c.h.bf16 %v2539_v38  ;;  %v1996_v46 = vunpack.c.l.bf16 %v2552_v43  ;;  %v1997_v47 = vunpack.c.h.bf16 %v2552_v43 }
   0xb   :  { %v2000_v51 = vunpack.c.l.bf16 %v2565_v48  ;;  %v2001_v52 = vunpack.c.h.bf16 %v2565_v48  ;;  %v2004_v56 = vunpack.c.l.bf16 %v2578_v53  ;;  %v2005_v57 = vunpack.c.h.bf16 %v2578_v53 }
   0xc   :  { %v144_v44 = vsel %vm95_vm0, %v1992_v41, 0.0  ;;  %v147_v45 = vsel %vm95_vm0, %v1993_v42, 0.0  ;;  %v150_v49 = vsel %vm95_vm0, %v1996_v46, 0.0  ;;  %v153_v50 = vsel %vm95_vm0, %v1997_v47, 0.0 }
   0xd   :  { %109 = vadd.xlane.f32.xlu0 %v108_v14  ;;  %112 = vadd.xlane.f32.xlu1 %v111_v15  ;;  %v156_v54 = vsel %vm95_vm0, %v2000_v51, 0.0  ;;  %v159_v55 = vsel %vm95_vm0, %v2001_v52, 0.0  ;;  %v162_v59 = vsel %vm95_vm0, %v2004_v56, 0.0  ;;  %v165_v60 = vsel %vm95_vm0, %v2005_v57, 0.0  ;;  %v2617_v14 = vld [vmem:[%s3591_s0 + $0x70] sm:$0xff]  }
   0xe   :  { %v2008_v61 = vunpack.c.l.bf16 %v2591_v58  ;;  %v2009_v62 = vunpack.c.h.bf16 %v2591_v58  ;;  %v2012_v9 = vunpack.c.l.bf16 %v2604_v63  ;;  %v2013_v10 = vunpack.c.h.bf16 %v2604_v63 }
  0x10   :  { %v168_v7 = vsel %vm95_vm0, %v2008_v61, 0.0  ;;  %v171_v8 = vsel %vm95_vm0, %v2009_v62, 0.0  ;;  %v174_v15 = vsel %vm95_vm0, %v2012_v9, 0.0 }
  0x11   :  { %115 = vadd.xlane.f32.xlu0 %v114_v19  ;;  %118 = vadd.xlane.f32.xlu1 %v117_v20  ;;  %v177_v19 = vsel %vm95_vm0, %v2013_v10, 0.0  ;;  %v2016_v20 = vunpack.c.l.bf16 %v2617_v14 }
  0x15   :  { %121 = vadd.xlane.f32.xlu0 %v120_v24  ;;  %124 = vadd.xlane.f32.xlu1 %v123_v25  ;;  %v2017_v24 = vunpack.c.h.bf16 %v2617_v14  ;;  %v2630_v25 = vld [vmem:[%s3591_s0 + $0x78] sm:$0xff]  }
  0x19   :  { %127 = vadd.xlane.f32.xlu0 %v126_v29  ;;  %130 = vadd.xlane.f32.xlu1 %v129_v30  ;;  %v180_v29 = vsel %vm95_vm0, %v2016_v20, 0.0  ;;  %v183_v30 = vsel %vm95_vm0, %v2017_v24, 0.0 }
  0x1d   :  { %133 = vadd.xlane.f32.xlu0 %v132_v34  ;;  %136 = vadd.xlane.f32.xlu1 %v135_v35  ;;  %v2020_v34 = vunpack.c.l.bf16 %v2630_v25  ;;  %v2021_v35 = vunpack.c.h.bf16 %v2630_v25 }
  0x21   :  { %139 = vadd.xlane.f32.xlu0 %v138_v39  ;;  %142 = vadd.xlane.f32.xlu1 %v141_v40  ;;  %v186_v39 = vsel %vm95_vm0, %v2020_v34, 0.0  ;;  %v189_v40 = vsel %vm95_vm0, %v2021_v35, 0.0 }
  0x25   :  { %145 = vadd.xlane.f32.xlu0 %v144_v44  ;;  %148 = vadd.xlane.f32.xlu1 %v147_v45 }
  0x29   :  { %151 = vadd.xlane.f32.xlu0 %v150_v49  ;;  %154 = vadd.xlane.f32.xlu1 %v153_v50 }
  0x2d   :  { %157 = vadd.xlane.f32.xlu0 %v156_v54  ;;  %160 = vadd.xlane.f32.xlu1 %v159_v55 }
  0x31   :  { %163 = vadd.xlane.f32.xlu0 %v162_v59  ;;  %166 = vadd.xlane.f32.xlu1 %v165_v60 }
  0x35   :  { %169 = vadd.xlane.f32.xlu0 %v168_v7  ;;  %172 = vadd.xlane.f32.xlu1 %v171_v8 }
  0x39   :  { %175 = vadd.xlane.f32.xlu0 %v174_v15  ;;  %178 = vadd.xlane.f32.xlu1 %v177_v19 }
  0x3d   :  { %181 = vadd.xlane.f32.xlu0 %v180_v29  ;;  %184 = vadd.xlane.f32.xlu1 %v183_v30 }
  0x41   :  { %187 = vadd.xlane.f32.xlu0 %v186_v39  ;;  %190 = vadd.xlane.f32.xlu1 %v189_v40 }
  0x92   :  { %v98_v44 = vpop.xlane.xlu0 %97  ;;  %v104_v45 = vpop.xlane.xlu1 %103 }
  0x93   :  { %v193_v49 = vmul.f32 0.03125, %v98_v44  ;;  %v195_v50 = vmul.f32 0.03125, %v104_v45 }
  0x95   :  { %v2648_v54 = vsub.f32 %v1960_v2, %v193_v49  ;;  %v2652_v55 = vsub.f32 %v1964_v3, %v195_v50 }
  0x96   :  { %v101_v59 = vpop.xlane.xlu0 %100  ;;  %v107_v60 = vpop.xlane.xlu1 %106 }
  0x97   :  { %v194_v7 = vmul.f32 0.03125, %v101_v59  ;;  %v196_v8 = vmul.f32 0.03125, %v107_v60  ;;  %v257_v15 = vmul.f32 %v2648_v54, %v2648_v54  ;;  %v259_v19 = vmul.f32 %v2652_v55, %v2652_v55 }
  0x99   :  { %v2660_v29 = vsub.f32 %v1961_v4, %v194_v7  ;;  %v2664_v2 = vsub.f32 %v1965_v5, %v196_v8  ;;  %v289_v3 = vsel %vm95_vm0, %v257_v15, 0.0  ;;  %v295_v40 = vsel %vm95_vm0, %v259_v19, 0.0 }
  0x9a   :  { %290 = vadd.xlane.f32.xlu0 %v289_v3  ;;  %v110_v30 = vpop.xlane.xlu0 %109  ;;  %v113_v39 = vpop.xlane.xlu1 %112 }
  0x9b   :  { %v197_v44 = vmul.f32 0.03125, %v110_v30  ;;  %v198_v45 = vmul.f32 0.03125, %v113_v39  ;;  %v258_v49 = vmul.f32 %v2660_v29, %v2660_v29  ;;  %v260_v0 = vmul.f32 %v2664_v2, %v2664_v2 }
  0x9d   :  { %v2674_v1 = vsub.f32 %v1968_v11, %v197_v44  ;;  %v2678_v4 = vsub.f32 %v1969_v12, %v198_v45  ;;  %v292_v5 = vsel %vm95_vm0, %v258_v49, 0.0  ;;  %v298_v60 = vsel %vm95_vm0, %v260_v0, 0.0 }
  0x9e   :  { %296 = vadd.xlane.f32.xlu0 %v295_v40  ;;  %293 = vadd.xlane.f32.xlu1 %v292_v5  ;;  %v116_v50 = vpop.xlane.xlu0 %115  ;;  %v119_v59 = vpop.xlane.xlu1 %118 }
  0x9f   :  { %v199_v7 = vmul.f32 0.03125, %v116_v50  ;;  %v200_v8 = vmul.f32 0.03125, %v119_v59  ;;  %v261_v15 = vmul.f32 %v2674_v1, %v2674_v1  ;;  %v262_v11 = vmul.f32 %v2678_v4, %v2678_v4 }
  0xa1   :  { %v2688_v6 = vsub.f32 %v1972_v16, %v199_v7  ;;  %v2692_v12 = vsub.f32 %v1973_v17, %v200_v8  ;;  %v301_v19 = vsel %vm95_vm0, %v261_v15, 0.0  ;;  %v304_v39 = vsel %vm95_vm0, %v262_v11, 0.0 }
  0xa2   :  { %299 = vadd.xlane.f32.xlu1 %v298_v60  ;;  %302 = vadd.xlane.f32.xlu0 %v301_v19  ;;  %v122_v3 = vpop.xlane.xlu0 %121  ;;  %v125_v30 = vpop.xlane.xlu1 %124 }
  0xa3   :  { %v201_v40 = vmul.f32 0.03125, %v122_v3  ;;  %v202_v44 = vmul.f32 0.03125, %v125_v30  ;;  %v263_v45 = vmul.f32 %v2688_v6, %v2688_v6  ;;  %v264_v16 = vmul.f32 %v2692_v12, %v2692_v12 }
  0xa5   :  { %v2702_v13 = vsub.f32 %v1976_v21, %v201_v40  ;;  %v2706_v17 = vsub.f32 %v1977_v22, %v202_v44  ;;  %v307_v49 = vsel %vm95_vm0, %v263_v45, 0.0  ;;  %v310_v50 = vsel %vm95_vm0, %v264_v16, 0.0 }
  0xa6   :  { %305 = vadd.xlane.f32.xlu1 %v304_v39  ;;  %308 = vadd.xlane.f32.xlu0 %v307_v49  ;;  %v128_v0 = vpop.xlane.xlu0 %127  ;;  %v131_v5 = vpop.xlane.xlu1 %130 }
  0xa7   :  { %v203_v59 = vmul.f32 0.03125, %v128_v0  ;;  %v204_v60 = vmul.f32 0.03125, %v131_v5  ;;  %v265_v7 = vmul.f32 %v2702_v13, %v2702_v13  ;;  %v266_v21 = vmul.f32 %v2706_v17, %v2706_v17 }
  0xa9   :  { %v2716_v18 = vsub.f32 %v1980_v26, %v203_v59  ;;  %v2720_v22 = vsub.f32 %v1981_v27, %v204_v60  ;;  %v313_v8 = vsel %vm95_vm0, %v265_v7, 0.0  ;;  %v316_v19 = vsel %vm95_vm0, %v266_v21, 0.0 }
  0xaa   :  { %311 = vadd.xlane.f32.xlu1 %v310_v50  ;;  %314 = vadd.xlane.f32.xlu0 %v313_v8  ;;  %v134_v15 = vpop.xlane.xlu0 %133  ;;  %v137_v11 = vpop.xlane.xlu1 %136 }
  0xab   :  { %v205_v3 = vmul.f32 0.03125, %v134_v15  ;;  %v206_v30 = vmul.f32 0.03125, %v137_v11  ;;  %v267_v39 = vmul.f32 %v2716_v18, %v2716_v18  ;;  %v268_v26 = vmul.f32 %v2720_v22, %v2720_v22 }
  0xad   :  { %v2730_v23 = vsub.f32 %v1984_v31, %v205_v3  ;;  %v2734_v27 = vsub.f32 %v1985_v32, %v206_v30  ;;  %v319_v40 = vsel %vm95_vm0, %v267_v39, 0.0  ;;  %v322_v16 = vsel %vm95_vm0, %v268_v26, 0.0 }
  0xae   :  { %317 = vadd.xlane.f32.xlu1 %v316_v19  ;;  %320 = vadd.xlane.f32.xlu0 %v319_v40  ;;  %v140_v44 = vpop.xlane.xlu0 %139  ;;  %v143_v45 = vpop.xlane.xlu1 %142 }
  0xaf   :  { %v207_v49 = vmul.f32 0.03125, %v140_v44  ;;  %v208_v0 = vmul.f32 0.03125, %v143_v45  ;;  %v269_v5 = vmul.f32 %v2730_v23, %v2730_v23  ;;  %v270_v31 = vmul.f32 %v2734_v27, %v2734_v27 }
  0xb1   :  { %v2744_v28 = vsub.f32 %v1988_v36, %v207_v49  ;;  %v2748_v32 = vsub.f32 %v1989_v37, %v208_v0  ;;  %v325_v50 = vsel %vm95_vm0, %v269_v5, 0.0  ;;  %v328_v7 = vsel %vm95_vm0, %v270_v31, 0.0 }
  0xb2   :  { %323 = vadd.xlane.f32.xlu1 %v322_v16  ;;  %326 = vadd.xlane.f32.xlu0 %v325_v50  ;;  %v146_v59 = vpop.xlane.xlu0 %145  ;;  %v149_v60 = vpop.xlane.xlu1 %148 }
  0xb3   :  { %v209_v21 = vmul.f32 0.03125, %v146_v59  ;;  %v210_v8 = vmul.f32 0.03125, %v149_v60  ;;  %v271_v15 = vmul.f32 %v2744_v28, %v2744_v28  ;;  %v272_v36 = vmul.f32 %v2748_v32, %v2748_v32 }
  0xb5   :  { %v2758_v33 = vsub.f32 %v1992_v41, %v209_v21  ;;  %v2762_v37 = vsub.f32 %v1993_v42, %v210_v8  ;;  %v331_v11 = vsel %vm95_vm0, %v271_v15, 0.0  ;;  %v334_v30 = vsel %vm95_vm0, %v272_v36, 0.0 }
  0xb6   :  { %329 = vadd.xlane.f32.xlu1 %v328_v7  ;;  %332 = vadd.xlane.f32.xlu0 %v331_v11  ;;  %v152_v19 = vpop.xlane.xlu0 %151  ;;  %v155_v3 = vpop.xlane.xlu1 %154 }
  0xb7   :  { %v211_v39 = vmul.f32 0.03125, %v152_v19  ;;  %v212_v26 = vmul.f32 0.03125, %v155_v3  ;;  %v273_v40 = vmul.f32 %v2758_v33, %v2758_v33  ;;  %v274_v41 = vmul.f32 %v2762_v37, %v2762_v37 }
  0xb9   :  { %v2772_v38 = vsub.f32 %v1996_v46, %v211_v39  ;;  %v2776_v42 = vsub.f32 %v1997_v47, %v212_v26  ;;  %v337_v44 = vsel %vm95_vm0, %v273_v40, 0.0  ;;  %v340_v49 = vsel %vm95_vm0, %v274_v41, 0.0 }
  0xba   :  { %335 = vadd.xlane.f32.xlu1 %v334_v30  ;;  %338 = vadd.xlane.f32.xlu0 %v337_v44  ;;  %v158_v45 = vpop.xlane.xlu0 %157  ;;  %v161_v16 = vpop.xlane.xlu1 %160 }
  0xbb   :  { %v213_v0 = vmul.f32 0.03125, %v158_v45  ;;  %v214_v5 = vmul.f32 0.03125, %v161_v16  ;;  %v275_v31 = vmul.f32 %v2772_v38, %v2772_v38  ;;  %v276_v46 = vmul.f32 %v2776_v42, %v2776_v42  ;;  %v2259_v16 = vld [vmem:[%s3592_s3] sm:$0xff]  }
  0xbc   :  { %2158 = vmatprep.subr.bf16.mxu0 %v2259_v16 }
  0xbd   :  { %v2786_v43 = vsub.f32 %v2000_v51, %v213_v0  ;;  %v2790_v47 = vsub.f32 %v2001_v52, %v214_v5  ;;  %v343_v50 = vsel %vm95_vm0, %v275_v31, 0.0  ;;  %v346_v7 = vsel %vm95_vm0, %v276_v46, 0.0  ;;  %2159 = vmatpush3.bf16.msra.mxu0 %v2259_v16 }
  0xbe   :  { %341 = vadd.xlane.f32.xlu1 %v340_v49  ;;  %344 = vadd.xlane.f32.xlu0 %v343_v50  ;;  %v164_v59 = vpop.xlane.xlu0 %163  ;;  %v167_v60 = vpop.xlane.xlu1 %166 }
  0xbf   :  { %v215_v21 = vmul.f32 0.03125, %v164_v59  ;;  %v216_v8 = vmul.f32 0.03125, %v167_v60  ;;  %v277_v15 = vmul.f32 %v2786_v43, %v2786_v43  ;;  %v278_v51 = vmul.f32 %v2790_v47, %v2790_v47  ;;  %v2260_v60 = vld [vmem:[%s3592_s3 + $0x8] sm:$0xff]  }
  0xc0   :  { %2160 = vmatprep.subr.bf16.mxu0 %v2260_v60 }
  0xc1   :  { %v2800_v48 = vsub.f32 %v2004_v56, %v215_v21  ;;  %v2804_v52 = vsub.f32 %v2005_v57, %v216_v8  ;;  %v349_v36 = vsel %vm95_vm0, %v277_v15, 0.0  ;;  %v352_v3 = vsel %vm95_vm0, %v278_v51, 0.0  ;;  %2161 = vmatpush3.bf16.msra.mxu0 %v2260_v60 }
  0xc2   :  { %347 = vadd.xlane.f32.xlu1 %v346_v7  ;;  %350 = vadd.xlane.f32.xlu0 %v349_v36  ;;  %v170_v11 = vpop.xlane.xlu0 %169  ;;  %v173_v19 = vpop.xlane.xlu1 %172 }
  0xc3   :  { %v217_v30 = vmul.f32 0.03125, %v170_v11  ;;  %v218_v39 = vmul.f32 0.03125, %v173_v19  ;;  %v279_v26 = vmul.f32 %v2800_v48, %v2800_v48  ;;  %v280_v56 = vmul.f32 %v2804_v52, %v2804_v52 }
  0xc5   :  { %v2814_v53 = vsub.f32 %v2008_v61, %v217_v30  ;;  %v2818_v57 = vsub.f32 %v2009_v62, %v218_v39  ;;  %v355_v40 = vsel %vm95_vm0, %v279_v26, 0.0  ;;  %v358_v45 = vsel %vm95_vm0, %v280_v56, 0.0 }
  0xc6   :  { %353 = vadd.xlane.f32.xlu1 %v352_v3  ;;  %356 = vadd.xlane.f32.xlu0 %v355_v40  ;;  %v176_v41 = vpop.xlane.xlu0 %175  ;;  %v179_v44 = vpop.xlane.xlu1 %178 }
  0xc7   :  { %v219_v49 = vmul.f32 0.03125, %v176_v41  ;;  %v220_v0 = vmul.f32 0.03125, %v179_v44  ;;  %v281_v61 = vmul.f32 %v2814_v53, %v2814_v53  ;;  %v282_v58 = vmul.f32 %v2818_v57, %v2818_v57 }
  0xc9   :  { %v2831_v62 = vsub.f32 %v2012_v9, %v219_v49  ;;  %v2835_v5 = vsub.f32 %v2013_v10, %v220_v0  ;;  %v361_v31 = vsel %vm95_vm0, %v281_v61, 0.0  ;;  %v364_v59 = vsel %vm95_vm0, %v282_v58, 0.0 }
  0xca   :  { %359 = vadd.xlane.f32.xlu1 %v358_v45  ;;  %362 = vadd.xlane.f32.xlu0 %v361_v31  ;;  %v182_v46 = vpop.xlane.xlu0 %181  ;;  %v185_v50 = vpop.xlane.xlu1 %184 }
  0xcb   :  { %v221_v7 = vmul.f32 0.03125, %v182_v46  ;;  %v222_v9 = vmul.f32 0.03125, %v185_v50  ;;  %v283_v63 = vmul.f32 %v2831_v62, %v2831_v62  ;;  %v284_v10 = vmul.f32 %v2835_v5, %v2835_v5 }
  0xcd   :  { %v2848_v21 = vsub.f32 %v2016_v20, %v221_v7  ;;  %v2852_v8 = vsub.f32 %v2017_v24, %v222_v9  ;;  %v367_v15 = vsel %vm95_vm0, %v283_v63, 0.0  ;;  %v370_v11 = vsel %vm95_vm0, %v284_v10, 0.0 }
  0xce   :  { %365 = vadd.xlane.f32.xlu1 %v364_v59  ;;  %368 = vadd.xlane.f32.xlu0 %v367_v15  ;;  %v188_v51 = vpop.xlane.xlu0 %187  ;;  %v191_v36 = vpop.xlane.xlu1 %190 }
  0xcf   :  { %v223_v19 = vmul.f32 0.03125, %v188_v51  ;;  %v224_v3 = vmul.f32 0.03125, %v191_v36  ;;  %v285_v30 = vmul.f32 %v2848_v21, %v2848_v21  ;;  %v286_v20 = vmul.f32 %v2852_v8, %v2852_v8 }
  0xd1   :  { %v2862_v14 = vsub.f32 %v2020_v34, %v223_v19  ;;  %v2866_v24 = vsub.f32 %v2021_v35, %v224_v3  ;;  %v373_v39 = vsel %vm95_vm0, %v285_v30, 0.0  ;;  %v376_v26 = vsel %vm95_vm0, %v286_v20, 0.0  ;;  %v2880_v20 = vld [vmem:[%s3593_s1] ss:$0 sm:$0xff] }
  0xd2   :  { %371 = vadd.xlane.f32.xlu1 %v370_v11  ;;  %374 = vadd.xlane.f32.xlu0 %v373_v39 }
  0xd3   :  { %v287_v56 = vmul.f32 %v2862_v14, %v2862_v14  ;;  %v288_v40 = vmul.f32 %v2866_v24, %v2866_v24 }
  0xd5   :  { %v379_v41 = vsel %vm95_vm0, %v287_v56, 0.0  ;;  %v382_v25 = vsel %vm95_vm0, %v288_v40, 0.0 }
  0xd6   :  { %377 = vadd.xlane.f32.xlu1 %v376_v26  ;;  %380 = vadd.xlane.f32.xlu0 %v379_v41 }
  0xda   :  { %383 = vadd.xlane.f32.xlu1 %v382_v25 }
 0x127   :  { %v291_v34 = vpop.xlane.xlu0 %290 }
 0x128   :  { %v385_v35 = vmul.f32 0.03125, %v291_v34 }
 0x12a   :  { %v417_v44 = vadd.f32 1e-05, %v385_v35 }
 0x12b   :  { %v294_v45 = vpop.xlane.xlu1 %293  ;;  %v297_v16 = vpop.xlane.xlu0 %296 }
 0x12c   :  { %2269 = vrsqrt.f32 %v417_v44  ;;  %v386_v49 = vmul.f32 0.03125, %v294_v45  ;;  %v387_v0 = vmul.f32 0.03125, %v297_v16  ;;  %v2887_v45 = vld [vmem:[%s3594_s2] ss:$0 sm:$0xff] }
 0x12e   :  { %v418_v61 = vadd.f32 1e-05, %v386_v49  ;;  %v419_v58 = vadd.f32 1e-05, %v387_v0 }
 0x12f   :  { %v300_v31 = vpop.xlane.xlu1 %299  ;;  %v303_v46 = vpop.xlane.xlu0 %302 }
 0x130   :  { %2271 = vrsqrt.f32 %v418_v61  ;;  %v388_v50 = vmul.f32 0.03125, %v300_v31  ;;  %v389_v59 = vmul.f32 0.03125, %v303_v46 }
 0x131   :  { %2273 = vrsqrt.f32 %v419_v58 }
 0x132   :  { %v420_v60 = vadd.f32 1e-05, %v388_v50  ;;  %v421_v7 = vadd.f32 1e-05, %v389_v59 }
 0x133   :  { %v306_v9 = vpop.xlane.xlu1 %305  ;;  %v309_v63 = vpop.xlane.xlu0 %308 }
 0x134   :  { %2275 = vrsqrt.f32 %v420_v60  ;;  %v390_v10 = vmul.f32 0.03125, %v306_v9  ;;  %v391_v15 = vmul.f32 0.03125, %v309_v63 }
 0x135   :  { %2277 = vrsqrt.f32 %v421_v7 }
 0x136   :  { %v2270_v51 = vpop.eup %2269  ;;  %v422_v36 = vadd.f32 1e-05, %v390_v10  ;;  %v423_v11 = vadd.f32 1e-05, %v391_v15 }
 0x137   :  { %v481_v19 = vmul.f32 %v2270_v51, %v2648_v54  ;;  %v312_v3 = vpop.xlane.xlu1 %311  ;;  %v315_v30 = vpop.xlane.xlu0 %314 }
 0x138   :  { %2279 = vrsqrt.f32 %v422_v36  ;;  %v392_v39 = vmul.f32 0.03125, %v312_v3  ;;  %v393_v26 = vmul.f32 0.03125, %v315_v30 }
 0x139   :  { %2281 = vrsqrt.f32 %v423_v11  ;;  %v520_v34 = vmul.f32 %v2880_v20, %v481_v19 }
 0x13a   :  { %v2272_v56 = vpop.eup %2271  ;;  %v424_v40 = vadd.f32 1e-05, %v392_v39  ;;  %v425_v41 = vadd.f32 1e-05, %v393_v26 }
 0x13b   :  { %v2274_v25 = vpop.eup %2273  ;;  %v482_v35 = vmul.f32 %v2272_v56, %v2660_v29  ;;  %v318_v54 = vpop.xlane.xlu1 %317  ;;  %v559_v29 = vadd.f32 %v2887_v45, %v520_v34 }
 0x13c   :  { %v321_v44 = vpop.xlane.xlu0 %320  ;;  %v483_v16 = vmul.f32 %v2274_v25, %v2652_v55  ;;  %2283 = vrsqrt.f32 %v424_v40  ;;  %v394_v49 = vmul.f32 0.03125, %v318_v54 }
 0x13d   :  { %v395_v0 = vmul.f32 0.03125, %v321_v44  ;;  %v521_v61 = vmul.f32 %v2880_v20, %v482_v35  ;;  %2285 = vrsqrt.f32 %v425_v41 }
 0x13e   :  { %v2276_v58 = vpop.eup %2275  ;;  %v426_v31 = vadd.f32 1e-05, %v394_v49  ;;  %v522_v60 = vmul.f32 %v2880_v20, %v483_v16 }
 0x13f   :  { %v427_v46 = vadd.f32 1e-05, %v395_v0  ;;  %v2278_v50 = vpop.eup %2277  ;;  %v560_v59 = vadd.f32 %v2887_v45, %v521_v61  ;;  %v484_v7 = vmul.f32 %v2276_v58, %v2664_v2  ;;  %v324_v9 = vpop.xlane.xlu1 %323 }
 0x140   :  { %v327_v55 = vpop.xlane.xlu0 %326  ;;  %v485_v63 = vmul.f32 %v2278_v50, %v2674_v1  ;;  %2287 = vrsqrt.f32 %v426_v31  ;;  %v396_v10 = vmul.f32 0.03125, %v324_v9  ;;  %v561_v2 = vadd.f32 %v2887_v45, %v522_v60 }
 0x141   :  { %v591_v15 = vpack.c.bf16 %v560_v59, %v559_v29  ;;  %v523_v51 = vmul.f32 %v2880_v20, %v484_v7  ;;  %2289 = vrsqrt.f32 %v427_v46  ;;  %v397_v36 = vmul.f32 0.03125, %v327_v55 }
 0x142   :  { %v2280_v11 = vpop.eup %2279  ;;  %v524_v19 = vmul.f32 %v2880_v20, %v485_v63  ;;  %v428_v3 = vadd.f32 1e-05, %v396_v10 }
 0x143   :  { %v2282_v30 = vpop.eup %2281  ;;  %607 = vst.msk [vmem:[#allocation2] sm:$0xff] %vm95_vm0, %v591_v15  ;;  %v562_v39 = vadd.f32 %v2887_v45, %v523_v51  ;;  %v486_v1 = vmul.f32 %v2280_v11, %v2678_v4  ;;  %v429_v26 = vadd.f32 1e-05, %v397_v36  ;;  %v330_v56 = vpop.xlane.xlu1 %329 }
 0x144   :  { %v333_v40 = vpop.xlane.xlu0 %332  ;;  %v487_v41 = vmul.f32 %v2282_v30, %v2688_v6  ;;  %2291 = vrsqrt.f32 %v428_v3  ;;  %v398_v25 = vmul.f32 0.03125, %v330_v56  ;;  %v563_v16 = vadd.f32 %v2887_v45, %v524_v19 }
 0x145   :  { %v592_v34 = vpack.c.bf16 %v562_v39, %v561_v2  ;;  %v525_v35 = vmul.f32 %v2880_v20, %v486_v1  ;;  %2293 = vrsqrt.f32 %v429_v26  ;;  %v399_v54 = vmul.f32 0.03125, %v333_v40 }
 0x146   :  { %v2284_v44 = vpop.eup %2283  ;;  %v430_v49 = vadd.f32 1e-05, %v398_v25  ;;  %v526_v61 = vmul.f32 %v2880_v20, %v487_v41 }
 0x147   :  { %v2286_v0 = vpop.eup %2285  ;;  %608 = vst.msk [vmem:[#allocation2 + $0x8] sm:$0xff] %vm95_vm0, %v592_v34  ;;  %v564_v4 = vadd.f32 %v2887_v45, %v525_v35  ;;  %v488_v6 = vmul.f32 %v2284_v44, %v2692_v12  ;;  %v431_v58 = vadd.f32 1e-05, %v399_v54  ;;  %v336_v31 = vpop.xlane.xlu1 %335 }
 0x148   :  { %v339_v46 = vpop.xlane.xlu0 %338  ;;  %v489_v50 = vmul.f32 %v2286_v0, %v2702_v13  ;;  %2295 = vrsqrt.f32 %v430_v49  ;;  %v400_v29 = vmul.f32 0.03125, %v336_v31  ;;  %v565_v12 = vadd.f32 %v2887_v45, %v526_v61 }
 0x149   :  { %v593_v59 = vpack.c.bf16 %v564_v4, %v563_v16  ;;  %v527_v60 = vmul.f32 %v2880_v20, %v488_v6  ;;  %2297 = vrsqrt.f32 %v431_v58  ;;  %v401_v7 = vmul.f32 0.03125, %v339_v46 }
 0x14a   :  { %v2288_v9 = vpop.eup %2287  ;;  %v528_v55 = vmul.f32 %v2880_v20, %v489_v50  ;;  %v432_v63 = vadd.f32 1e-05, %v400_v29  ;;  %v655_v10 = vld [vmem:[#allocation2] sm:$0xff] }
 0x14b   :  { %v2290_v15 = vpop.eup %2289  ;;  %609 = vst.msk [vmem:[#allocation2 + $0x10] sm:$0xff] %vm95_vm0, %v593_v59  ;;  %v566_v51 = vadd.f32 %v2887_v45, %v527_v60  ;;  %v490_v13 = vmul.f32 %v2288_v9, %v2706_v17  ;;  %v433_v36 = vadd.f32 1e-05, %v401_v7  ;;  %v342_v11 = vpop.xlane.xlu1 %341  ;;  %2162 = vmatprep.mubr.msk.bf16.mxu0 %vm95_vm0, %v655_v10 }
 0x14c   :  { %v345_v19 = vpop.xlane.xlu0 %344  ;;  %v491_v3 = vmul.f32 %v2290_v15, %v2716_v18  ;;  %2299 = vrsqrt.f32 %v432_v63  ;;  %v402_v30 = vmul.f32 0.03125, %v342_v11  ;;  %v567_v56 = vadd.f32 %v2887_v45, %v528_v55 }
 0x14d   :  { %v594_v2 = vpack.c.bf16 %v566_v51, %v565_v12  ;;  %v529_v39 = vmul.f32 %v2880_v20, %v490_v13  ;;  %2301 = vrsqrt.f32 %v433_v36  ;;  %v403_v1 = vmul.f32 0.03125, %v345_v19 }
 0x14e   :  { %v2292_v26 = vpop.eup %2291  ;;  %v434_v40 = vadd.f32 1e-05, %v402_v30  ;;  %v656_v41 = vld [vmem:[#allocation2 + $0x8] sm:$0xff]  ;;  %v530_v34 = vmul.f32 %v2880_v20, %v491_v3 }
 0x14f   :  { %v2294_v17 = vpop.eup %2293  ;;  %610 = vst.msk [vmem:[#allocation2 + $0x18] sm:$0xff] %vm95_vm0, %v594_v2  ;;  %v568_v25 = vadd.f32 %v2887_v45, %v529_v39  ;;  %v492_v18 = vmul.f32 %v2292_v26, %v2720_v22  ;;  %v435_v35 = vadd.f32 1e-05, %v403_v1  ;;  %v348_v54 = vpop.xlane.xlu1 %347  ;;  %2163 = vmatmul.mubr.msk.bf16.vlgmr.msra.gmra.mrb[0].mxu0 %vm95_vm0, %v656_v41 }
 0x150   :  { %v351_v44 = vpop.xlane.xlu0 %350  ;;  %v493_v16 = vmul.f32 %v2294_v17, %v2730_v23  ;;  %2303 = vrsqrt.f32 %v434_v40  ;;  %v404_v49 = vmul.f32 0.03125, %v348_v54  ;;  %v569_v50 = vadd.f32 %v2887_v45, %v530_v34 }
 0x151   :  { %v595_v0 = vpack.c.bf16 %v568_v25, %v567_v56  ;;  %v531_v4 = vmul.f32 %v2880_v20, %v492_v18  ;;  %2305 = vrsqrt.f32 %v435_v35  ;;  %v405_v61 = vmul.f32 0.03125, %v351_v44 }
 0x152   :  { %v2296_v6 = vpop.eup %2295  ;;  %v532_v58 = vmul.f32 %v2880_v20, %v493_v16  ;;  %v436_v31 = vadd.f32 1e-05, %v404_v49  ;;  %v657_v46 = vld [vmem:[#allocation2 + $0x10] sm:$0xff] }
 0x153   :  { %v2298_v22 = vpop.eup %2297  ;;  %611 = vst.msk [vmem:[#allocation2 + $0x20] sm:$0xff] %vm95_vm0, %v595_v0  ;;  %v570_v29 = vadd.f32 %v2887_v45, %v531_v4  ;;  %v494_v23 = vmul.f32 %v2296_v6, %v2734_v27  ;;  %v437_v59 = vadd.f32 1e-05, %v405_v61  ;;  %v354_v60 = vpop.xlane.xlu1 %353  ;;  %2166 = vmatprep.mubr.msk.bf16.mxu0 %vm95_vm0, %v657_v46 }
 0x154   :  { %v357_v7 = vpop.xlane.xlu0 %356  ;;  %v495_v9 = vmul.f32 %v2298_v22, %v2744_v28  ;;  %2307 = vrsqrt.f32 %v436_v31  ;;  %v406_v55 = vmul.f32 0.03125, %v354_v60  ;;  %v571_v51 = vadd.f32 %v2887_v45, %v532_v58 }
 0x155   :  { %v596_v63 = vpack.c.bf16 %v570_v29, %v569_v50  ;;  %v533_v10 = vmul.f32 %v2880_v20, %v494_v23  ;;  %2309 = vrsqrt.f32 %v437_v59  ;;  %v407_v15 = vmul.f32 0.03125, %v357_v7 }
 0x156   :  { %v2300_v12 = vpop.eup %2299  ;;  %v438_v13 = vadd.f32 1e-05, %v406_v55  ;;  %v658_v36 = vld [vmem:[#allocation2 + $0x18] sm:$0xff]  ;;  %v534_v19 = vmul.f32 %v2880_v20, %v495_v9 }
 0x157   :  { %v2302_v27 = vpop.eup %2301  ;;  %612 = vst.msk [vmem:[#allocation2 + $0x28] sm:$0xff] %vm95_vm0, %v596_v63  ;;  %v572_v11 = vadd.f32 %v2887_v45, %v533_v10  ;;  %v496_v28 = vmul.f32 %v2300_v12, %v2748_v32  ;;  %v439_v3 = vadd.f32 1e-05, %v407_v15  ;;  %v360_v30 = vpop.xlane.xlu1 %359  ;;  %2167 = vmatmul.mubr.msk.bf16.gmra.mrb[4].mxu0 %vm95_vm0, %v658_v36 }
 0x158   :  { %v363_v2 = vpop.xlane.xlu0 %362  ;;  %v497_v39 = vmul.f32 %v2302_v27, %v2758_v33  ;;  %2311 = vrsqrt.f32 %v438_v13  ;;  %v408_v1 = vmul.f32 0.03125, %v360_v30  ;;  %v573_v18 = vadd.f32 %v2887_v45, %v534_v19 }
 0x159   :  { %v597_v26 = vpack.c.bf16 %v572_v11, %v571_v51  ;;  %v535_v56 = vmul.f32 %v2880_v20, %v496_v28  ;;  %2313 = vrsqrt.f32 %v439_v3  ;;  %v409_v40 = vmul.f32 0.03125, %v363_v2 }
 0x15a   :  { %v2304_v41 = vpop.eup %2303  ;;  %v536_v17 = vmul.f32 %v2880_v20, %v497_v39  ;;  %v440_v25 = vadd.f32 1e-05, %v408_v1  ;;  %v659_v34 = vld [vmem:[#allocation2 + $0x20] sm:$0xff] }
 0x15b   :  { %v2306_v32 = vpop.eup %2305  ;;  %613 = vst.msk [vmem:[#allocation2 + $0x30] sm:$0xff] %vm95_vm0, %v597_v26  ;;  %v574_v35 = vadd.f32 %v2887_v45, %v535_v56  ;;  %v498_v33 = vmul.f32 %v2304_v41, %v2762_v37  ;;  %v441_v54 = vadd.f32 1e-05, %v409_v40  ;;  %v366_v44 = vpop.xlane.xlu1 %365  ;;  %2170 = vmatprep.mubr.msk.bf16.mxu0 %vm95_vm0, %v659_v34 }
 0x15c   :  { %v369_v16 = vpop.xlane.xlu0 %368  ;;  %v499_v49 = vmul.f32 %v2306_v32, %v2772_v38  ;;  %2315 = vrsqrt.f32 %v440_v25  ;;  %v410_v0 = vmul.f32 0.03125, %v366_v44  ;;  %v575_v31 = vadd.f32 %v2887_v45, %v536_v17 }
 0x15d   :  { %v598_v4 = vpack.c.bf16 %v574_v35, %v573_v18  ;;  %v537_v61 = vmul.f32 %v2880_v20, %v498_v33  ;;  %2317 = vrsqrt.f32 %v441_v54  ;;  %v411_v6 = vmul.f32 0.03125, %v369_v16 }
 0x15e   :  { %v2308_v58 = vpop.eup %2307  ;;  %v442_v46 = vadd.f32 1e-05, %v410_v0  ;;  %v660_v22 = vld [vmem:[#allocation2 + $0x28] sm:$0xff]  ;;  %v538_v29 = vmul.f32 %v2880_v20, %v499_v49 }
 0x15f   :  { %v2310_v37 = vpop.eup %2309  ;;  %614 = vst.msk [vmem:[#allocation2 + $0x38] sm:$0xff] %vm95_vm0, %v598_v4  ;;  %v576_v50 = vadd.f32 %v2887_v45, %v537_v61  ;;  %v500_v38 = vmul.f32 %v2308_v58, %v2776_v42  ;;  %v443_v23 = vadd.f32 1e-05, %v411_v6  ;;  %v372_v59 = vpop.xlane.xlu1 %371  ;;  %2171 = vmatmul.mubr.msk.bf16.gmra.mrb[8].mxu0 %vm95_vm0, %v660_v22 }
 0x160   :  { %v375_v60 = vpop.xlane.xlu0 %374  ;;  %v501_v7 = vmul.f32 %v2310_v37, %v2786_v43  ;;  %2319 = vrsqrt.f32 %v442_v46  ;;  %v412_v9 = vmul.f32 0.03125, %v372_v59  ;;  %v577_v36 = vadd.f32 %v2887_v45, %v538_v29 }
 0x161   :  { %v599_v55 = vpack.c.bf16 %v576_v50, %v575_v31  ;;  %v539_v63 = vmul.f32 %v2880_v20, %v500_v38  ;;  %2321 = vrsqrt.f32 %v443_v23  ;;  %v413_v10 = vmul.f32 0.03125, %v375_v60 }
 0x162   :  { %v2312_v15 = vpop.eup %2311  ;;  %v540_v12 = vmul.f32 %v2880_v20, %v501_v7  ;;  %v444_v51 = vadd.f32 1e-05, %v412_v9  ;;  %v661_v13 = vld [vmem:[#allocation2 + $0x30] sm:$0xff] }
 0x163   :  { %v2314_v42 = vpop.eup %2313  ;;  %615 = vst.msk [vmem:[#allocation2 + $0x40] sm:$0xff] %vm95_vm0, %v599_v55  ;;  %v578_v27 = vadd.f32 %v2887_v45, %v539_v63  ;;  %v502_v43 = vmul.f32 %v2312_v15, %v2790_v47  ;;  %v445_v11 = vadd.f32 1e-05, %v413_v10  ;;  %v378_v19 = vpop.xlane.xlu1 %377  ;;  %2174 = vmatprep.mubr.msk.bf16.mxu0 %vm95_vm0, %v661_v13 }
 0x164   :  { %v381_v28 = vpop.xlane.xlu0 %380  ;;  %v503_v3 = vmul.f32 %v2314_v42, %v2800_v48  ;;  %2323 = vrsqrt.f32 %v444_v51  ;;  %v414_v30 = vmul.f32 0.03125, %v378_v19  ;;  %v579_v56 = vadd.f32 %v2887_v45, %v540_v12 }
 0x165   :  { %v600_v2 = vpack.c.bf16 %v578_v27, %v577_v36  ;;  %v541_v39 = vmul.f32 %v2880_v20, %v502_v43  ;;  %2325 = vrsqrt.f32 %v445_v11  ;;  %v415_v1 = vmul.f32 0.03125, %v381_v28 }
 0x166   :  { %v2316_v26 = vpop.eup %2315  ;;  %v446_v40 = vadd.f32 1e-05, %v414_v30  ;;  %v662_v41 = vld [vmem:[#allocation2 + $0x38] sm:$0xff]  ;;  %v542_v25 = vmul.f32 %v2880_v20, %v503_v3 }
 0x167   :  { %v2318_v47 = vpop.eup %2317  ;;  %616 = vst.msk [vmem:[#allocation2 + $0x48] sm:$0xff] %vm95_vm0, %v600_v2  ;;  %v580_v17 = vadd.f32 %v2887_v45, %v541_v39  ;;  %v504_v48 = vmul.f32 %v2316_v26, %v2804_v52  ;;  %v447_v34 = vadd.f32 1e-05, %v415_v1  ;;  %v384_v32 = vpop.xlane.xlu1 %383  ;;  %2175 = vmatmul.mubr.msk.bf16.gmra.mrb[12].mxu0 %vm95_vm0, %v662_v41  ;;  %v2263_v39 = vld [vmem:[%s3595_s5 + $0x10] sm:$0xff]   ;;  %v2264_v1 = vld [vmem:[%s3595_s5 + $0x18] sm:$0xff]   ;;  %v2265_v26 = vld [vmem:[%s3595_s5 + $0x20] sm:$0xff]  }
 0x168   :  { %v505_v18 = vmul.f32 %v2318_v47, %v2814_v53  ;;  %2327 = vrsqrt.f32 %v446_v40  ;;  %v416_v35 = vmul.f32 0.03125, %v384_v32  ;;  %v581_v52 = vadd.f32 %v2887_v45, %v542_v25  ;;  %v2267_v40 = vld [vmem:[%s3595_s5 + $0x30] sm:$0xff]   ;;  %v2268_v41 = vld [vmem:[%s3595_s5 + $0x38] sm:$0xff]  }
 0x169   :  { %v601_v33 = vpack.c.bf16 %v580_v17, %v579_v56  ;;  %v543_v54 = vmul.f32 %v2880_v20, %v504_v48  ;;  %2329 = vrsqrt.f32 %v447_v34  ;;  %v2266_v56 = vld [vmem:[%s3595_s5 + $0x28] sm:$0xff]   ;;  %v2397_v47 = vmov 0.0   ;;  %v3073_v17 = vld [vmem:[%s3596_s4] ss:$0 sm:$0xff] }
 0x16a   :  { %v2320_v44 = vpop.eup %2319  ;;  %v448_v16 = vadd.f32 1e-05, %v416_v35  ;;  %v663_v49 = vld [vmem:[#allocation2 + $0x40] sm:$0xff]  ;;  %v544_v61 = vmul.f32 %v2880_v20, %v505_v18  ;;  %625 = vst.msk [vmem:[#allocation3 + $0x10] sm:$0xff] %vm95_vm0, %v2397_v47  ;;  %623 = vst.msk [vmem:[#allocation3] sm:$0xff] %vm95_vm0, %v2397_v47 }
 0x16b   :  { %v2322_v0 = vpop.eup %2321  ;;  %617 = vst.msk [vmem:[#allocation2 + $0x50] sm:$0xff] %vm95_vm0, %v601_v33  ;;  %v582_v4 = vadd.f32 %v2887_v45, %v543_v54  ;;  %v506_v53 = vmul.f32 %v2320_v44, %v2818_v57  ;;  %2178 = vmatprep.mubr.msk.bf16.mxu0 %vm95_vm0, %v663_v49  ;;  %624 = vst.msk [vmem:[#allocation3 + $0x8] sm:$0xff] %vm95_vm0, %v2397_v47 }
 0x16c   :  { %v507_v6 = vmul.f32 %v2322_v0, %v2831_v62  ;;  %2331 = vrsqrt.f32 %v448_v16  ;;  %v583_v50 = vadd.f32 %v2887_v45, %v544_v61  ;;  %626 = vst.msk [vmem:[#allocation3 + $0x18] sm:$0xff] %vm95_vm0, %v2397_v47  ;;  %627 = vst.msk [vmem:[#allocation3 + $0x20] sm:$0xff] %vm95_vm0, %v2397_v47 }
 0x16d   :  { %v602_v58 = vpack.c.bf16 %v582_v4, %v581_v52  ;;  %v545_v31 = vmul.f32 %v2880_v20, %v506_v53  ;;  %628 = vst.msk [vmem:[#allocation3 + $0x28] sm:$0xff] %vm95_vm0, %v2397_v47  ;;  %629 = vst.msk [vmem:[#allocation3 + $0x30] sm:$0xff] %vm95_vm0, %v2397_v47 }
 0x16e   :  { %v2324_v46 = vpop.eup %2323  ;;  %v664_v22 = vld [vmem:[#allocation2 + $0x48] sm:$0xff]  ;;  %v546_v38 = vmul.f32 %v2880_v20, %v507_v6  ;;  %630 = vst.msk [vmem:[#allocation3 + $0x38] sm:$0xff] %vm95_vm0, %v2397_v47  ;;  %631 = vst.msk [vmem:[#allocation3 + $0x40] sm:$0xff] %vm95_vm0, %v2397_v47 }
 0x16f   :  { %v2326_v37 = vpop.eup %2325  ;;  %618 = vst.msk [vmem:[#allocation2 + $0x58] sm:$0xff] %vm95_vm0, %v602_v58  ;;  %v584_v29 = vadd.f32 %v2887_v45, %v545_v31  ;;  %v508_v57 = vmul.f32 %v2324_v46, %v2835_v5  ;;  %2179 = vmatmul.mubr.msk.bf16.gmra.mrb[16].mxu0 %vm95_vm0, %v664_v22  ;;  %632 = vst.msk [vmem:[#allocation3 + $0x48] sm:$0xff] %vm95_vm0, %v2397_v47 }
 0x170   :  { %v509_v62 = vmul.f32 %v2326_v37, %v2848_v21  ;;  %v585_v55 = vadd.f32 %v2887_v45, %v546_v38  ;;  %633 = vst.msk [vmem:[#allocation3 + $0x50] sm:$0xff] %vm95_vm0, %v2397_v47  ;;  %634 = vst.msk [vmem:[#allocation3 + $0x58] sm:$0xff] %vm95_vm0, %v2397_v47 }
 0x171   :  { %v603_v23 = vpack.c.bf16 %v584_v29, %v583_v50  ;;  %v547_v59 = vmul.f32 %v2880_v20, %v508_v57  ;;  %635 = vst.msk [vmem:[#allocation3 + $0x60] sm:$0xff] %vm95_vm0, %v2397_v47  ;;  %636 = vst.msk [vmem:[#allocation3 + $0x68] sm:$0xff] %vm95_vm0, %v2397_v47 }
 0x172   :  { %v2328_v60 = vpop.eup %2327  ;;  %v665_v7 = vld [vmem:[#allocation2 + $0x50] sm:$0xff]  ;;  %v548_v10 = vmul.f32 %v2880_v20, %v509_v62  ;;  %637 = vst.msk [vmem:[#allocation3 + $0x70] sm:$0xff] %vm95_vm0, %v2397_v47  ;;  %638 = vst.msk [vmem:[#allocation3 + $0x78] sm:$0xff] %vm95_vm0, %v2397_v47 }
 0x173   :  { %v2330_v9 = vpop.eup %2329  ;;  %619 = vst.msk [vmem:[#allocation2 + $0x60] sm:$0xff] %vm95_vm0, %v603_v23  ;;  %v586_v63 = vadd.f32 %v2887_v45, %v547_v59  ;;  %v510_v5 = vmul.f32 %v2328_v60, %v2852_v8  ;;  %2182 = vmatprep.mubr.msk.bf16.mxu0 %vm95_vm0, %v665_v7  ;;  %639 = vst.msk [vmem:[#allocation3 + $0x80] sm:$0xff] %vm95_vm0, %v2397_v47 }
 0x174   :  { %v511_v21 = vmul.f32 %v2330_v9, %v2862_v14  ;;  %v587_v42 = vadd.f32 %v2887_v45, %v548_v10  ;;  %640 = vst.msk [vmem:[#allocation3 + $0x88] sm:$0xff] %vm95_vm0, %v2397_v47  ;;  %641 = vst.msk [vmem:[#allocation3 + $0x90] sm:$0xff] %vm95_vm0, %v2397_v47 }
 0x175   :  { %v604_v15 = vpack.c.bf16 %v586_v63, %v585_v55  ;;  %v549_v12 = vmul.f32 %v2880_v20, %v510_v5  ;;  %642 = vst.msk [vmem:[#allocation3 + $0x98] sm:$0xff] %vm95_vm0, %v2397_v47  ;;  %643 = vst.msk [vmem:[#allocation3 + $0xa0] sm:$0xff] %vm95_vm0, %v2397_v47 }
 0x176   :  { %v2332_v51 = vpop.eup %2331  ;;  %v666_v13 = vld [vmem:[#allocation2 + $0x58] sm:$0xff]  ;;  %v550_v27 = vmul.f32 %v2880_v20, %v511_v21  ;;  %644 = vst.msk [vmem:[#allocation3 + $0xa8] sm:$0xff] %vm95_vm0, %v2397_v47  ;;  %645 = vst.msk [vmem:[#allocation3 + $0xb0] sm:$0xff] %vm95_vm0, %v2397_v47 }
 0x177   :  { %620 = vst.msk [vmem:[#allocation2 + $0x68] sm:$0xff] %vm95_vm0, %v604_v15  ;;  %v588_v36 = vadd.f32 %v2887_v45, %v549_v12  ;;  %v512_v43 = vmul.f32 %v2332_v51, %v2866_v24  ;;  %2183 = vmatmul.mubr.msk.bf16.gmra.mrb[20].mxu0 %vm95_vm0, %v666_v13  ;;  %646 = vst.msk [vmem:[#allocation3 + $0xb8] sm:$0xff] %vm95_vm0, %v2397_v47 }
 0x178   :  { %v589_v19 = vadd.f32 %v2887_v45, %v550_v27  ;;  %647 = vst.msk [vmem:[#allocation3 + $0xc0] sm:$0xff] %vm95_vm0, %v2397_v47  ;;  %648 = vst.msk [vmem:[#allocation3 + $0xc8] sm:$0xff] %vm95_vm0, %v2397_v47 }
 0x179   :  { %v605_v8 = vpack.c.bf16 %v588_v36, %v587_v42  ;;  %v551_v14 = vmul.f32 %v2880_v20, %v512_v43  ;;  %v2261_v20 = vld [vmem:[%s3595_s5] sm:$0xff]   ;;  %649 = vst.msk [vmem:[#allocation3 + $0xd0] sm:$0xff] %vm95_vm0, %v2397_v47  ;;  %650 = vst.msk [vmem:[#allocation3 + $0xd8] sm:$0xff] %vm95_vm0, %v2397_v47 }
 0x17a   :  { %v667_v11 = vld [vmem:[#allocation2 + $0x60] sm:$0xff]  ;;  %2194 = vmatprep.subr.bf16.mxu0 %v2261_v20  ;;  %2242 = vmatprep.subr.bf16.mxu1 %v2261_v20  ;;  %651 = vst.msk [vmem:[#allocation3 + $0xe0] sm:$0xff] %vm95_vm0, %v2397_v47  ;;  %652 = vst.msk [vmem:[#allocation3 + $0xe8] sm:$0xff] %vm95_vm0, %v2397_v47 }
 0x17b   :  { %621 = vst.msk [vmem:[#allocation2 + $0x70] sm:$0xff] %vm95_vm0, %v605_v8  ;;  %v590_v28 = vadd.f32 %v2887_v45, %v551_v14  ;;  %2186 = vmatprep.mubr.msk.bf16.mxu0 %vm95_vm0, %v667_v11  ;;  %2195 = vmatpush3.bf16.msra.mxu0 %v2261_v20  ;;  %v2262_v45 = vld [vmem:[%s3595_s5 + $0x8] sm:$0xff]   ;;  %653 = vst.msk [vmem:[#allocation3 + $0xf0] sm:$0xff] %vm95_vm0, %v2397_v47 }
 0x17c   :  { %2250 = vmatpush3.bf16.msra.mxu1 %v2261_v20  ;;  %2196 = vmatprep.subr.bf16.mxu0 %v2262_v45  ;;  %654 = vst.msk [vmem:[#allocation3 + $0xf8] sm:$0xff] %vm95_vm0, %v2397_v47 }
 0x17d   :  { %v606_v3 = vpack.c.bf16 %v590_v28, %v589_v19  ;;  %2243 = vmatprep.subr.bf16.mxu1 %v2262_v45 }
 0x17e   :  { %v668_v30 = vld [vmem:[#allocation2 + $0x68] sm:$0xff] }
 0x17f   :  { %622 = vst.msk [vmem:[#allocation2 + $0x78] sm:$0xff] %vm95_vm0, %v606_v3  ;;  %2187 = vmatmul.mubr.msk.bf16.gmra.mrb[24].mxu0 %vm95_vm0, %v668_v30 }
 0x180   :  { %2197 = vmatpush3.bf16.msra.mxu0 %v2262_v45  ;;  %2251 = vmatpush3.bf16.msra.mxu1 %v2262_v45 }
 0x181   :  { %2198 = vmatprep.subr.bf16.mxu0 %v2263_v39  ;;  %2244 = vmatprep.subr.bf16.mxu1 %v2263_v39 }
 0x182   :  { %v669_v24 = vld [vmem:[#allocation2 + $0x70] sm:$0xff] }
 0x183   :  { %2190 = vmatprep.mubr.msk.bf16.mxu0 %vm95_vm0, %v669_v24 }
 0x184   :  { %2199 = vmatpush3.bf16.msra.mxu0 %v2263_v39  ;;  %2252 = vmatpush3.bf16.msra.mxu1 %v2263_v39 }
 0x185   :  { %2200 = vmatprep.subr.bf16.mxu0 %v2264_v1  ;;  %2245 = vmatprep.subr.bf16.mxu1 %v2264_v1 }
 0x186   :  { %v670_v2 = vld [vmem:[#allocation2 + $0x78] sm:$0xff] }
 0x187   :  { %2191 = vmatmul.mubr.msk.bf16.gmra.mrb[28].mxu0 %vm95_vm0, %v670_v2 }
 0x188   :  { %2201 = vmatpush3.bf16.msra.mxu0 %v2264_v1  ;;  %2253 = vmatpush3.bf16.msra.mxu1 %v2264_v1 }
 0x189   :  { %2202 = vmatprep.subr.bf16.mxu0 %v2265_v26  ;;  %2246 = vmatprep.subr.bf16.mxu1 %v2265_v26 }
 0x18c   :  { %2203 = vmatpush3.bf16.msra.mxu0 %v2265_v26  ;;  %2254 = vmatpush3.bf16.msra.mxu1 %v2265_v26 }
 0x18d   :  { %2204 = vmatprep.subr.bf16.mxu0 %v2266_v56  ;;  %2247 = vmatprep.subr.bf16.mxu1 %v2266_v56 }
 0x190   :  { %2205 = vmatpush3.bf16.msra.mxu0 %v2266_v56  ;;  %2255 = vmatpush3.bf16.msra.mxu1 %v2266_v56 }
 0x191   :  { %2206 = vmatprep.subr.bf16.mxu0 %v2267_v40  ;;  %2248 = vmatprep.subr.bf16.mxu1 %v2267_v40 }
 0x194   :  { %2207 = vmatpush3.bf16.msra.mxu0 %v2267_v40  ;;  %2256 = vmatpush3.bf16.msra.mxu1 %v2267_v40 }
 0x195   :  { %2208 = vmatprep.subr.bf16.mxu0 %v2268_v41  ;;  %2249 = vmatprep.subr.bf16.mxu1 %v2268_v41 }
 0x198   :  { %2209 = vmatpush3.bf16.msra.mxu0 %v2268_v41  ;;  %2257 = vmatpush3.bf16.msra.mxu1 %v2268_v41 }
 0x222   :  { %v2164_v25 = vpop.f32.mrb[0].mxu0 }
 0x223   :  { %v3076_v48 = vadd.f32 %v2164_v25, %v3073_v17  ;;  %v777_v34 = vpop.f32.mrb[1].mxu0 }
 0x224   :  { %v3079_v32 = vadd.f32 %v3073_v17, %v777_v34  ;;  %v2165_v18 = vpop.f32.mrb[2].mxu0 }
 0x225   :  { %v938_v35 = vmul.f32 0.044715, %v3076_v48  ;;  %v3083_v33 = vadd.f32 %v2165_v18, %v3073_v17  ;;  %v780_v54 = vpop.f32.mrb[3].mxu0 }
 0x226   :  { %v936_v44 = vmul.f32 0.044715, %v3079_v32  ;;  %v3087_v16 = vadd.f32 %v3073_v17, %v780_v54 }
 0x227   :  { %v970_v49 = vmul.f32 %v938_v35, %v3076_v48  ;;  %v939_v0 = vmul.f32 0.044715, %v3083_v33 }
 0x228   :  { %v968_v52 = vmul.f32 %v936_v44, %v3079_v32  ;;  %v937_v4 = vmul.f32 0.044715, %v3087_v16  ;;  %v906_v44 = vmul.f32 0.5, %v3076_v48 }
 0x229   :  { %v1002_v61 = vmul.f32 %v970_v49, %v3076_v48  ;;  %v971_v53 = vmul.f32 %v939_v0, %v3083_v33  ;;  %v904_v49 = vmul.f32 0.5, %v3079_v32 }
 0x22a   :  { %v1000_v6 = vmul.f32 %v968_v52, %v3079_v32  ;;  %v969_v58 = vmul.f32 %v937_v4, %v3087_v16  ;;  %v2168_v31 = vpop.f32.mrb[4].mxu0 }
 0x22b   :  { %v1034_v46 = vadd.f32 %v1002_v61, %v3076_v48  ;;  %v1003_v22 = vmul.f32 %v971_v53, %v3083_v33  ;;  %v3100_v37 = vadd.f32 %v2168_v31, %v3073_v17  ;;  %v793_v50 = vpop.f32.mrb[5].mxu0 }
 0x22c   :  { %v1001_v29 = vmul.f32 %v969_v58, %v3087_v16  ;;  %v3104_v38 = vadd.f32 %v3073_v17, %v793_v50  ;;  %v2169_v57 = vpop.f32.mrb[6].mxu0  ;;  %v1032_v62 = vadd.f32 %v1000_v6, %v3079_v32  ;;  %v907_v58 = vmul.f32 0.5, %v3083_v33 }
 0x22d   :  { %v1066_v23 = vmul.f32 0.7978846, %v1034_v46  ;;  %v1035_v59 = vadd.f32 %v1003_v22, %v3083_v33  ;;  %v942_v60 = vmul.f32 0.044715, %v3100_v37  ;;  %v3110_v7 = vadd.f32 %v2169_v57, %v3073_v17  ;;  %v796_v9 = vpop.f32.mrb[7].mxu0 }
 0x22e   :  { %v940_v55 = vmul.f32 0.044715, %v3104_v38  ;;  %v3114_v63 = vadd.f32 %v3073_v17, %v796_v9  ;;  %v1033_v10 = vadd.f32 %v1001_v29, %v3087_v16  ;;  %v1064_v5 = vmul.f32 0.7978846, %v1032_v62 }
 0x22f   :  { %2333 = vtanh.f32 %v1066_v23  ;;  %v1067_v21 = vmul.f32 0.7978846, %v1035_v59  ;;  %v974_v15 = vmul.f32 %v942_v60, %v3100_v37  ;;  %v943_v12 = vmul.f32 0.044715, %v3110_v7 }
 0x230   :  { %v941_v51 = vmul.f32 0.044715, %v3114_v63  ;;  %v1065_v13 = vmul.f32 0.7978846, %v1033_v10  ;;  %2335 = vtanh.f32 %v1064_v5  ;;  %v972_v43 = vmul.f32 %v940_v55, %v3104_v38 }
 0x231   :  { %2337 = vtanh.f32 %v1067_v21  ;;  %v1006_v42 = vmul.f32 %v974_v15, %v3100_v37  ;;  %v975_v36 = vmul.f32 %v943_v12, %v3110_v7  ;;  %v905_v33 = vmul.f32 0.5, %v3087_v16 }
 0x232   :  { %v2172_v27 = vpop.f32.mrb[8].mxu0  ;;  %2339 = vtanh.f32 %v1065_v13  ;;  %v973_v8 = vmul.f32 %v941_v51, %v3114_v63  ;;  %v1004_v30 = vmul.f32 %v972_v43, %v3104_v38  ;;  %v908_v9 = vmul.f32 0.5, %v3104_v38 }
 0x233   :  { %v1007_v14 = vmul.f32 %v975_v36, %v3110_v7  ;;  %v809_v11 = vpop.f32.mrb[9].mxu0  ;;  %v1038_v19 = vadd.f32 %v1006_v42, %v3100_v37  ;;  %v3132_v2 = vadd.f32 %v2172_v27, %v3073_v17 }
 0x234   :  { %v3127_v28 = vadd.f32 %v3073_v17, %v809_v11  ;;  %v2173_v3 = vpop.f32.mrb[10].mxu0  ;;  %v1005_v24 = vmul.f32 %v973_v8, %v3114_v63  ;;  %v1036_v56 = vadd.f32 %v1004_v30, %v3104_v38  ;;  %v910_v30 = vmul.f32 0.5, %v3100_v37 }
 0x235   :  { %v812_v20 = vpop.f32.mrb[11].mxu0  ;;  %v1039_v45 = vadd.f32 %v1007_v14, %v3110_v7  ;;  %v1070_v39 = vmul.f32 0.7978846, %v1038_v19  ;;  %v3142_v41 = vadd.f32 %v2173_v3, %v3073_v17  ;;  %v946_v52 = vmul.f32 0.044715, %v3132_v2 }
 0x236   :  { %v944_v1 = vmul.f32 0.044715, %v3127_v28  ;;  %v3137_v26 = vadd.f32 %v3073_v17, %v812_v20  ;;  %v1037_v40 = vadd.f32 %v1005_v24, %v3114_v63  ;;  %v1068_v18 = vmul.f32 0.7978846, %v1036_v56 }
 0x237   :  { %v1071_v47 = vmul.f32 0.7978846, %v1039_v45  ;;  %2341 = vtanh.f32 %v1070_v39  ;;  %v947_v32 = vmul.f32 0.044715, %v3142_v41  ;;  %v978_v55 = vmul.f32 %v946_v52, %v3132_v2 }
 0x238   :  { %v976_v25 = vmul.f32 %v944_v1, %v3127_v28  ;;  %v945_v34 = vmul.f32 0.044715, %v3137_v26  ;;  %v1069_v35 = vmul.f32 0.7978846, %v1037_v40  ;;  %v909_v14 = vmul.f32 0.5, %v3114_v63 }
 0x239   :  { %v2334_v54 = vpop.eup %2333  ;;  %2343 = vtanh.f32 %v1071_v47  ;;  %v979_v42 = vmul.f32 %v947_v32, %v3142_v41  ;;  %v1010_v47 = vmul.f32 %v978_v55, %v3132_v2  ;;  %v911_v37 = vmul.f32 0.5, %v3110_v7 }
 0x23a   :  { %v2336_v0 = vpop.eup %2335  ;;  %v977_v4 = vmul.f32 %v945_v34, %v3137_v26  ;;  %v2176_v61 = vpop.f32.mrb[12].mxu0  ;;  %v1130_v53 = vadd.f32 1.0, %v2334_v54  ;;  %2345 = vtanh.f32 %v1068_v18  ;;  %v1008_v31 = vmul.f32 %v976_v25, %v3127_v28 }
 0x23b   :  { %v2338_v6 = vpop.eup %2337  ;;  %v825_v46 = vpop.f32.mrb[13].mxu0  ;;  %v1128_v22 = vadd.f32 1.0, %v2336_v0  ;;  %2347 = vtanh.f32 %v1069_v35  ;;  %v3158_v23 = vadd.f32 %v2176_v61, %v3073_v17  ;;  %v1011_v25 = vmul.f32 %v979_v42, %v3142_v41 }
 0x23c   :  { %v2340_v48 = vpop.eup %2339  ;;  %v1009_v50 = vmul.f32 %v977_v4, %v3137_v26  ;;  %v3155_v29 = vadd.f32 %v3073_v17, %v825_v46  ;;  %v2177_v57 = vpop.f32.mrb[14].mxu0  ;;  %v1131_v62 = vadd.f32 1.0, %v2338_v6  ;;  %v1162_v5 = vmul.f32 %v1130_v53, %v906_v44 }
 0x23d   :  { %v828_v59 = vpop.f32.mrb[15].mxu0  ;;  %v1129_v60 = vadd.f32 1.0, %v2340_v48  ;;  %v1160_v12 = vmul.f32 %v1128_v22, %v904_v49  ;;  %v1040_v13 = vadd.f32 %v1008_v31, %v3127_v28  ;;  %v950_v43 = vmul.f32 0.044715, %v3158_v23 }
 0x23e   :  { %v3164_v10 = vadd.f32 %v3073_v17, %v828_v59  ;;  %v1163_v21 = vmul.f32 %v1131_v62, %v907_v58  ;;  %v948_v15 = vmul.f32 0.044715, %v3155_v29  ;;  %v1041_v38 = vadd.f32 %v1009_v50, %v3137_v26 }
 0x23f   :  { %v1161_v51 = vmul.f32 %v1129_v60, %v905_v33  ;;  %v1072_v11 = vmul.f32 0.7978846, %v1040_v13  ;;  %v3174_v19 = vadd.f32 %v2177_v57, %v3073_v17  ;;  %v982_v54 = vmul.f32 %v950_v43, %v3158_v23 }
 0x240   :  { %v949_v16 = vmul.f32 0.044715, %v3164_v10  ;;  %v1225_v36 = vpack.c.bf16 %v1163_v21, %v1162_v5  ;;  %v1073_v20 = vmul.f32 0.7978846, %v1041_v38  ;;  %v980_v39 = vmul.f32 %v948_v15, %v3155_v29 }
 0x241   :  { %v2342_v27 = vpop.eup %2341  ;;  %v1224_v8 = vpack.c.bf16 %v1161_v51, %v1160_v12  ;;  %2349 = vtanh.f32 %v1072_v11  ;;  %v951_v52 = vmul.f32 0.044715, %v3174_v19  ;;  %v912_v31 = vmul.f32 0.5, %v3127_v28 }
 0x242   :  { %v2180_v3 = vpop.f32.mrb[16].mxu0  ;;  %v1134_v24 = vadd.f32 1.0, %v2342_v27  ;;  %v981_v1 = vmul.f32 %v949_v16, %v3164_v10  ;;  %2351 = vtanh.f32 %v1073_v20  ;;  %v1012_v6 = vmul.f32 %v980_v39, %v3155_v29 }
 0x243   :  { %v2344_v45 = vpop.eup %2343  ;;  %v3180_v56 = vadd.f32 %v2180_v3, %v3073_v17  ;;  %v841_v40 = vpop.f32.mrb[17].mxu0  ;;  %2210 = vmatprep.mubr.bf16.mxu0 %v1224_v8  ;;  %v1042_v62 = vadd.f32 %v1010_v47, %v3132_v2  ;;  %v1043_v59 = vadd.f32 %v1011_v25, %v3142_v41  ;;  %v1014_v33 = vmul.f32 %v982_v54, %v3158_v23 }
 0x244   :  { %v2346_v63 = vpop.eup %2345  ;;  %v2181_v34 = vpop.f32.mrb[18].mxu0  ;;  %2211 = vmatmul.mubr.bf16.vlgmr.msra.gmra.mrb[32].mxu0 %v1225_v36  ;;  %v1135_v18 = vadd.f32 1.0, %v2344_v45  ;;  %v3187_v44 = vadd.f32 %v3073_v17, %v841_v40  ;;  %v1166_v61 = vmul.f32 %v1134_v24, %v910_v30  ;;  %v1013_v58 = vmul.f32 %v981_v1, %v3164_v10 }
 0x245   :  { %v2348_v35 = vpop.eup %2347  ;;  %v844_v49 = vpop.f32.mrb[19].mxu0  ;;  %v1132_v0 = vadd.f32 1.0, %v2346_v63  ;;  %v954_v7 = vmul.f32 0.044715, %v3180_v56  ;;  %v3199_v57 = vadd.f32 %v2181_v34, %v3073_v17  ;;  %v983_v60 = vmul.f32 %v951_v52, %v3174_v19 }
 0x246   :  { %v1133_v4 = vadd.f32 1.0, %v2348_v35  ;;  %v1167_v53 = vmul.f32 %v1135_v18, %v911_v37  ;;  %v3195_v46 = vadd.f32 %v3073_v17, %v844_v49  ;;  %v952_v50 = vmul.f32 0.044715, %v3187_v44 }
 0x247   :  { %v1164_v22 = vmul.f32 %v1132_v0, %v908_v9  ;;  %v913_v5 = vmul.f32 0.5, %v3137_v26  ;;  %v3210_v15 = vmul.f32 0.5, %v3132_v2  ;;  %v1074_v12 = vmul.f32 0.7978846, %v1042_v62 }
 0x248   :  { %v1165_v48 = vmul.f32 %v1133_v4, %v909_v14  ;;  %v1227_v32 = vpack.c.bf16 %v1167_v53, %v1166_v61  ;;  %v1075_v51 = vmul.f32 0.7978846, %v1043_v59  ;;  %v986_v13 = vmul.f32 %v954_v7, %v3180_v56 }
 0x249   :  { %v953_v42 = vmul.f32 0.044715, %v3195_v46  ;;  %v1044_v26 = vadd.f32 %v1012_v6, %v3155_v29  ;;  %v984_v27 = vmul.f32 %v952_v50, %v3187_v44  ;;  %v955_v43 = vmul.f32 0.044715, %v3199_v57 }
 0x24a   :  { %v2184_v28 = vpop.f32.mrb[20].mxu0  ;;  %v1226_v55 = vpack.c.bf16 %v1165_v48, %v1164_v22  ;;  %2353 = vtanh.f32 %v1074_v12  ;;  %v1045_v8 = vadd.f32 %v1013_v58, %v3164_v10  ;;  %v915_v3 = vmul.f32 0.5, %v3142_v41 }
 0x24b   :  { %v3207_v9 = vadd.f32 %v2184_v28, %v3073_v17  ;;  %v857_v21 = vpop.f32.mrb[21].mxu0  ;;  %v2350_v38 = vpop.eup %2349  ;;  %2355 = vtanh.f32 %v1075_v51  ;;  %v1015_v24 = vmul.f32 %v983_v60, %v3174_v19  ;;  %v1076_v45 = vmul.f32 0.7978846, %v1044_v26 }
 0x24c   :  { %v3215_v16 = vadd.f32 %v3073_v17, %v857_v21  ;;  %2214 = vmatprep.mubr.bf16.mxu1 %v1226_v55  ;;  %v2185_v36 = vpop.f32.mrb[22].mxu0  ;;  %v1136_v11 = vadd.f32 1.0, %v2350_v38  ;;  %v2352_v30 = vpop.eup %2351  ;;  %v1077_v39 = vmul.f32 0.7978846, %v1045_v8  ;;  %v3228_v1 = vmul.f32 %v986_v13, %v3180_v56 }
 0x24d   :  { %2215 = vmatmul.mubr.bf16.vlgmr.msra.gmra.mrb[0].mxu1 %v1227_v32  ;;  %v860_v2 = vpop.f32.mrb[23].mxu0  ;;  %v3222_v14 = vadd.f32 %v2185_v36, %v3073_v17  ;;  %v958_v20 = vmul.f32 0.044715, %v3207_v9  ;;  %v985_v40 = vmul.f32 %v953_v42, %v3195_v46  ;;  %v1137_v47 = vadd.f32 1.0, %v2352_v30 }
 0x24e   :  { %v956_v63 = vmul.f32 0.044715, %v3215_v16  ;;  %v1016_v25 = vmul.f32 %v984_v27, %v3187_v44  ;;  %v987_v41 = vmul.f32 %v955_v43, %v3199_v57  ;;  %v3235_v34 = vadd.f32 %v3073_v17, %v860_v2 }
 0x24f   :  { %2357 = vtanh.f32 %v1076_v45  ;;  %v959_v37 = vmul.f32 0.044715, %v3222_v14  ;;  %v1168_v35 = vmul.f32 %v1136_v11, %v912_v31  ;;  %v1169_v54 = vmul.f32 %v1137_v47, %v913_v5 }
 0x250   :  { %2359 = vtanh.f32 %v1077_v39  ;;  %v990_v49 = vmul.f32 %v958_v20, %v3207_v9  ;;  %v916_v4 = vmul.f32 0.5, %v3155_v29  ;;  %v1046_v61 = vadd.f32 %v1014_v33, %v3158_v23 }
 0x251   :  { %v1017_v53 = vmul.f32 %v985_v40, %v3195_v46  ;;  %v988_v6 = vmul.f32 %v956_v63, %v3215_v16  ;;  %v1228_v58 = vpack.c.bf16 %v1169_v54, %v1168_v35  ;;  %v1047_v31 = vadd.f32 %v1015_v24, %v3174_v19 }
 0x252   :  { %v2188_v18 = vpop.f32.mrb[24].mxu0  ;;  %v957_v22 = vmul.f32 0.044715, %v3235_v34  ;;  %v1078_v29 = vmul.f32 0.7978846, %v1046_v61  ;;  %v1019_v62 = vmul.f32 %v987_v41, %v3199_v57  ;;  %v991_v59 = vmul.f32 %v959_v37, %v3222_v14 }
 0x253   :  { %v3240_v0 = vadd.f32 %v2188_v18, %v3073_v17  ;;  %v873_v52 = vpop.f32.mrb[25].mxu0  ;;  %2218 = vmatprep.mubr.bf16.mxu1 %v1228_v58  ;;  %v917_v33 = vmul.f32 0.5, %v3164_v10  ;;  %v1079_v60 = vmul.f32 0.7978846, %v1047_v31  ;;  %v3258_v55 = vmul.f32 %v990_v49, %v3207_v9 }
 0x254   :  { %v2189_v7 = vpop.f32.mrb[26].mxu0  ;;  %v3249_v48 = vadd.f32 %v3073_v17, %v873_v52  ;;  %v2354_v28 = vpop.eup %2353  ;;  %v3261_v5 = vmul.f32 0.5, %v3158_v23  ;;  %2361 = vtanh.f32 %v1078_v29  ;;  %v1048_v21 = vadd.f32 %v1016_v25, %v3187_v44 }
 0x255   :  { %v3252_v32 = vadd.f32 %v2189_v7, %v3073_v17  ;;  %v876_v50 = vpop.f32.mrb[27].mxu0  ;;  %v2356_v12 = vpop.eup %2355  ;;  %v3265_v51 = vmul.f32 %v988_v6, %v3215_v16  ;;  %v962_v13 = vmul.f32 0.044715, %v3240_v0  ;;  %v1138_v42 = vadd.f32 1.0, %v2354_v28 }
 0x256   :  { %2363 = vtanh.f32 %v1079_v60  ;;  %v989_v10 = vmul.f32 %v957_v22, %v3235_v34  ;;  %v960_v36 = vmul.f32 0.044715, %v3249_v48  ;;  %v1139_v26 = vadd.f32 1.0, %v2356_v12 }
 0x257   :  { %v1049_v38 = vadd.f32 %v1017_v53, %v3195_v46  ;;  %v1023_v23 = vmul.f32 %v991_v59, %v3222_v14  ;;  %v963_v27 = vmul.f32 0.044715, %v3252_v32  ;;  %v3274_v43 = vadd.f32 %v3073_v17, %v876_v50 }
 0x258   :  { %v1080_v8 = vmul.f32 0.7978846, %v1048_v21  ;;  %v1170_v30 = vmul.f32 %v1138_v42, %v3210_v15  ;;  %v1171_v24 = vmul.f32 %v1139_v26, %v915_v3  ;;  %v994_v63 = vmul.f32 %v962_v13, %v3240_v0 }
 0x259   :  { %v2358_v11 = vpop.eup %2357  ;;  %v1081_v39 = vmul.f32 0.7978846, %v1049_v38  ;;  %v992_v37 = vmul.f32 %v960_v36, %v3249_v48  ;;  %v961_v54 = vmul.f32 0.044715, %v3274_v43  ;;  %v919_v49 = vmul.f32 0.5, %v3174_v19 }
 0x25a   :  { %v2192_v2 = vpop.f32.mrb[28].mxu0  ;;  %v2360_v40 = vpop.eup %2359  ;;  %v1140_v25 = vadd.f32 1.0, %v2358_v11  ;;  %2365 = vtanh.f32 %v1080_v8  ;;  %v1229_v18 = vpack.c.bf16 %v1171_v24, %v1170_v30  ;;  %v1021_v61 = vmul.f32 %v989_v10, %v3235_v34 }
 0x25b   :  { %v3278_v20 = vadd.f32 %v2192_v2, %v3073_v17  ;;  %v889_v45 = vpop.f32.mrb[29].mxu0  ;;  %v1141_v35 = vadd.f32 1.0, %v2360_v40  ;;  %2367 = vtanh.f32 %v1081_v39  ;;  %v995_v53 = vmul.f32 %v963_v27, %v3252_v32 }
 0x25c   :  { %v3282_v47 = vadd.f32 %v3073_v17, %v889_v45  ;;  %v2193_v41 = vpop.f32.mrb[30].mxu0  ;;  %2219 = vmatmul.mubr.bf16.gmra.mrb[4].mxu1 %v1229_v18  ;;  %v1172_v6 = vmul.f32 %v1140_v25, %v916_v4  ;;  %v920_v31 = vmul.f32 0.5, %v3187_v44  ;;  %v921_v22 = vmul.f32 0.5, %v3195_v46 }
 0x25d   :  { %v3286_v15 = vadd.f32 %v2193_v41, %v3073_v17  ;;  %v892_v3 = vpop.f32.mrb[31].mxu0  ;;  %v1173_v58 = vmul.f32 %v1141_v35, %v917_v33  ;;  %v1050_v19 = vadd.f32 %v3228_v1, %v3180_v56  ;;  %v1024_v29 = vmul.f32 %v992_v37, %v3249_v48 }
 0x25e   :  { %v3291_v52 = vadd.f32 %v3073_v17, %v892_v3  ;;  %v964_v7 = vmul.f32 0.044715, %v3282_v47  ;;  %v2362_v50 = vpop.eup %2361  ;;  %v1026_v17 = vmul.f32 %v994_v63, %v3240_v0  ;;  %v1051_v60 = vadd.f32 %v1019_v62, %v3199_v57 }
 0x25f   :  { %v1230_v59 = vpack.c.bf16 %v1173_v58, %v1172_v6  ;;  %v993_v4 = vmul.f32 %v961_v54, %v3274_v43  ;;  %v1142_v33 = vadd.f32 1.0, %v2362_v50  ;;  %v1082_v44 = vmul.f32 0.7978846, %v1050_v19 }
 0x260   :  { %v2364_v28 = vpop.eup %2363  ;;  %v965_v21 = vmul.f32 0.044715, %v3291_v52  ;;  %v1027_v46 = vmul.f32 %v995_v53, %v3252_v32  ;;  %v966_v12 = vmul.f32 0.044715, %v3278_v20  ;;  %v1083_v13 = vmul.f32 0.7978846, %v1051_v60 }
 0x261   :  { %2222 = vmatprep.mubr.bf16.mxu1 %v1230_v59  ;;  %v1143_v1 = vadd.f32 1.0, %v2364_v28  ;;  %v996_v42 = vmul.f32 %v964_v7, %v3282_v47  ;;  %v967_v10 = vmul.f32 0.044715, %v3286_v15  ;;  %v1174_v62 = vmul.f32 %v1142_v33, %v3261_v5 }
 0x262   :  { %2369 = vtanh.f32 %v1082_v44  ;;  %v1052_v26 = vadd.f32 %v3265_v51, %v3215_v16  ;;  %v1053_v38 = vadd.f32 %v1021_v61, %v3235_v34  ;;  %v1025_v2 = vmul.f32 %v993_v4, %v3274_v43 }
 0x263   :  { %v1175_v36 = vmul.f32 %v1143_v1, %v919_v49  ;;  %2371 = vtanh.f32 %v1083_v13  ;;  %v997_v8 = vmul.f32 %v965_v21, %v3291_v52  ;;  %v1054_v11 = vadd.f32 %v3258_v55, %v3207_v9 }
 0x264   :  { %v2366_v27 = vpop.eup %2365  ;;  %v1055_v30 = vadd.f32 %v1023_v23, %v3222_v14  ;;  %v1084_v45 = vmul.f32 0.7978846, %v1052_v26  ;;  %v1085_v39 = vmul.f32 0.7978846, %v1053_v38  ;;  %v998_v63 = vmul.f32 %v966_v12, %v3278_v20 }
 0x265   :  { %v1231_v24 = vpack.c.bf16 %v1175_v36, %v1174_v62  ;;  %v1144_v5 = vadd.f32 1.0, %v2366_v27  ;;  %v2368_v40 = vpop.eup %2367  ;;  %v999_v51 = vmul.f32 %v967_v10, %v3286_v15  ;;  %v1086_v25 = vmul.f32 0.7978846, %v1054_v11 }
 0x266   :  { %v1087_v41 = vmul.f32 0.7978846, %v1055_v30  ;;  %v1028_v37 = vmul.f32 %v996_v42, %v3282_v47  ;;  %v1145_v18 = vadd.f32 1.0, %v2368_v40  ;;  %2373 = vtanh.f32 %v1084_v45 }
 0x267   :  { %2223 = vmatmul.mubr.bf16.gmra.mrb[8].mxu1 %v1231_v24  ;;  %v1056_v55 = vadd.f32 %v1024_v29, %v3249_v48  ;;  %v1029_v23 = vmul.f32 %v997_v8, %v3291_v52  ;;  %v1176_v35 = vmul.f32 %v1144_v5, %v920_v31  ;;  %2375 = vtanh.f32 %v1085_v39 }
 0x268   :  { %v1057_v3 = vadd.f32 %v1025_v2, %v3274_v43  ;;  %v1177_v54 = vmul.f32 %v1145_v18, %v921_v22  ;;  %2377 = vtanh.f32 %v1086_v25  ;;  %v1058_v61 = vadd.f32 %v1026_v17, %v3240_v0 }
 0x269   :  { %v1088_v49 = vmul.f32 0.7978846, %v1056_v55  ;;  %v1030_v53 = vmul.f32 %v998_v63, %v3278_v20  ;;  %2379 = vtanh.f32 %v1087_v41  ;;  %v1059_v58 = vadd.f32 %v1027_v46, %v3252_v32 }
 0x26a   :  { %v1089_v6 = vmul.f32 0.7978846, %v1057_v3  ;;  %v1031_v7 = vmul.f32 %v999_v51, %v3286_v15  ;;  %v1232_v19 = vpack.c.bf16 %v1177_v54, %v1176_v35  ;;  %v1090_v50 = vmul.f32 0.7978846, %v1058_v61 }
 0x26b   :  { %2381 = vtanh.f32 %v1088_v49  ;;  %v1091_v29 = vmul.f32 0.7978846, %v1059_v58  ;;  %v1060_v22 = vadd.f32 %v1028_v37, %v3282_v47  ;;  %v1061_v59 = vadd.f32 %v1029_v23, %v3291_v52 }
 0x26c   :  { %v2370_v31 = vpop.eup %2369  ;;  %2383 = vtanh.f32 %v1089_v6  ;;  %2226 = vmatprep.mubr.bf16.mxu1 %v1232_v19  ;;  %v922_v17 = vmul.f32 0.5, %v3180_v56  ;;  %v923_v28 = vmul.f32 0.5, %v3199_v57  ;;  %v1062_v46 = vadd.f32 %v1030_v53, %v3278_v20 }
 0x26d   :  { %v2372_v60 = vpop.eup %2371  ;;  %v1146_v4 = vadd.f32 1.0, %v2370_v31  ;;  %2385 = vtanh.f32 %v1090_v50  ;;  %v1092_v21 = vmul.f32 0.7978846, %v1060_v22  ;;  %v1093_v44 = vmul.f32 0.7978846, %v1061_v59 }
 0x26e   :  { %v1147_v33 = vadd.f32 1.0, %v2372_v60  ;;  %2387 = vtanh.f32 %v1091_v29  ;;  %v1063_v12 = vadd.f32 %v1031_v7, %v3286_v15  ;;  %v1094_v10 = vmul.f32 0.7978846, %v1062_v46 }
 0x26f   :  { %v1178_v1 = vmul.f32 %v1146_v4, %v922_v17  ;;  %2389 = vtanh.f32 %v1092_v21  ;;  %v924_v38 = vmul.f32 0.5, %v3215_v16  ;;  %v925_v27 = vmul.f32 0.5, %v3235_v34 }
 0x270   :  { %v1179_v13 = vmul.f32 %v1147_v33, %v923_v28  ;;  %v2374_v42 = vpop.eup %2373  ;;  %2391 = vtanh.f32 %v1093_v44  ;;  %v1095_v62 = vmul.f32 0.7978846, %v1063_v12  ;;  %v926_v11 = vmul.f32 0.5, %v3207_v9 }
 0x271   :  { %v2376_v56 = vpop.eup %2375  ;;  %v1148_v57 = vadd.f32 1.0, %v2374_v42  ;;  %2393 = vtanh.f32 %v1094_v10  ;;  %v927_v39 = vmul.f32 0.5, %v3222_v14  ;;  %v928_v51 = vmul.f32 0.5, %v3249_v48  ;;  %v1193_v10 = vld [vmem:[#allocation3 + $0x8] sm:$0xff] }
 0x272   :  { %v1233_v36 = vpack.c.bf16 %v1179_v13, %v1178_v1  ;;  %v2378_v26 = vpop.eup %2377  ;;  %v1149_v2 = vadd.f32 1.0, %v2376_v56  ;;  %2395 = vtanh.f32 %v1095_v62  ;;  %v929_v16 = vmul.f32 0.5, %v3274_v43  ;;  %v1195_v1 = vld [vmem:[#allocation3 + $0x18] sm:$0xff] }
 0x273   :  { %v2380_v8 = vpop.eup %2379  ;;  %v1150_v30 = vadd.f32 1.0, %v2378_v26  ;;  %v1180_v5 = vmul.f32 %v1148_v57, %v924_v38  ;;  %v930_v23 = vmul.f32 0.5, %v3240_v0  ;;  %v931_v35 = vmul.f32 0.5, %v3252_v32  ;;  %v2101_v57 = vld [vmem:[%s3591_s0 + $0x8] sm:$0xff]   ;;  %v2023_v26 = vld [vmem:[%s3591_s0] sm:$0xff]   ;;  %v1198_v38 = vld [vmem:[#allocation3 + $0x30] sm:$0xff] }
 0x274   :  { %2227 = vmatmul.mubr.bf16.gmra.mrb[12].mxu1 %v1233_v36  ;;  %v1181_v45 = vmul.f32 %v1149_v2, %v925_v27  ;;  %v1151_v40 = vadd.f32 1.0, %v2380_v8  ;;  %v932_v19 = vmul.f32 0.5, %v3282_v47  ;;  %v933_v50 = vmul.f32 0.5, %v3291_v52  ;;  %v1194_v47 = vld [vmem:[#allocation3 + $0x10] sm:$0xff]  ;;  %v1192_v52 = vld [vmem:[#allocation3] sm:$0xff] }
 0x275   :  { %v2382_v24 = vpop.eup %2381  ;;  %v1182_v37 = vmul.f32 %v1150_v30, %v926_v11  ;;  %v934_v17 = vmul.f32 0.5, %v3278_v20  ;;  %v935_v28 = vmul.f32 0.5, %v3286_v15  ;;  %v3359_v27 = vld [vmem:[%s3597_s6] ss:$0 sm:$0xff]  ;;  %v2028_v8 = vunpack.c.l.bf16 %v2101_v57  ;;  %v1199_v30 = vld [vmem:[#allocation3 + $0x38] sm:$0xff] }
 0x276   :  { %v2384_v63 = vpop.eup %2383  ;;  %v1152_v34 = vadd.f32 1.0, %v2382_v24  ;;  %v1234_v41 = vpack.c.bf16 %v1181_v45, %v1180_v5  ;;  %v1183_v18 = vmul.f32 %v1151_v40, %v927_v39  ;;  %v1196_v2 = vld [vmem:[#allocation3 + $0x20] sm:$0xff]  ;;  %v2024_v5 = vunpack.c.l.bf16 %v2023_v26  ;;  %v1197_v40 = vld [vmem:[#allocation3 + $0x28] sm:$0xff] }
 0x277   :  { %v2386_v25 = vpop.eup %2385  ;;  %v1153_v55 = vadd.f32 1.0, %v2384_v63 }
 0x278   :  { %v2388_v9 = vpop.eup %2387  ;;  %v1154_v3 = vadd.f32 1.0, %v2386_v25  ;;  %2230 = vmatprep.mubr.bf16.mxu1 %v1234_v41  ;;  %v1235_v14 = vpack.c.bf16 %v1183_v18, %v1182_v37  ;;  %v1184_v54 = vmul.f32 %v1152_v34, %v928_v51  ;;  %v2025_v18 = vunpack.c.h.bf16 %v2023_v26 }
 0x279   :  { %v1185_v49 = vmul.f32 %v1153_v55, %v929_v16  ;;  %v1155_v61 = vadd.f32 1.0, %v2388_v9  ;;  %v2390_v48 = vpop.eup %2389  ;;  %v2029_v16 = vunpack.c.h.bf16 %v2101_v57 }
 0x27a   :  { %v2392_v53 = vpop.eup %2391  ;;  %v1186_v6 = vmul.f32 %v1154_v3, %v930_v23  ;;  %v1156_v7 = vadd.f32 1.0, %v2390_v48 }
 0x27b   :  { %v1236_v43 = vpack.c.bf16 %v1185_v49, %v1184_v54  ;;  %v1187_v58 = vmul.f32 %v1155_v61, %v931_v35  ;;  %v1157_v0 = vadd.f32 1.0, %v2392_v53  ;;  %v2394_v31 = vpop.eup %2393  ;;  %v2103_v53 = vld [vmem:[%s3591_s0 + $0x18] sm:$0xff]  }
 0x27c   :  { %2231 = vmatmul.mubr.bf16.gmra.mrb[16].mxu1 %v1235_v14  ;;  %v2396_v29 = vpop.eup %2395  ;;  %v1188_v22 = vmul.f32 %v1156_v7, %v932_v19  ;;  %v1158_v60 = vadd.f32 1.0, %v2394_v31 }
 0x27d   :  { %2234 = vmatprep.mubr.bf16.mxu1 %v1236_v43  ;;  %v1237_v32 = vpack.c.bf16 %v1187_v58, %v1186_v6  ;;  %v1189_v59 = vmul.f32 %v1157_v0, %v933_v50  ;;  %v1159_v4 = vadd.f32 1.0, %v2396_v29  ;;  %v2102_v58 = vld [vmem:[%s3591_s0 + $0x10] sm:$0xff]   ;;  %v2036_v50 = vunpack.c.l.bf16 %v2103_v53 }
 0x27e   :  { %v1190_v21 = vmul.f32 %v1158_v60, %v934_v17  ;;  %v2032_v31 = vunpack.c.l.bf16 %v2102_v58  ;;  %v2033_v17 = vunpack.c.h.bf16 %v2102_v58 }
 0x27f   :  { %v1238_v33 = vpack.c.bf16 %v1189_v59, %v1188_v22  ;;  %v1191_v44 = vmul.f32 %v1159_v4, %v935_v28  ;;  %v2037_v22 = vunpack.c.h.bf16 %v2103_v53 }
 0x281   :  { %v1239_v46 = vpack.c.bf16 %v1191_v44, %v1190_v21 }
 0x284   :  { %2235 = vmatmul.mubr.bf16.gmra.mrb[20].mxu1 %v1237_v32 }
 0x285   :  { %2238 = vmatprep.mubr.bf16.mxu1 %v1238_v33 }
 0x28c   :  { %2239 = vmatmul.mubr.bf16.gmra.mrb[24].mxu1 %v1239_v46 }
 0x317   :  { %v2212_v12 = vpop.f32.mrb[32].mxu0 }
 0x318   :  { %v1467_v13 = vadd.f32 %v2212_v12, %v1194_v47  ;;  %v1338_v42 = vpop.f32.mrb[33].mxu0 }
 0x319   :  { %v1465_v62 = vadd.f32 %v1338_v42, %v1192_v52  ;;  %v2213_v56 = vpop.f32.mrb[34].mxu0  ;;  %v1200_v42 = vld [vmem:[#allocation3 + $0x40] sm:$0xff] }
 0x31a   :  { %1499 = vst.msk [vmem:[#allocation3 + $0x10] sm:$0xff] %vm95_vm0, %v1467_v13  ;;  %v1468_v20 = vadd.f32 %v2213_v56, %v1195_v1  ;;  %v1341_v15 = vpop.f32.mrb[35].mxu0  ;;  %v1202_v1 = vld [vmem:[#allocation3 + $0x50] sm:$0xff]  ;;  %v1203_v56 = vld [vmem:[#allocation3 + $0x58] sm:$0xff] }
 0x31b   :  { %1497 = vst.msk [vmem:[#allocation3] sm:$0xff] %vm95_vm0, %v1465_v62  ;;  %v1466_v36 = vadd.f32 %v1341_v15, %v1193_v10 }
 0x31c   :  { %1500 = vst.msk [vmem:[#allocation3 + $0x18] sm:$0xff] %vm95_vm0, %v1468_v20 }
 0x31d   :  { %1498 = vst.msk [vmem:[#allocation3 + $0x8] sm:$0xff] %vm95_vm0, %v1466_v36  ;;  %v1201_v36 = vld [vmem:[#allocation3 + $0x48] sm:$0xff] }
 0x320   :  { %v2216_v11 = vpop.f32.mrb[0].mxu1 }
 0x321   :  { %v1534_v24 = vld [vmem:[#allocation3 + $0x10] sm:$0xff]  ;;  %v1471_v45 = vadd.f32 %v2216_v11, %v1198_v38  ;;  %v1354_v39 = vpop.f32.mrb[1].mxu1  ;;  %v2105_v11 = vld [vmem:[%s3591_s0 + $0x28] sm:$0xff]  }
 0x322   :  { %v1573_v63 = vadd.f32 %v3359_v27, %v1534_v24  ;;  %v1532_v51 = vld [vmem:[#allocation3] sm:$0xff]  ;;  %v1469_v34 = vadd.f32 %v1354_v39, %v1196_v2  ;;  %v2217_v25 = vpop.f32.mrb[2].mxu1  ;;  %v1206_v24 = vld [vmem:[#allocation3 + $0x70] sm:$0xff] }
 0x323   :  { %v1571_v41 = vadd.f32 %v3359_v27, %v1532_v51  ;;  %v1535_v37 = vld [vmem:[#allocation3 + $0x18] sm:$0xff]  ;;  %1503 = vst.msk [vmem:[#allocation3 + $0x30] sm:$0xff] %vm95_vm0, %v1471_v45  ;;  %v1472_v55 = vadd.f32 %v2217_v25, %v1199_v30  ;;  %v1357_v9 = vpop.f32.mrb[3].mxu1  ;;  %v2104_v30 = vld [vmem:[%s3591_s0 + $0x20] sm:$0xff]   ;;  %v2045_v25 = vunpack.c.h.bf16 %v2105_v11 }
 0x324   :  { %v1669_v23 = vadd.f32 %v2028_v8, %v1573_v63  ;;  %v1574_v35 = vadd.f32 %v3359_v27, %v1535_v37  ;;  %v1533_v3 = vld [vmem:[#allocation3 + $0x8] sm:$0xff]  ;;  %1501 = vst.msk [vmem:[#allocation3 + $0x20] sm:$0xff] %vm95_vm0, %v1469_v34  ;;  %v1470_v14 = vadd.f32 %v1357_v9, %v1197_v40  ;;  %v1204_v45 = vld [vmem:[#allocation3 + $0x60] sm:$0xff]  ;;  %v2040_v40 = vunpack.c.l.bf16 %v2104_v30  ;;  %v1207_v51 = vld [vmem:[#allocation3 + $0x78] sm:$0xff] }
 0x325   :  { %v1667_v54 = vadd.f32 %v2024_v5, %v1571_v41  ;;  %v1572_v49 = vadd.f32 %v3359_v27, %v1533_v3  ;;  %1504 = vst.msk [vmem:[#allocation3 + $0x38] sm:$0xff] %vm95_vm0, %v1472_v55  ;;  %v2044_v5 = vunpack.c.l.bf16 %v2105_v11 }
 0x326   :  { %v1928_v61 = vpack.c.bf16 %v1669_v23, %v1669_v23  ;;  %v1670_v48 = vadd.f32 %v2029_v16, %v1574_v35  ;;  %1502 = vst.msk [vmem:[#allocation3 + $0x28] sm:$0xff] %vm95_vm0, %v1470_v14  ;;  %v2041_v23 = vunpack.c.h.bf16 %v2104_v30 }
 0x327   :  { %v1926_v43 = vpack.c.bf16 %v1667_v54, %v1667_v54  ;;  %v1668_v6 = vadd.f32 %v2025_v18, %v1572_v49  ;;  %v1205_v18 = vld [vmem:[#allocation3 + $0x68] sm:$0xff] }
 0x328   :  { %1830 = vst.msk [vmem:[%s3598_s7 + $0x8] sm:$0xf] %vm1827_vm1, %v1928_v61  ;;  %v1929_v7 = vpack.c.bf16 %v1670_v48, %v1670_v48 }
 0x329   :  { %1828 = vst.msk [vmem:[%s3598_s7] sm:$0xf] %vm1827_vm1, %v1926_v43  ;;  %v1927_v19 = vpack.c.bf16 %v1668_v6, %v1668_v6 }
 0x32a   :  { %1831 = vst.msk [vmem:[%s3598_s7 + $0xc] sm:$0xf] %vm1827_vm1, %v1929_v7  ;;  %v1538_v0 = vld [vmem:[#allocation3 + $0x30] sm:$0xff] }
 0x32b   :  { %1829 = vst.msk [vmem:[%s3598_s7 + $0x4] sm:$0xf] %vm1827_vm1, %v1927_v19  ;;  %v1577_v32 = vadd.f32 %v3359_v27, %v1538_v0  ;;  %v1536_v29 = vld [vmem:[#allocation3 + $0x20] sm:$0xff]  ;;  %v2107_v0 = vld [vmem:[%s3591_s0 + $0x38] sm:$0xff]  }
 0x32c   :  { %v1575_v59 = vadd.f32 %v3359_v27, %v1536_v29  ;;  %v1539_v60 = vld [vmem:[#allocation3 + $0x38] sm:$0xff] }
 0x32d   :  { %v1673_v28 = vadd.f32 %v2036_v50, %v1577_v32  ;;  %v1578_v4 = vadd.f32 %v3359_v27, %v1539_v60  ;;  %v1537_v33 = vld [vmem:[#allocation3 + $0x28] sm:$0xff]  ;;  %v2106_v32 = vld [vmem:[%s3591_s0 + $0x30] sm:$0xff]  }
 0x32e   :  { %v1671_v21 = vadd.f32 %v2032_v31, %v1575_v59  ;;  %v1576_v44 = vadd.f32 %v3359_v27, %v1537_v33  ;;  %v2048_v60 = vunpack.c.l.bf16 %v2106_v32  ;;  %v1210_v33 = vld [vmem:[#allocation3 + $0x90] sm:$0xff] }
 0x32f   :  { %v1932_v46 = vpack.c.bf16 %v1673_v28, %v1673_v28  ;;  %v1674_v47 = vadd.f32 %v2037_v22, %v1578_v4  ;;  %v2220_v62 = vpop.f32.mrb[4].mxu1  ;;  %v2052_v22 = vunpack.c.l.bf16 %v2107_v0  ;;  %v2053_v4 = vunpack.c.h.bf16 %v2107_v0 }
 0x330   :  { %v1930_v52 = vpack.c.bf16 %v1671_v21, %v1671_v21  ;;  %v1672_v12 = vadd.f32 %v2033_v17, %v1576_v44  ;;  %v1475_v20 = vadd.f32 %v2220_v62, %v1202_v1  ;;  %v1370_v15 = vpop.f32.mrb[5].mxu1 }
 0x331   :  { %1834 = vst.msk [vmem:[%s3598_s7 + $0x18] sm:$0xf] %vm1827_vm1, %v1932_v46  ;;  %v1933_v13 = vpack.c.bf16 %v1674_v47, %v1674_v47  ;;  %v1473_v57 = vadd.f32 %v1370_v15, %v1200_v42  ;;  %v2221_v26 = vpop.f32.mrb[6].mxu1  ;;  %v2049_v46 = vunpack.c.h.bf16 %v2106_v32  ;;  %v1208_v47 = vld [vmem:[#allocation3 + $0x80] sm:$0xff]  ;;  %v1211_v42 = vld [vmem:[#allocation3 + $0x98] sm:$0xff]  ;;  %v1209_v15 = vld [vmem:[#allocation3 + $0x88] sm:$0xff] }
 0x332   :  { %1832 = vst.msk [vmem:[%s3598_s7 + $0x10] sm:$0xf] %vm1827_vm1, %v1930_v52  ;;  %v1931_v10 = vpack.c.bf16 %v1672_v12, %v1672_v12  ;;  %v1476_v38 = vadd.f32 %v2221_v26, %v1203_v56  ;;  %v1373_v2 = vpop.f32.mrb[7].mxu1  ;;  %v1218_v32 = vld [vmem:[#allocation3 + $0xd0] sm:$0xff] }
 0x333   :  { %1835 = vst.msk [vmem:[%s3598_s7 + $0x1c] sm:$0xf] %vm1827_vm1, %v1933_v13  ;;  %v1474_v8 = vadd.f32 %v1373_v2, %v1201_v36 }
 0x334   :  { %1833 = vst.msk [vmem:[%s3598_s7 + $0x14] sm:$0xf] %vm1827_vm1, %v1931_v10 }
 0x335   :  { %1507 = vst.msk [vmem:[#allocation3 + $0x50] sm:$0xff] %vm95_vm0, %v1475_v20  ;;  %1505 = vst.msk [vmem:[#allocation3 + $0x40] sm:$0xff] %vm95_vm0, %v1473_v57 }
 0x336   :  { %1508 = vst.msk [vmem:[#allocation3 + $0x58] sm:$0xff] %vm95_vm0, %v1476_v38  ;;  %1506 = vst.msk [vmem:[#allocation3 + $0x48] sm:$0xff] %vm95_vm0, %v1474_v8 }
 0x33a   :  { %v2224_v63 = vpop.f32.mrb[8].mxu1 }
 0x33b   :  { %v1479_v41 = vadd.f32 %v2224_v63, %v1206_v24  ;;  %v1386_v37 = vpop.f32.mrb[9].mxu1  ;;  %v2108_v63 = vld [vmem:[%s3591_s0 + $0x40] sm:$0xff]  }
 0x33c   :  { %v1542_v39 = vld [vmem:[#allocation3 + $0x50] sm:$0xff]  ;;  %v1540_v34 = vld [vmem:[#allocation3 + $0x40] sm:$0xff]  ;;  %v1477_v35 = vadd.f32 %v1386_v37, %v1204_v45  ;;  %v2225_v3 = vpop.f32.mrb[10].mxu1 }
 0x33d   :  { %v1581_v16 = vadd.f32 %v3359_v27, %v1542_v39  ;;  %v1579_v55 = vadd.f32 %v3359_v27, %v1540_v34  ;;  %v1543_v9 = vld [vmem:[#allocation3 + $0x58] sm:$0xff]  ;;  %v1541_v49 = vld [vmem:[#allocation3 + $0x48] sm:$0xff]  ;;  %1511 = vst.msk [vmem:[#allocation3 + $0x70] sm:$0xff] %vm95_vm0, %v1479_v41  ;;  %v1480_v61 = vadd.f32 %v2225_v3, %v1207_v51  ;;  %v1389_v48 = vpop.f32.mrb[11].mxu1  ;;  %v1212_v51 = vld [vmem:[#allocation3 + $0xa0] sm:$0xff] }
 0x33e   :  { %v1582_v54 = vadd.f32 %v3359_v27, %v1543_v9  ;;  %v1580_v43 = vadd.f32 %v3359_v27, %v1541_v49  ;;  %1509 = vst.msk [vmem:[#allocation3 + $0x60] sm:$0xff] %vm95_vm0, %v1477_v35  ;;  %v1478_v6 = vadd.f32 %v1389_v48, %v1205_v18  ;;  %v2109_v39 = vld [vmem:[%s3591_s0 + $0x48] sm:$0xff]   ;;  %v1215_v34 = vld [vmem:[#allocation3 + $0xb8] sm:$0xff]  ;;  %v2056_v9 = vunpack.c.l.bf16 %v2108_v63 }
 0x33f   :  { %v1677_v14 = vadd.f32 %v2044_v5, %v1581_v16  ;;  %v1675_v53 = vadd.f32 %v2040_v40, %v1579_v55  ;;  %1512 = vst.msk [vmem:[#allocation3 + $0x78] sm:$0xff] %vm95_vm0, %v1480_v61  ;;  %v1214_v40 = vld [vmem:[#allocation3 + $0xb0] sm:$0xff]  ;;  %v1213_v18 = vld [vmem:[#allocation3 + $0xa8] sm:$0xff] }
 0x340   :  { %v1678_v7 = vadd.f32 %v2045_v25, %v1582_v54  ;;  %v1676_v50 = vadd.f32 %v2041_v23, %v1580_v43  ;;  %1510 = vst.msk [vmem:[#allocation3 + $0x68] sm:$0xff] %vm95_vm0, %v1478_v6  ;;  %v2060_v25 = vunpack.c.l.bf16 %v2109_v39  ;;  %v2061_v54 = vunpack.c.h.bf16 %v2109_v39  ;;  %v1222_v39 = vld [vmem:[#allocation3 + $0xf0] sm:$0xff] }
 0x341   :  { %v1936_v58 = vpack.c.bf16 %v1677_v14, %v1677_v14  ;;  %v1934_v19 = vpack.c.bf16 %v1675_v53, %v1675_v53  ;;  %v2057_v43 = vunpack.c.h.bf16 %v2108_v63 }
 0x342   :  { %v1937_v31 = vpack.c.bf16 %v1678_v7, %v1678_v7  ;;  %v1935_v29 = vpack.c.bf16 %v1676_v50, %v1676_v50 }
 0x343   :  { %1838 = vst.msk [vmem:[%s3598_s7 + $0x28] sm:$0xf] %vm1827_vm1, %v1936_v58  ;;  %1836 = vst.msk [vmem:[%s3598_s7 + $0x20] sm:$0xf] %vm1827_vm1, %v1934_v19 }
 0x344   :  { %1839 = vst.msk [vmem:[%s3598_s7 + $0x2c] sm:$0xf] %vm1827_vm1, %v1937_v31  ;;  %1837 = vst.msk [vmem:[%s3598_s7 + $0x24] sm:$0xf] %vm1827_vm1, %v1935_v29  ;;  %v1546_v59 = vld [vmem:[#allocation3 + $0x70] sm:$0xff]  ;;  %v2111_v31 = vld [vmem:[%s3591_s0 + $0x58] sm:$0xff]  }
 0x345   :  { %v1585_v17 = vadd.f32 %v3359_v27, %v1546_v59  ;;  %v1544_v28 = vld [vmem:[#allocation3 + $0x60] sm:$0xff]  ;;  %v2110_v59 = vld [vmem:[%s3591_s0 + $0x50] sm:$0xff]  }
 0x346   :  { %v1583_v21 = vadd.f32 %v3359_v27, %v1544_v28  ;;  %v1547_v44 = vld [vmem:[#allocation3 + $0x78] sm:$0xff] }
 0x347   :  { %v1681_v52 = vadd.f32 %v2052_v22, %v1585_v17  ;;  %v1586_v12 = vadd.f32 %v3359_v27, %v1547_v44  ;;  %v1545_v1 = vld [vmem:[#allocation3 + $0x68] sm:$0xff]  ;;  %v2228_v13 = vpop.f32.mrb[12].mxu1  ;;  %v2068_v44 = vunpack.c.l.bf16 %v2111_v31 }
 0x348   :  { %v1679_v10 = vadd.f32 %v2048_v60, %v1583_v21  ;;  %v1584_v62 = vadd.f32 %v3359_v27, %v1545_v1  ;;  %v1483_v56 = vadd.f32 %v2228_v13, %v1210_v33  ;;  %v1402_v20 = vpop.f32.mrb[13].mxu1  ;;  %v1216_v60 = vld [vmem:[#allocation3 + $0xc0] sm:$0xff]  ;;  %v1219_v33 = vld [vmem:[#allocation3 + $0xd8] sm:$0xff]  ;;  %v2064_v13 = vunpack.c.l.bf16 %v2110_v59 }
 0x349   :  { %v1940_v36 = vpack.c.bf16 %v1681_v52, %v1681_v52  ;;  %v1682_v57 = vadd.f32 %v2053_v4, %v1586_v12  ;;  %v1481_v26 = vadd.f32 %v1402_v20, %v1208_v47  ;;  %v2229_v38 = vpop.f32.mrb[14].mxu1  ;;  %v1217_v52 = vld [vmem:[#allocation3 + $0xc8] sm:$0xff]  ;;  %v2069_v20 = vunpack.c.h.bf16 %v2111_v31 }
 0x34a   :  { %v1938_v2 = vpack.c.bf16 %v1679_v10, %v1679_v10  ;;  %v1680_v8 = vadd.f32 %v2049_v46, %v1584_v62  ;;  %1515 = vst.msk [vmem:[#allocation3 + $0x90] sm:$0xff] %vm95_vm0, %v1483_v56  ;;  %v1484_v11 = vadd.f32 %v2229_v38, %v1211_v42  ;;  %v1405_v30 = vpop.f32.mrb[15].mxu1  ;;  %v2065_v38 = vunpack.c.h.bf16 %v2110_v59 }
 0x34b   :  { %1842 = vst.msk [vmem:[%s3598_s7 + $0x38] sm:$0xf] %vm1827_vm1, %v1940_v36  ;;  %v1941_v24 = vpack.c.bf16 %v1682_v57, %v1682_v57  ;;  %v1482_v5 = vadd.f32 %v1405_v30, %v1209_v15 }
 0x34c   :  { %1513 = vst.msk [vmem:[#allocation3 + $0x80] sm:$0xff] %vm95_vm0, %v1481_v26  ;;  %v1939_v45 = vpack.c.bf16 %v1680_v8, %v1680_v8  ;;  %1516 = vst.msk [vmem:[#allocation3 + $0x98] sm:$0xff] %vm95_vm0, %v1484_v11 }
 0x34d   :  { %1840 = vst.msk [vmem:[%s3598_s7 + $0x30] sm:$0xf] %vm1827_vm1, %v1938_v2  ;;  %1843 = vst.msk [vmem:[%s3598_s7 + $0x3c] sm:$0xf] %vm1827_vm1, %v1941_v24 }
 0x34e   :  { %1514 = vst.msk [vmem:[#allocation3 + $0x88] sm:$0xff] %vm95_vm0, %v1482_v5 }
 0x34f   :  { %1841 = vst.msk [vmem:[%s3598_s7 + $0x34] sm:$0xf] %vm1827_vm1, %v1939_v45  ;;  %v2232_v16 = vpop.f32.mrb[16].mxu1  ;;  %v2113_v45 = vld [vmem:[%s3591_s0 + $0x68] sm:$0xff]  }
 0x350   :  { %v1487_v41 = vadd.f32 %v2232_v16, %v1214_v40  ;;  %v1418_v37 = vpop.f32.mrb[17].mxu1  ;;  %v1220_v16 = vld [vmem:[#allocation3 + $0xe0] sm:$0xff] }
 0x351   :  { %v1550_v55 = vld [vmem:[#allocation3 + $0x90] sm:$0xff]  ;;  %v1485_v23 = vadd.f32 %v1418_v37, %v1212_v51  ;;  %v2233_v35 = vpop.f32.mrb[18].mxu1  ;;  %v2112_v51 = vld [vmem:[%s3591_s0 + $0x60] sm:$0xff]   ;;  %v1223_v37 = vld [vmem:[#allocation3 + $0xf8] sm:$0xff] }
 0x352   :  { %v1589_v3 = vadd.f32 %v3359_v27, %v1550_v55  ;;  %1519 = vst.msk [vmem:[#allocation3 + $0xb0] sm:$0xff] %vm95_vm0, %v1487_v41  ;;  %v1488_v49 = vadd.f32 %v2233_v35, %v1215_v34  ;;  %v1421_v61 = vpop.f32.mrb[19].mxu1  ;;  %v2076_v55 = vunpack.c.l.bf16 %v2113_v45  ;;  %v1221_v35 = vld [vmem:[#allocation3 + $0xe8] sm:$0xff] }
 0x353   :  { %v1548_v14 = vld [vmem:[#allocation3 + $0x80] sm:$0xff]  ;;  %v1551_v53 = vld [vmem:[#allocation3 + $0x98] sm:$0xff]  ;;  %1517 = vst.msk [vmem:[#allocation3 + $0xa0] sm:$0xff] %vm95_vm0, %v1485_v23  ;;  %v1486_v6 = vadd.f32 %v1421_v61, %v1213_v18 }
 0x354   :  { %v1587_v48 = vadd.f32 %v3359_v27, %v1548_v14  ;;  %v1685_v58 = vadd.f32 %v2060_v25, %v1589_v3  ;;  %v1590_v7 = vadd.f32 %v3359_v27, %v1551_v53  ;;  %1520 = vst.msk [vmem:[#allocation3 + $0xb8] sm:$0xff] %vm95_vm0, %v1488_v49 }
 0x355   :  { %v1549_v19 = vld [vmem:[#allocation3 + $0x88] sm:$0xff]  ;;  %1518 = vst.msk [vmem:[#allocation3 + $0xa8] sm:$0xff] %vm95_vm0, %v1486_v6 }
 0x356   :  { %v1683_v50 = vadd.f32 %v2056_v9, %v1587_v48  ;;  %v1588_v0 = vadd.f32 %v3359_v27, %v1549_v19  ;;  %v1944_v29 = vpack.c.bf16 %v1685_v58, %v1685_v58  ;;  %v1686_v22 = vadd.f32 %v2061_v54, %v1590_v7 }
 0x357   :  { %v2236_v4 = vpop.f32.mrb[20].mxu1  ;;  %v2072_v54 = vunpack.c.l.bf16 %v2112_v51 }
 0x358   :  { %v1942_v17 = vpack.c.bf16 %v1683_v50, %v1683_v50  ;;  %v1684_v28 = vadd.f32 %v2057_v43, %v1588_v0  ;;  %1846 = vst.msk [vmem:[%s3598_s7 + $0x48] sm:$0xf] %vm1827_vm1, %v1944_v29  ;;  %v1945_v21 = vpack.c.bf16 %v1686_v22, %v1686_v22  ;;  %v1491_v46 = vadd.f32 %v2236_v4, %v1218_v32  ;;  %v1434_v47 = vpop.f32.mrb[21].mxu1  ;;  %v2114_v4 = vld [vmem:[%s3591_s0 + $0x70] sm:$0xff]  }
 0x359   :  { %v1554_v1 = vld [vmem:[#allocation3 + $0xb0] sm:$0xff]  ;;  %v1489_v42 = vadd.f32 %v1434_v47, %v1216_v60  ;;  %v2237_v10 = vpop.f32.mrb[22].mxu1  ;;  %v2077_v43 = vunpack.c.h.bf16 %v2113_v45  ;;  %v2073_v50 = vunpack.c.h.bf16 %v2112_v51  ;;  %v2115_v60 = vld [vmem:[%s3591_s0 + $0x78] sm:$0xff]  }
 0x35a   :  { %1844 = vst.msk [vmem:[%s3598_s7 + $0x40] sm:$0xf] %vm1827_vm1, %v1942_v17  ;;  %v1943_v12 = vpack.c.bf16 %v1684_v28, %v1684_v28  ;;  %1847 = vst.msk [vmem:[%s3598_s7 + $0x4c] sm:$0xf] %vm1827_vm1, %v1945_v21  ;;  %v1593_v62 = vadd.f32 %v3359_v27, %v1554_v1  ;;  %v1552_v56 = vld [vmem:[#allocation3 + $0xa0] sm:$0xff]  ;;  %v1492_v15 = vadd.f32 %v2237_v10, %v1219_v33  ;;  %v1437_v36 = vpop.f32.mrb[23].mxu1 }
 0x35b   :  { %1523 = vst.msk [vmem:[#allocation3 + $0xd0] sm:$0xff] %vm95_vm0, %v1491_v46  ;;  %v1591_v57 = vadd.f32 %v3359_v27, %v1552_v56  ;;  %v1555_v26 = vld [vmem:[#allocation3 + $0xb8] sm:$0xff]  ;;  %1521 = vst.msk [vmem:[#allocation3 + $0xc0] sm:$0xff] %vm95_vm0, %v1489_v42  ;;  %v1490_v2 = vadd.f32 %v1437_v36, %v1217_v52  ;;  %v2084_v46 = vunpack.c.l.bf16 %v2115_v60  ;;  %v2085_v42 = vunpack.c.h.bf16 %v2115_v60 }
 0x35c   :  { %1845 = vst.msk [vmem:[%s3598_s7 + $0x44] sm:$0xf] %vm1827_vm1, %v1943_v12  ;;  %v1689_v8 = vadd.f32 %v2068_v44, %v1593_v62  ;;  %v1594_v11 = vadd.f32 %v3359_v27, %v1555_v26  ;;  %v1553_v30 = vld [vmem:[#allocation3 + $0xa8] sm:$0xff]  ;;  %v2080_v12 = vunpack.c.l.bf16 %v2114_v4  ;;  %v2081_v56 = vunpack.c.h.bf16 %v2114_v4 }
 0x35d   :  { %1524 = vst.msk [vmem:[#allocation3 + $0xd8] sm:$0xff] %vm95_vm0, %v1492_v15  ;;  %v1687_v24 = vadd.f32 %v2064_v13, %v1591_v57  ;;  %v1592_v5 = vadd.f32 %v3359_v27, %v1553_v30  ;;  %1522 = vst.msk [vmem:[#allocation3 + $0xc8] sm:$0xff] %vm95_vm0, %v1490_v2 }
 0x35e   :  { %v1948_v40 = vpack.c.bf16 %v1689_v8, %v1689_v8  ;;  %v1690_v63 = vadd.f32 %v2069_v20, %v1594_v11 }
 0x35f   :  { %v1946_v34 = vpack.c.bf16 %v1687_v24, %v1687_v24  ;;  %v1688_v25 = vadd.f32 %v2065_v38, %v1592_v5  ;;  %v2240_v41 = vpop.f32.mrb[24].mxu1 }
 0x360   :  { %1850 = vst.msk [vmem:[%s3598_s7 + $0x58] sm:$0xf] %vm1827_vm1, %v1948_v40  ;;  %v1949_v18 = vpack.c.bf16 %v1690_v63, %v1690_v63  ;;  %v1495_v9 = vadd.f32 %v2240_v41, %v1222_v39  ;;  %v1450_v23 = vpop.f32.mrb[25].mxu1 }
 0x361   :  { %1848 = vst.msk [vmem:[%s3598_s7 + $0x50] sm:$0xf] %vm1827_vm1, %v1946_v34  ;;  %v1947_v3 = vpack.c.bf16 %v1688_v25, %v1688_v25  ;;  %v1493_v49 = vadd.f32 %v1450_v23, %v1220_v16  ;;  %v2241_v61 = vpop.f32.mrb[26].mxu1 }
 0x362   :  { %v1558_v14 = vld [vmem:[#allocation3 + $0xd0] sm:$0xff]  ;;  %1851 = vst.msk [vmem:[%s3598_s7 + $0x5c] sm:$0xf] %vm1827_vm1, %v1949_v18  ;;  %v1556_v53 = vld [vmem:[#allocation3 + $0xc0] sm:$0xff]  ;;  %v1496_v6 = vadd.f32 %v2241_v61, %v1223_v37  ;;  %v1453_v58 = vpop.f32.mrb[27].mxu1 }
 0x363   :  { %v1597_v48 = vadd.f32 %v3359_v27, %v1558_v14  ;;  %1527 = vst.msk [vmem:[#allocation3 + $0xf0] sm:$0xff] %vm95_vm0, %v1495_v9  ;;  %v1595_v7 = vadd.f32 %v3359_v27, %v1556_v53  ;;  %1525 = vst.msk [vmem:[#allocation3 + $0xe0] sm:$0xff] %vm95_vm0, %v1493_v49  ;;  %v1494_v0 = vadd.f32 %v1453_v58, %v1221_v35 }
 0x364   :  { %1849 = vst.msk [vmem:[%s3598_s7 + $0x54] sm:$0xf] %vm1827_vm1, %v1947_v3  ;;  %v1559_v19 = vld [vmem:[#allocation3 + $0xd8] sm:$0xff]  ;;  %v1557_v29 = vld [vmem:[#allocation3 + $0xc8] sm:$0xff] }
 0x365   :  { %v1693_v31 = vadd.f32 %v2076_v55, %v1597_v48  ;;  %v1598_v32 = vadd.f32 %v3359_v27, %v1559_v19  ;;  %1528 = vst.msk [vmem:[#allocation3 + $0xf8] sm:$0xff] %vm95_vm0, %v1496_v6  ;;  %v1691_v22 = vadd.f32 %v2072_v54, %v1595_v7  ;;  %v1596_v59 = vadd.f32 %v3359_v27, %v1557_v29 }
 0x366   :  { %1526 = vst.msk [vmem:[#allocation3 + $0xe8] sm:$0xff] %vm95_vm0, %v1494_v0 }
 0x367   :  { %v1952_v17 = vpack.c.bf16 %v1693_v31, %v1693_v31  ;;  %v1694_v28 = vadd.f32 %v2077_v43, %v1598_v32  ;;  %v1950_v33 = vpack.c.bf16 %v1691_v22, %v1691_v22  ;;  %v1692_v21 = vadd.f32 %v2073_v50, %v1596_v59 }
 0x369   :  { %1854 = vst.msk [vmem:[%s3598_s7 + $0x68] sm:$0xf] %vm1827_vm1, %v1952_v17  ;;  %v1953_v44 = vpack.c.bf16 %v1694_v28, %v1694_v28  ;;  %1852 = vst.msk [vmem:[%s3598_s7 + $0x60] sm:$0xf] %vm1827_vm1, %v1950_v33  ;;  %v1951_v47 = vpack.c.bf16 %v1692_v21, %v1692_v21 }
 0x36a   :  { %v1562_v52 = vld [vmem:[#allocation3 + $0xf0] sm:$0xff]  ;;  %v1560_v13 = vld [vmem:[#allocation3 + $0xe0] sm:$0xff] }
 0x36b   :  { %1855 = vst.msk [vmem:[%s3598_s7 + $0x6c] sm:$0xf] %vm1827_vm1, %v1953_v44  ;;  %v1601_v1 = vadd.f32 %v3359_v27, %v1562_v52  ;;  %1853 = vst.msk [vmem:[%s3598_s7 + $0x64] sm:$0xf] %vm1827_vm1, %v1951_v47  ;;  %v1599_v10 = vadd.f32 %v3359_v27, %v1560_v13 }
 0x36c   :  { %v1563_v62 = vld [vmem:[#allocation3 + $0xf8] sm:$0xff] }
 0x36d   :  { %v1697_v20 = vadd.f32 %v2084_v46, %v1601_v1  ;;  %v1602_v15 = vadd.f32 %v3359_v27, %v1563_v62  ;;  %v1561_v36 = vld [vmem:[#allocation3 + $0xe8] sm:$0xff]  ;;  %v1695_v57 = vadd.f32 %v2080_v12, %v1599_v10 }
 0x36e   :  { %v1600_v26 = vadd.f32 %v3359_v27, %v1561_v36 }
 0x36f   :  { %v1956_v38 = vpack.c.bf16 %v1697_v20, %v1697_v20  ;;  %v1698_v2 = vadd.f32 %v2085_v42, %v1602_v15  ;;  %v1954_v8 = vpack.c.bf16 %v1695_v57, %v1695_v57 }
 0x370   :  { %v1696_v11 = vadd.f32 %v2081_v56, %v1600_v26 }
 0x371   :  { %1858 = vst.msk [vmem:[%s3598_s7 + $0x78] sm:$0xf] %vm1827_vm1, %v1956_v38  ;;  %v1957_v30 = vpack.c.bf16 %v1698_v2, %v1698_v2  ;;  %1856 = vst.msk [vmem:[%s3598_s7 + $0x70] sm:$0xf] %vm1827_vm1, %v1954_v8 }
 0x372   :  { %v1955_v24 = vpack.c.bf16 %v1696_v11, %v1696_v11 }
 0x373   :  { %1859 = vst.msk [vmem:[%s3598_s7 + $0x7c] sm:$0xf] %vm1827_vm1, %v1957_v30 }
 0x374   :  { %1857 = vst.msk [vmem:[%s3598_s7 + $0x74] sm:$0xf] %vm1827_vm1, %v1955_v24 }

</bundles_post_ra>
